<compile_context>
chip_gen: v7x
topology: tpu7x:2x2x1
jax: 0.10.0
libtpu: 0.0.40
codegen_flags: <defaults>
</compile_context>

<pallas_src>
import functools

import jax
import jax.numpy as jnp
from jax import lax
from jax.experimental import pallas as pl
from jax.experimental.pallas import tpu as pltpu

# k_size -> (inner kernel k0, dilated kernel ks, dilation, dilated padding)
_LSKA_CFG = {
    7:  dict(k0=3, ks=3,  dil=2, pad_s=2),
    11: dict(k0=3, ks=5,  dil=2, pad_s=4),
    23: dict(k0=5, ks=7,  dil=3, pad_s=9),
    35: dict(k0=5, ks=11, dil=3, pad_s=15),
    41: dict(k0=5, ks=13, dil=3, pad_s=18),
    53: dict(k0=5, ks=17, dil=3, pad_s=24),
}

_LANE = 128


def _round_up(x, m):
    return (x + m - 1) // m * m


def _cdiv(a, b):
    return -(-a // b)


def _vmem_need_bytes(th, W, Cp, k0, ks, halo, pad_s, PW):
    """Rough per-core VMEM footprint for a given tile_h (f32 bytes)."""
    Wp = W + 2 * PW
    R = th + 2 * halo
    n2 = th + 2 * pad_s
    pipeline = 2 * R * Wp + 2 * th * W + n2 * Wp     # dbl-buffered in/out + pad_c
    live = W * (R + n2 + 2 * th)                     # spilled a0 / b0|c0 / d, attn
    param = 2 * Cp + 2 * (2 * k0 + 2 * ks + 5)       # resident weights (w1 dominant)
    return 4 * Cp * (pipeline + live + param)


def _pick_tile_h(H, W, Cp, k0, ks, halo, pad_s, PW, budget_bytes):
    """Largest tile_h whose footprint fits the per-generation VMEM budget."""
    for th in (128, 96, 64, 48, 40, 32, 24, 16, 8):
        if th > max(8, H):
            continue
        if _vmem_need_bytes(th, W, Cp, k0, ks, halo, pad_s, PW) <= budget_bytes:
            return th
    return 8


def _lska_kernel(x_ref, w0h_ref, b0h_ref, w0v_ref, b0v_ref,
                 wsh_ref, bsh_ref, wsv_ref, bsv_ref, w1_ref, b1_ref,
                 o_ref, pad_c_ref,
                 *, h_img, tile_h, pad0, pad_s, dil, halo, pw, precision):
    row0 = pl.program_id(1) * tile_h        # first output row (image coords)

    R, Wp, Cp = x_ref.shape                 # R  = tile_h + 2*halo
    n2 = pad_c_ref.shape[0]                 # n2 = tile_h + 2*pad_s
    W = o_ref.shape[1]
    PW = pw                                 # sublane-aligned W margin
    k0 = w0h_ref.shape[0]
    ks = wsh_ref.shape[0]

    # Zero exactly the pad_s-wide W margins conv_spatial_h reads (its zero
    # 'same' padding).  The input stripe's own W margins arrive already zeroed
    # with the auto-pipelined fetch of the pre-padded HBM copy.
    pad_c_ref[:, PW - pad_s:PW, :] = jnp.zeros((n2, pad_s, Cp), jnp.float32)
    pad_c_ref[:, PW + W:PW + W + pad_s, :] = jnp.zeros((n2, pad_s, Cp), jnp.float32)

    # In-image row masks.  Out-of-image *input* rows are already zero, so the
    # vertical convs' zero padding only needs the biases / b0 masked — no
    # full-slab jnp.where over the activations.
    lrow = row0 - halo + lax.broadcasted_iota(jnp.int32, (R, 1, 1), 0)
    mask_r = ((lrow >= 0) & (lrow < h_img)).astype(jnp.float32)
    mrow = row0 - pad_s + lax.broadcasted_iota(jnp.int32, (n2, 1, 1), 0)
    mask_n = ((mrow >= 0) & (mrow < h_img)).astype(jnp.float32)

    # ---- conv0h: depthwise 1 x k0 along W ---------------------------------
    w0h = w0h_ref[...]
    base0 = PW - pad0
    a0 = x_ref[:, base0:base0 + W, :] * w0h[0:1, :]
    for t in range(1, k0):
        a0 = a0 + x_ref[:, base0 + t:base0 + t + W, :] * w0h[t:t + 1, :]
    a0 = a0 + b0h_ref[...] * mask_r         # taps are exactly 0 on halo rows

    # ---- conv0v: depthwise k0 x 1 along H (halo rows supply the padding) --
    w0v = w0v_ref[...]
    b0 = a0[0:n2] * w0v[0:1, :]
    for t in range(1, k0):
        b0 = b0 + a0[t:t + n2] * w0v[t:t + 1, :]
    b0 = b0 + b0v_ref[...]

    # b0 rows outside the image must be zero before conv_spatial_v sees them
    # (through conv_spatial_h); skip the multiply on interior stripes.
    interior = (row0 >= pad_s) & (row0 + tile_h + pad_s <= h_img)

    @pl.when(interior)
    def _():
        pad_c_ref[:, PW:PW + W, :] = b0

    @pl.when(jnp.logical_not(interior))
    def _():
        pad_c_ref[:, PW:PW + W, :] = b0 * mask_n

    # ---- conv_spatial_h: depthwise 1 x ks, dilation dil, along W ----------
    wsh = wsh_ref[...]
    base_s = PW - pad_s
    c0 = pad_c_ref[:, base_s:base_s + W, :] * wsh[0:1, :]
    for t in range(1, ks):
        c0 = c0 + pad_c_ref[:, base_s + t * dil:base_s + t * dil + W, :] * wsh[t:t + 1, :]
    c0 = c0 + bsh_ref[...] * mask_n         # keep out-of-image rows at zero

    # ---- conv_spatial_v: depthwise ks x 1, dilation dil, along H ----------
    wsv = wsv_ref[...]
    d = c0[0:tile_h] * wsv[0:1, :]
    for t in range(1, ks):
        d = d + c0[t * dil:t * dil + tile_h] * wsv[t:t + 1, :]
    d = d + bsv_ref[...]

    # ---- conv1 (1x1 on the MXU) with the u * attn gate fused in -----------
    u = x_ref[halo:halo + tile_h, PW:PW + W, :]          # original x rows
    attn = jnp.dot(d.reshape(tile_h * W, Cp), w1_ref[...],
                   preferred_element_type=jnp.float32,
                   precision=precision) + b1_ref[...]
    o_ref[...] = (u.reshape(tile_h * W, Cp) * attn).reshape(tile_h, W, Cp)


def lska_forward_nhwc(x, params, k_size, *, tile_h=None, precision=None):
    """LSKA forward.  x: (B, H, W, C) float32.  params: depthwise weights
    (k, C), biases (1, C), 1x1 weight (C, C), bias (1, C).  Returns u * attn,
    shape (B, H, W, C)."""
    cfg = _LSKA_CFG[k_size]
    k0, ks, dil, pad_s = cfg['k0'], cfg['ks'], cfg['dil'], cfg['pad_s']
    pad0 = (k0 - 1) // 2
    halo = pad0 + pad_s

    B, H, W, C = x.shape
    Cp = _round_up(max(C, _LANE), _LANE)        # lane-dense channels
    PW = _round_up(pad_s, 8)                    # sublane-aligned W margin
    Wp = W + 2 * PW

    # Per-generation VMEM budget (v5e/v6e: 128 MiB, v7x: 64 MiB per core).
    try:
        vmem_cap = int(pltpu.get_tpu_info().vmem_capacity_bytes)
    except Exception:                           # conservative fallback
        vmem_cap = 64 * 1024 * 1024
    budget = min(int(vmem_cap * 0.55), 72 * 1024 * 1024)

    if tile_h is None:
        th = _pick_tile_h(H, W, Cp, k0, ks, halo, pad_s, PW, budget)
        # Keep both v7x TensorCores busy when the batch alone cannot.
        if B * _cdiv(H, th) < 2 and H >= 16:
            th = min(H, max(8, _round_up(_cdiv(H, 2), 8)))
    else:
        th = tile_h
    th = max(1, min(th, H))

    nH = _cdiv(H, th)
    R = th + 2 * halo                           # rows per fetched stripe
    n2 = th + 2 * pad_s
    Hp = nH * th + 2 * halo                     # padded H of the HBM copy

    vmem_need = _vmem_need_bytes(th, W, Cp, k0, ks, halo, pad_s, PW)
    vmem_limit = int(min(max(vmem_need + (16 << 20), 32 << 20),
                         100 * 1024 * 1024, vmem_cap))

    w0h, b0h, w0v, b0v, wsh, bsh, wsv, bsv, w1, b1 = params

    def pad_lane(a):                            # (k, C) -> (k, Cp)
        return jnp.pad(a.astype(jnp.float32), ((0, 0), (0, Cp - C)))

    # Pre-pad once in HBM (H halo rows, W 'same' margins, channel lanes), then
    # materialize the overlapping row stripes so the auto-pipeliner can
    # double-buffer the halo'ed fetch — no blocking in-kernel DMA.
    x_pad = jnp.pad(x.astype(jnp.float32),
                    ((0, 0), (halo, Hp - H - halo), (PW, PW), (0, Cp - C)))
    if nH == 1:
        x_win = x_pad[:, None]                  # (B, 1, R, Wp, Cp)
    else:
        row_idx = jnp.arange(nH)[:, None] * th + jnp.arange(R)[None, :]
        x_win = x_pad[:, row_idx]               # (B, nH, R, Wp, Cp)
    w1p = jnp.pad(w1.astype(jnp.float32), ((0, Cp - C), (0, Cp - C)))

    kernel = functools.partial(_lska_kernel, h_img=H, tile_h=th, pad0=pad0,
                               pad_s=pad_s, dil=dil, halo=halo, pw=PW,
                               precision=precision)

    def const_spec(shape):                      # tiny resident parameters
        return pl.BlockSpec(shape, lambda b, h: (0, 0))

    flops = int(B * nH * th * W * Cp * (4 * (k0 + ks) + 2 * Cp + 1))
    bytes_accessed = int(4 * (B * nH * (R * Wp + th * W) * Cp
                              + Cp * Cp + (2 * k0 + 2 * ks + 5) * Cp))

    out = pl.pallas_call(
        kernel,
        out_shape=jax.ShapeDtypeStruct((B, nH * th, W, Cp), jnp.float32),
        grid_spec=pltpu.PrefetchScalarGridSpec(
            num_scalar_prefetch=0,
            grid=(B, nH),
            in_specs=[
                pl.BlockSpec((None, None, R, Wp, Cp),
                             lambda b, h: (b, h, 0, 0, 0)),   # halo'ed stripe
                const_spec((k0, Cp)), const_spec((1, Cp)),    # conv0h
                const_spec((k0, Cp)), const_spec((1, Cp)),    # conv0v
                const_spec((ks, Cp)), const_spec((1, Cp)),    # conv_spatial_h
                const_spec((ks, Cp)), const_spec((1, Cp)),    # conv_spatial_v
                const_spec((Cp, Cp)), const_spec((1, Cp)),    # conv1 (1x1)
            ],
            out_specs=pl.BlockSpec((None, th, W, Cp),
                                   lambda b, h: (b, h, 0, 0)),
            scratch_shapes=[
                pltpu.VMEM((n2, Wp, Cp), jnp.float32),   # W-padded conv0v output
            ]),
        compiler_params=pltpu.CompilerParams(
            dimension_semantics=("parallel", "parallel"),
            vmem_limit_bytes=vmem_limit),
        cost_estimate=pl.CostEstimate(flops=flops, transcendentals=0,
                                      bytes_accessed=bytes_accessed),
    )(x_win,
      pad_lane(w0h), pad_lane(b0h), pad_lane(w0v), pad_lane(b0v),
      pad_lane(wsh), pad_lane(bsh), pad_lane(wsv), pad_lane(bsv),
      w1p, pad_lane(b1))

    if nH * th != H:
        out = out[:, :H]
    if Cp != C:
        out = out[..., :C]
    return out


def _ref_lska_nchw(x, params, k_size):
    # Pure-JAX reference mirroring the PyTorch NCHW conv semantics.
    cfg = _LSKA_CFG[k_size]
    w0h, b0h, w0v, b0v, wsh, bsh, wsv, bsv, w1, b1 = params
    C = x.shape[1]

    def dw(x, w_kc, b, horizontal, dil, pad):
        k = w_kc.shape[0]
        if horizontal:
            rhs = w_kc.T.reshape(C, 1, 1, k)
            padding = [(0, 0), (pad, pad)]
            rhs_dil = (1, dil)
        else:
            rhs = w_kc.T.reshape(C, 1, k, 1)
            padding = [(pad, pad), (0, 0)]
            rhs_dil = (dil, 1)
        y = lax.conv_general_dilated(
            x, rhs, window_strides=(1, 1), padding=padding,
            rhs_dilation=rhs_dil,
            dimension_numbers=('NCHW', 'OIHW', 'NCHW'),
            feature_group_count=C)
        return y + b.reshape(1, C, 1, 1)

    pad0 = (cfg['k0'] - 1) // 2
    attn = dw(x, w0h, b0h, True, 1, pad0)
    attn = dw(attn, w0v, b0v, False, 1, pad0)
    attn = dw(attn, wsh, bsh, True, cfg['dil'], cfg['pad_s'])
    attn = dw(attn, wsv, bsv, False, cfg['dil'], cfg['pad_s'])
    attn = jnp.einsum('bihw,io->bohw', attn, w1) + b1.reshape(1, C, 1, 1)
    return x * attn


if __name__ == "__main__":
    def run_case(key, k_size, B, C, H, W, tile_h=None):
        cfg = _LSKA_CFG[k_size]
        k0, ks = cfg['k0'], cfg['ks']
        keys = jax.random.split(key, 11)

        def rnd(k, shape, scale=0.2):
            return scale * jax.random.normal(k, shape, jnp.float32)

        params = (
            rnd(keys[0], (k0, C)), rnd(keys[1], (1, C)),     # conv0h
            rnd(keys[2], (k0, C)), rnd(keys[3], (1, C)),     # conv0v
            rnd(keys[4], (ks, C)), rnd(keys[5], (1, C)),     # conv_spatial_h
            rnd(keys[6], (ks, C)), rnd(keys[7], (1, C)),     # conv_spatial_v
            rnd(keys[8], (C, C)),  rnd(keys[9], (1, C)),     # conv1 (1x1)
        )
        x_nchw = jax.random.normal(keys[10], (B, C, H, W), jnp.float32)
        x_nhwc = jnp.transpose(x_nchw, (0, 2, 3, 1))

        out_nhwc = jax.block_until_ready(
            lska_forward_nhwc(x_nhwc, params, k_size, tile_h=tile_h))
        out_nchw = jnp.transpose(out_nhwc, (0, 3, 1, 2))

        ref = _ref_lska_nchw(x_nchw, params, k_size)
        assert out_nchw.shape == ref.shape
        assert jnp.allclose(out_nchw, ref, rtol=1e-4, atol=1e-4), (
            f"LSKA kernel mismatch vs reference (k_size={k_size})")

    k_a, k_b, k_c = jax.random.split(jax.random.PRNGKey(0), 3)
    # Base config (matches the module spec shapes).
    run_case(k_a, k_size=7, B=2, C=4, H=16, W=16)
    # Dilated taps, H not a multiple of the tile, channel padding, 2 stripes.
    run_case(k_b, k_size=23, B=1, C=6, H=12, W=8)
    # Forced small tile: exercises interior (unmasked) and boundary stripes.
    run_case(k_c, k_size=11, B=1, C=3, H=24, W=8, tile_h=8)
    print("KERNEL_OK")
</pallas_src>

<mosaic_0001>
module attributes {stable_mosaic.version = 11 : i64} {
  func.func @_lska_kernel(%arg0: i32, %arg1: i32, %arg2: memref<1x1x22x32x128xf32, #tpu.memory_space<vmem>>, %arg3: memref<3x128xf32, #tpu.memory_space<vmem>>, %arg4: memref<1x128xf32, #tpu.memory_space<vmem>>, %arg5: memref<3x128xf32, #tpu.memory_space<vmem>>, %arg6: memref<1x128xf32, #tpu.memory_space<vmem>>, %arg7: memref<3x128xf32, #tpu.memory_space<vmem>>, %arg8: memref<1x128xf32, #tpu.memory_space<vmem>>, %arg9: memref<3x128xf32, #tpu.memory_space<vmem>>, %arg10: memref<1x128xf32, #tpu.memory_space<vmem>>, %arg11: memref<128x128xf32, #tpu.memory_space<vmem>>, %arg12: memref<1x128xf32, #tpu.memory_space<vmem>>, %arg13: memref<1x16x16x128xf32, #tpu.memory_space<vmem>>, %arg14: memref<20x32x128xf32, #tpu.memory_space<vmem>>) attributes {dimension_semantics = [#tpu.dimension_semantics<parallel>, #tpu.dimension_semantics<parallel>], iteration_bounds = array<i64: 2, 1>, scalar_prefetch = 0 : i64, scratch_operands = 1 : i64, tpu.core_type = #tpu.core_type<tc>, window_params = [{transform_indices = @transform_0, window_bounds = array<i64: 1, 1, 22, 32, 128>}, {pipeline_mode = #tpu.pipeline_mode<synchronous>, transform_indices = @transform_1, window_bounds = array<i64: 3, 128>}, {pipeline_mode = #tpu.pipeline_mode<synchronous>, transform_indices = @transform_2, window_bounds = array<i64: 1, 128>}, {pipeline_mode = #tpu.pipeline_mode<synchronous>, transform_indices = @transform_3, window_bounds = array<i64: 3, 128>}, {pipeline_mode = #tpu.pipeline_mode<synchronous>, transform_indices = @transform_4, window_bounds = array<i64: 1, 128>}, {pipeline_mode = #tpu.pipeline_mode<synchronous>, transform_indices = @transform_5, window_bounds = array<i64: 3, 128>}, {pipeline_mode = #tpu.pipeline_mode<synchronous>, transform_indices = @transform_6, window_bounds = array<i64: 1, 128>}, {pipeline_mode = #tpu.pipeline_mode<synchronous>, transform_indices = @transform_7, window_bounds = array<i64: 3, 128>}, {pipeline_mode = #tpu.pipeline_mode<synchronous>, transform_indices = @transform_8, window_bounds = array<i64: 1, 128>}, {pipeline_mode = #tpu.pipeline_mode<synchronous>, transform_indices = @transform_9, window_bounds = array<i64: 128, 128>}, {pipeline_mode = #tpu.pipeline_mode<synchronous>, transform_indices = @transform_10, window_bounds = array<i64: 1, 128>}, {transform_indices = @transform_11, window_bounds = array<i64: 1, 16, 16, 128>}]} {
    %c16_i32 = arith.constant 16 : i32
    %0 = arith.muli %arg1, %c16_i32 : i32
    %cst = arith.constant 0.000000e+00 : f32
    %1 = vector.broadcast %cst : f32 to vector<20x2x128xf32>
    %c0 = arith.constant 0 : index
    %c6 = arith.constant 6 : index
    %c0_0 = arith.constant 0 : index
    %2 = vector.load %arg14[%c0, %c6, %c0_0] : memref<20x32x128xf32, #tpu.memory_space<vmem>>, vector<20x2x128xf32>
    tpu.vector_store %arg14[%c0, %c6, %c0_0], %1 {strides = array<i32>} : memref<20x32x128xf32, #tpu.memory_space<vmem>>, vector<20x2x128xf32>,
    %cst_1 = arith.constant 0.000000e+00 : f32
    %3 = vector.broadcast %cst_1 : f32 to vector<20x2x128xf32>
    %c0_2 = arith.constant 0 : index
    %c24 = arith.constant 24 : index
    %c0_3 = arith.constant 0 : index
    %4 = vector.load %arg14[%c0_2, %c24, %c0_3] : memref<20x32x128xf32, #tpu.memory_space<vmem>>, vector<20x2x128xf32>
    tpu.vector_store %arg14[%c0_2, %c24, %c0_3], %3 {strides = array<i32>} : memref<20x32x128xf32, #tpu.memory_space<vmem>>, vector<20x2x128xf32>,
    %c3_i32 = arith.constant 3 : i32
    %5 = arith.subi %0, %c3_i32 : i32
    %6 = tpu.iota {dimensions = array<i32: 0>} : vector<22x1x1xi32>
    %7 = vector.broadcast %5 : i32 to vector<22x1x1xi32>
    %8 = arith.addi %7, %6 : vector<22x1x1xi32>
    %c0_i32 = arith.constant 0 : i32
    %9 = vector.broadcast %c0_i32 : i32 to vector<22x1x1xi32>
    %10 = arith.cmpi sge, %8, %9 : vector<22x1x1xi32>
    %c16_i32_4 = arith.constant 16 : i32
    %11 = vector.broadcast %c16_i32_4 : i32 to vector<22x1x1xi32>
    %12 = arith.cmpi slt, %8, %11 : vector<22x1x1xi32>
    %13 = arith.andi %10, %12 : vector<22x1x1xi1>
    %14 = arith.extui %13 : vector<22x1x1xi1> to vector<22x1x1xi32>
    %15 = arith.sitofp %14 : vector<22x1x1xi32> to vector<22x1x1xf32>
    %c2_i32 = arith.constant 2 : i32
    %16 = arith.subi %0, %c2_i32 : i32
    %17 = tpu.iota {dimensions = array<i32: 0>} : vector<20x1x1xi32>
    %18 = vector.broadcast %16 : i32 to vector<20x1x1xi32>
    %19 = arith.addi %18, %17 : vector<20x1x1xi32>
    %c0_i32_5 = arith.constant 0 : i32
    %20 = vector.broadcast %c0_i32_5 : i32 to vector<20x1x1xi32>
    %21 = arith.cmpi sge, %19, %20 : vector<20x1x1xi32>
    %c16_i32_6 = arith.constant 16 : i32
    %22 = vector.broadcast %c16_i32_6 : i32 to vector<20x1x1xi32>
    %23 = arith.cmpi slt, %19, %22 : vector<20x1x1xi32>
    %24 = arith.andi %21, %23 : vector<20x1x1xi1>
    %25 = arith.extui %24 : vector<20x1x1xi1> to vector<20x1x1xi32>
    %26 = arith.sitofp %25 : vector<20x1x1xi32> to vector<20x1x1xf32>
    %c0_7 = arith.constant 0 : index
    %c0_8 = arith.constant 0 : index
    %27 = vector.load %arg3[%c0_7, %c0_8] : memref<3x128xf32, #tpu.memory_space<vmem>>, vector<3x128xf32>
    %c0_9 = arith.constant 0 : index
    %c0_10 = arith.constant 0 : index
    %c0_11 = arith.constant 0 : index
    %c7 = arith.constant 7 : index
    %c0_12 = arith.constant 0 : index
    %28 = vector.load %arg2[%c0_9, %c0_10, %c0_11, %c7, %c0_12] : memref<1x1x22x32x128xf32, #tpu.memory_space<vmem>>, vector<1x1x22x16x128xf32>
    %29 = vector.shape_cast %28 : vector<1x1x22x16x128xf32> to vector<22x16x128xf32>
    %30 = vector.extract_strided_slice %27 {offsets = [0, 0], sizes = [1, 128], strides = [1, 1]} : vector<3x128xf32> to vector<1x128xf32>
    %31 = vector.shape_cast %30 : vector<1x128xf32> to vector<1x1x128xf32>
    %32 = vector.broadcast %31 : vector<1x1x128xf32> to vector<22x16x128xf32>
    %33 = arith.mulf %29, %32 : vector<22x16x128xf32>
    %c0_13 = arith.constant 0 : index
    %c0_14 = arith.constant 0 : index
    %c0_15 = arith.constant 0 : index
    %c8 = arith.constant 8 : index
    %c0_16 = arith.constant 0 : index
    %34 = vector.load %arg2[%c0_13, %c0_14, %c0_15, %c8, %c0_16] : memref<1x1x22x32x128xf32, #tpu.memory_space<vmem>>, vector<1x1x22x16x128xf32>
    %35 = vector.shape_cast %34 : vector<1x1x22x16x128xf32> to vector<22x16x128xf32>
    %36 = vector.extract_strided_slice %27 {offsets = [1, 0], sizes = [1, 128], strides = [1, 1]} : vector<3x128xf32> to vector<1x128xf32>
    %37 = vector.shape_cast %36 : vector<1x128xf32> to vector<1x1x128xf32>
    %38 = vector.broadcast %37 : vector<1x1x128xf32> to vector<22x16x128xf32>
    %39 = arith.mulf %35, %38 : vector<22x16x128xf32>
    %40 = arith.addf %33, %39 : vector<22x16x128xf32>
    %c0_17 = arith.constant 0 : index
    %c0_18 = arith.constant 0 : index
    %c0_19 = arith.constant 0 : index
    %c9 = arith.constant 9 : index
    %c0_20 = arith.constant 0 : index
    %41 = vector.load %arg2[%c0_17, %c0_18, %c0_19, %c9, %c0_20] : memref<1x1x22x32x128xf32, #tpu.memory_space<vmem>>, vector<1x1x22x16x128xf32>
    %42 = vector.shape_cast %41 : vector<1x1x22x16x128xf32> to vector<22x16x128xf32>
    %43 = vector.extract_strided_slice %27 {offsets = [2, 0], sizes = [1, 128], strides = [1, 1]} : vector<3x128xf32> to vector<1x128xf32>
    %44 = vector.shape_cast %43 : vector<1x128xf32> to vector<1x1x128xf32>
    %45 = vector.broadcast %44 : vector<1x1x128xf32> to vector<22x16x128xf32>
    %46 = arith.mulf %42, %45 : vector<22x16x128xf32>
    %47 = arith.addf %40, %46 : vector<22x16x128xf32>
    %c0_21 = arith.constant 0 : index
    %c0_22 = arith.constant 0 : index
    %48 = vector.load %arg4[%c0_21, %c0_22] : memref<1x128xf32, #tpu.memory_space<vmem>>, vector<1x128xf32>
    %49 = vector.shape_cast %48 : vector<1x128xf32> to vector<1x1x128xf32>
    %50 = vector.broadcast %49 : vector<1x1x128xf32> to vector<22x1x128xf32>
    %51 = vector.broadcast %15 : vector<22x1x1xf32> to vector<22x1x128xf32>
    %52 = arith.mulf %50, %51 : vector<22x1x128xf32>
    %53 = vector.broadcast %52 : vector<22x1x128xf32> to vector<22x16x128xf32>
    %54 = arith.addf %47, %53 : vector<22x16x128xf32>
    %c0_23 = arith.constant 0 : index
    %c0_24 = arith.constant 0 : index
    %55 = vector.load %arg5[%c0_23, %c0_24] : memref<3x128xf32, #tpu.memory_space<vmem>>, vector<3x128xf32>
    %56 = vector.extract_strided_slice %54 {offsets = [0, 0, 0], sizes = [20, 16, 128], strides = [1, 1, 1]} : vector<22x16x128xf32> to vector<20x16x128xf32>
    %57 = vector.extract_strided_slice %55 {offsets = [0, 0], sizes = [1, 128], strides = [1, 1]} : vector<3x128xf32> to vector<1x128xf32>
    %58 = vector.shape_cast %57 : vector<1x128xf32> to vector<1x1x128xf32>
    %59 = vector.broadcast %58 : vector<1x1x128xf32> to vector<20x16x128xf32>
    %60 = arith.mulf %56, %59 : vector<20x16x128xf32>
    %61 = vector.extract_strided_slice %54 {offsets = [1, 0, 0], sizes = [20, 16, 128], strides = [1, 1, 1]} : vector<22x16x128xf32> to vector<20x16x128xf32>
    %62 = vector.extract_strided_slice %55 {offsets = [1, 0], sizes = [1, 128], strides = [1, 1]} : vector<3x128xf32> to vector<1x128xf32>
    %63 = vector.shape_cast %62 : vector<1x128xf32> to vector<1x1x128xf32>
    %64 = vector.broadcast %63 : vector<1x1x128xf32> to vector<20x16x128xf32>
    %65 = arith.mulf %61, %64 : vector<20x16x128xf32>
    %66 = arith.addf %60, %65 : vector<20x16x128xf32>
    %67 = vector.extract_strided_slice %54 {offsets = [2, 0, 0], sizes = [20, 16, 128], strides = [1, 1, 1]} : vector<22x16x128xf32> to vector<20x16x128xf32>
    %68 = vector.extract_strided_slice %55 {offsets = [2, 0], sizes = [1, 128], strides = [1, 1]} : vector<3x128xf32> to vector<1x128xf32>
    %69 = vector.shape_cast %68 : vector<1x128xf32> to vector<1x1x128xf32>
    %70 = vector.broadcast %69 : vector<1x1x128xf32> to vector<20x16x128xf32>
    %71 = arith.mulf %67, %70 : vector<20x16x128xf32>
    %72 = arith.addf %66, %71 : vector<20x16x128xf32>
    %c0_25 = arith.constant 0 : index
    %c0_26 = arith.constant 0 : index
    %73 = vector.load %arg6[%c0_25, %c0_26] : memref<1x128xf32, #tpu.memory_space<vmem>>, vector<1x128xf32>
    %74 = vector.shape_cast %73 : vector<1x128xf32> to vector<1x1x128xf32>
    %75 = vector.broadcast %74 : vector<1x1x128xf32> to vector<20x16x128xf32>
    %76 = arith.addf %72, %75 : vector<20x16x128xf32>
    %c2_i32_27 = arith.constant 2 : i32
    %77 = arith.cmpi sge, %0, %c2_i32_27 : i32
    %c16_i32_28 = arith.constant 16 : i32
    %78 = arith.addi %0, %c16_i32_28 : i32
    %c2_i32_29 = arith.constant 2 : i32
    %79 = arith.addi %78, %c2_i32_29 : i32
    %c16_i32_30 = arith.constant 16 : i32
    %80 = arith.cmpi sle, %79, %c16_i32_30 : i32
    %81 = arith.andi %77, %80 : i1
    %82 = arith.extui %81 : i1 to i32
    %c0_i32_31 = arith.constant 0 : i32
    %83 = arith.cmpi ne, %82, %c0_i32_31 : i32
    scf.if %83 {
      %c0_62 = arith.constant 0 : index
      %c8_63 = arith.constant 8 : index
      %c0_64 = arith.constant 0 : index
      %148 = vector.load %arg14[%c0_62, %c8_63, %c0_64] : memref<20x32x128xf32, #tpu.memory_space<vmem>>, vector<20x16x128xf32>
      tpu.vector_store %arg14[%c0_62, %c8_63, %c0_64], %76 {strides = array<i32>} : memref<20x32x128xf32, #tpu.memory_space<vmem>>, vector<20x16x128xf32>,
    } else {
    }
    %true = arith.constant true
    %84 = arith.xori %81, %true : i1
    %85 = arith.extui %84 : i1 to i32
    %c0_i32_32 = arith.constant 0 : i32
    %86 = arith.cmpi ne, %85, %c0_i32_32 : i32
    scf.if %86 {
      %148 = vector.broadcast %26 : vector<20x1x1xf32> to vector<20x16x128xf32>
      %149 = arith.mulf %76, %148 : vector<20x16x128xf32>
      %c0_62 = arith.constant 0 : index
      %c8_63 = arith.constant 8 : index
      %c0_64 = arith.constant 0 : index
      %150 = vector.load %arg14[%c0_62, %c8_63, %c0_64] : memref<20x32x128xf32, #tpu.memory_space<vmem>>, vector<20x16x128xf32>
      tpu.vector_store %arg14[%c0_62, %c8_63, %c0_64], %149 {strides = array<i32>} : memref<20x32x128xf32, #tpu.memory_space<vmem>>, vector<20x16x128xf32>,
    } else {
    }
    %c0_33 = arith.constant 0 : index
    %c0_34 = arith.constant 0 : index
    %87 = vector.load %arg7[%c0_33, %c0_34] : memref<3x128xf32, #tpu.memory_space<vmem>>, vector<3x128xf32>
    %c0_35 = arith.constant 0 : index
    %c6_36 = arith.constant 6 : index
    %c0_37 = arith.constant 0 : index
    %88 = vector.load %arg14[%c0_35, %c6_36, %c0_37] : memref<20x32x128xf32, #tpu.memory_space<vmem>>, vector<20x16x128xf32>
    %89 = vector.extract_strided_slice %87 {offsets = [0, 0], sizes = [1, 128], strides = [1, 1]} : vector<3x128xf32> to vector<1x128xf32>
    %90 = vector.shape_cast %89 : vector<1x128xf32> to vector<1x1x128xf32>
    %91 = vector.broadcast %90 : vector<1x1x128xf32> to vector<20x16x128xf32>
    %92 = arith.mulf %88, %91 : vector<20x16x128xf32>
    %c0_38 = arith.constant 0 : index
    %c8_39 = arith.constant 8 : index
    %c0_40 = arith.constant 0 : index
    %93 = vector.load %arg14[%c0_38, %c8_39, %c0_40] : memref<20x32x128xf32, #tpu.memory_space<vmem>>, vector<20x16x128xf32>
    %94 = vector.extract_strided_slice %87 {offsets = [1, 0], sizes = [1, 128], strides = [1, 1]} : vector<3x128xf32> to vector<1x128xf32>
    %95 = vector.shape_cast %94 : vector<1x128xf32> to vector<1x1x128xf32>
    %96 = vector.broadcast %95 : vector<1x1x128xf32> to vector<20x16x128xf32>
    %97 = arith.mulf %93, %96 : vector<20x16x128xf32>
    %98 = arith.addf %92, %97 : vector<20x16x128xf32>
    %c0_41 = arith.constant 0 : index
    %c10 = arith.constant 10 : index
    %c0_42 = arith.constant 0 : index
    %99 = vector.load %arg14[%c0_41, %c10, %c0_42] : memref<20x32x128xf32, #tpu.memory_space<vmem>>, vector<20x16x128xf32>
    %100 = vector.extract_strided_slice %87 {offsets = [2, 0], sizes = [1, 128], strides = [1, 1]} : vector<3x128xf32> to vector<1x128xf32>
    %101 = vector.shape_cast %100 : vector<1x128xf32> to vector<1x1x128xf32>
    %102 = vector.broadcast %101 : vector<1x1x128xf32> to vector<20x16x128xf32>
    %103 = arith.mulf %99, %102 : vector<20x16x128xf32>
    %104 = arith.addf %98, %103 : vector<20x16x128xf32>
    %c0_43 = arith.constant 0 : index
    %c0_44 = arith.constant 0 : index
    %105 = vector.load %arg8[%c0_43, %c0_44] : memref<1x128xf32, #tpu.memory_space<vmem>>, vector<1x128xf32>
    %106 = vector.shape_cast %105 : vector<1x128xf32> to vector<1x1x128xf32>
    %107 = vector.broadcast %106 : vector<1x1x128xf32> to vector<20x1x128xf32>
    %108 = vector.broadcast %26 : vector<20x1x1xf32> to vector<20x1x128xf32>
    %109 = arith.mulf %107, %108 : vector<20x1x128xf32>
    %110 = vector.broadcast %109 : vector<20x1x128xf32> to vector<20x16x128xf32>
    %111 = arith.addf %104, %110 : vector<20x16x128xf32>
    %c0_45 = arith.constant 0 : index
    %c0_46 = arith.constant 0 : index
    %112 = vector.load %arg9[%c0_45, %c0_46] : memref<3x128xf32, #tpu.memory_space<vmem>>, vector<3x128xf32>
    %113 = vector.extract_strided_slice %111 {offsets = [0, 0, 0], sizes = [16, 16, 128], strides = [1, 1, 1]} : vector<20x16x128xf32> to vector<16x16x128xf32>
    %114 = vector.extract_strided_slice %112 {offsets = [0, 0], sizes = [1, 128], strides = [1, 1]} : vector<3x128xf32> to vector<1x128xf32>
    %115 = vector.shape_cast %114 : vector<1x128xf32> to vector<1x1x128xf32>
    %116 = vector.broadcast %115 : vector<1x1x128xf32> to vector<16x16x128xf32>
    %117 = arith.mulf %113, %116 : vector<16x16x128xf32>
    %118 = vector.extract_strided_slice %111 {offsets = [2, 0, 0], sizes = [16, 16, 128], strides = [1, 1, 1]} : vector<20x16x128xf32> to vector<16x16x128xf32>
    %119 = vector.extract_strided_slice %112 {offsets = [1, 0], sizes = [1, 128], strides = [1, 1]} : vector<3x128xf32> to vector<1x128xf32>
    %120 = vector.shape_cast %119 : vector<1x128xf32> to vector<1x1x128xf32>
    %121 = vector.broadcast %120 : vector<1x1x128xf32> to vector<16x16x128xf32>
    %122 = arith.mulf %118, %121 : vector<16x16x128xf32>
    %123 = arith.addf %117, %122 : vector<16x16x128xf32>
    %124 = vector.extract_strided_slice %111 {offsets = [4, 0, 0], sizes = [16, 16, 128], strides = [1, 1, 1]} : vector<20x16x128xf32> to vector<16x16x128xf32>
    %125 = vector.extract_strided_slice %112 {offsets = [2, 0], sizes = [1, 128], strides = [1, 1]} : vector<3x128xf32> to vector<1x128xf32>
    %126 = vector.shape_cast %125 : vector<1x128xf32> to vector<1x1x128xf32>
    %127 = vector.broadcast %126 : vector<1x1x128xf32> to vector<16x16x128xf32>
    %128 = arith.mulf %124, %127 : vector<16x16x128xf32>
    %129 = arith.addf %123, %128 : vector<16x16x128xf32>
    %c0_47 = arith.constant 0 : index
    %c0_48 = arith.constant 0 : index
    %130 = vector.load %arg10[%c0_47, %c0_48] : memref<1x128xf32, #tpu.memory_space<vmem>>, vector<1x128xf32>
    %131 = vector.shape_cast %130 : vector<1x128xf32> to vector<1x1x128xf32>
    %132 = vector.broadcast %131 : vector<1x1x128xf32> to vector<16x16x128xf32>
    %133 = arith.addf %129, %132 : vector<16x16x128xf32>
    %c0_49 = arith.constant 0 : index
    %c0_50 = arith.constant 0 : index
    %c3 = arith.constant 3 : index
    %c8_51 = arith.constant 8 : index
    %c0_52 = arith.constant 0 : index
    %134 = vector.load %arg2[%c0_49, %c0_50, %c3, %c8_51, %c0_52] : memref<1x1x22x32x128xf32, #tpu.memory_space<vmem>>, vector<1x1x16x16x128xf32>
    %135 = vector.shape_cast %134 : vector<1x1x16x16x128xf32> to vector<16x16x128xf32>
    %136 = vector.shape_cast %133 : vector<16x16x128xf32> to vector<256x128xf32>
    %c0_53 = arith.constant 0 : index
    %c0_54 = arith.constant 0 : index
    %137 = vector.load %arg11[%c0_53, %c0_54] : memref<128x128xf32, #tpu.memory_space<vmem>>, vector<128x128xf32>
    %cst_55 = arith.constant dense<0.000000e+00> : vector<256x128xf32>
    %138 = tpu.matmul %136, %137, %cst_55 {dimension_numbers = #tpu.dot_dimension_numbers<[1], [0], [0], [1], [0, 0, 1, 1], [], []>} : vector<256x128xf32>, vector<128x128xf32>, vector<256x128xf32> -> vector<256x128xf32>
    %c0_56 = arith.constant 0 : index
    %c0_57 = arith.constant 0 : index
    %139 = vector.load %arg12[%c0_56, %c0_57] : memref<1x128xf32, #tpu.memory_space<vmem>>, vector<1x128xf32>
    %140 = vector.broadcast %139 : vector<1x128xf32> to vector<256x128xf32>
    %141 = arith.addf %138, %140 : vector<256x128xf32>
    %142 = vector.shape_cast %135 : vector<16x16x128xf32> to vector<256x128xf32>
    %143 = arith.mulf %142, %141 : vector<256x128xf32>
    %144 = vector.shape_cast %143 : vector<256x128xf32> to vector<16x16x128xf32>
    %c0_58 = arith.constant 0 : index
    %c0_59 = arith.constant 0 : index
    %c0_60 = arith.constant 0 : index
    %c0_61 = arith.constant 0 : index
    %145 = vector.load %arg13[%c0_58, %c0_59, %c0_60, %c0_61] : memref<1x16x16x128xf32, #tpu.memory_space<vmem>>, vector<1x16x16x128xf32>
    %146 = vector.shape_cast %145 : vector<1x16x16x128xf32> to vector<16x16x128xf32>
    %147 = vector.shape_cast %144 : vector<16x16x128xf32> to vector<1x16x16x128xf32>
    tpu.vector_store %arg13[%c0_58, %c0_59, %c0_60, %c0_61], %147 {strides = array<i32>} : memref<1x16x16x128xf32, #tpu.memory_space<vmem>>, vector<1x16x16x128xf32>,
    return
  }
  func.func @transform_0(%arg0: i32, %arg1: i32) -> (i32, i32, i32, i32, i32) {
    %c0_i32 = arith.constant 0 : i32
    %c0_i32_0 = arith.constant 0 : i32
    %c0_i32_1 = arith.constant 0 : i32
    %c0_i32_2 = arith.constant 0 : i32
    return %arg0, %arg1, %c0_i32, %c0_i32_0, %c0_i32_1 : i32, i32, i32, i32, i32
  }
  func.func @transform_1(%arg0: i32, %arg1: i32) -> (i32, i32) {
    %c0_i32 = arith.constant 0 : i32
    %c0_i32_0 = arith.constant 0 : i32
    %c0_i32_1 = arith.constant 0 : i32
    return %c0_i32, %c0_i32_0 : i32, i32
  }
  func.func @transform_2(%arg0: i32, %arg1: i32) -> (i32, i32) {
    %c0_i32 = arith.constant 0 : i32
    %c0_i32_0 = arith.constant 0 : i32
    %c0_i32_1 = arith.constant 0 : i32
    return %c0_i32, %c0_i32_0 : i32, i32
  }
  func.func @transform_3(%arg0: i32, %arg1: i32) -> (i32, i32) {
    %c0_i32 = arith.constant 0 : i32
    %c0_i32_0 = arith.constant 0 : i32
    %c0_i32_1 = arith.constant 0 : i32
    return %c0_i32, %c0_i32_0 : i32, i32
  }
  func.func @transform_4(%arg0: i32, %arg1: i32) -> (i32, i32) {
    %c0_i32 = arith.constant 0 : i32
    %c0_i32_0 = arith.constant 0 : i32
    %c0_i32_1 = arith.constant 0 : i32
    return %c0_i32, %c0_i32_0 : i32, i32
  }
  func.func @transform_5(%arg0: i32, %arg1: i32) -> (i32, i32) {
    %c0_i32 = arith.constant 0 : i32
    %c0_i32_0 = arith.constant 0 : i32
    %c0_i32_1 = arith.constant 0 : i32
    return %c0_i32, %c0_i32_0 : i32, i32
  }
  func.func @transform_6(%arg0: i32, %arg1: i32) -> (i32, i32) {
    %c0_i32 = arith.constant 0 : i32
    %c0_i32_0 = arith.constant 0 : i32
    %c0_i32_1 = arith.constant 0 : i32
    return %c0_i32, %c0_i32_0 : i32, i32
  }
  func.func @transform_7(%arg0: i32, %arg1: i32) -> (i32, i32) {
    %c0_i32 = arith.constant 0 : i32
    %c0_i32_0 = arith.constant 0 : i32
    %c0_i32_1 = arith.constant 0 : i32
    return %c0_i32, %c0_i32_0 : i32, i32
  }
  func.func @transform_8(%arg0: i32, %arg1: i32) -> (i32, i32) {
    %c0_i32 = arith.constant 0 : i32
    %c0_i32_0 = arith.constant 0 : i32
    %c0_i32_1 = arith.constant 0 : i32
    return %c0_i32, %c0_i32_0 : i32, i32
  }
  func.func @transform_9(%arg0: i32, %arg1: i32) -> (i32, i32) {
    %c0_i32 = arith.constant 0 : i32
    %c0_i32_0 = arith.constant 0 : i32
    %c0_i32_1 = arith.constant 0 : i32
    return %c0_i32, %c0_i32_0 : i32, i32
  }
  func.func @transform_10(%arg0: i32, %arg1: i32) -> (i32, i32) {
    %c0_i32 = arith.constant 0 : i32
    %c0_i32_0 = arith.constant 0 : i32
    %c0_i32_1 = arith.constant 0 : i32
    return %c0_i32, %c0_i32_0 : i32, i32
  }
  func.func @transform_11(%arg0: i32, %arg1: i32) -> (i32, i32, i32, i32) {
    %c0_i32 = arith.constant 0 : i32
    %c0_i32_0 = arith.constant 0 : i32
    %c0_i32_1 = arith.constant 0 : i32
    return %arg0, %arg1, %c0_i32, %c0_i32_0 : i32, i32, i32, i32
  }
}

</mosaic_0001>

<bundles_post_ra>
// kernel: tpu_custom_call.1
= control target key start
LH: loop header
LB: loop body
LE: loop exit
PB: predicated region body
PF: predicated region fallthrough
CT: control target
= control target key end

     0   :  { %s5116_s0 = inlined_call_operand.hbm [shape: f32[2,1,22,32,128], index: 0, kind: input, shape index: {}]   ;;  %s5117_s1 = inlined_call_operand.hbm [shape: f32[3,128], index: 1, kind: input, shape index: {}]   ;;  %s5118_s2 = inlined_call_operand.vmem [shape: f32[1,128], index: 2, kind: input, shape index: {}]   ;;  %s5119_s3 = inlined_call_operand.vmem [shape: f32[3,128], index: 3, kind: input, shape index: {}]   ;;  %s5120_s4 = inlined_call_operand.vmem [shape: f32[1,128], index: 4, kind: input, shape index: {}]   ;;  %s5121_s5 = inlined_call_operand.vmem [shape: f32[3,128], index: 5, kind: input, shape index: {}]   ;;  %s5122_s6 = inlined_call_operand.vmem [shape: f32[1,128], index: 6, kind: input, shape index: {}]   ;;  %s5123_s7 = inlined_call_operand.vmem [shape: f32[3,128], index: 7, kind: input, shape index: {}]   ;;  %s5124_s8 = inlined_call_operand.vmem [shape: f32[1,128], index: 8, kind: input, shape index: {}]   ;;  %s5125_s9 = inlined_call_operand.hbm [shape: f32[128,128], index: 9, kind: input, shape index: {}]   ;;  %s5126_s10 = inlined_call_operand.vmem [shape: f32[1,128], index: 10, kind: input, shape index: {}]   ;;  %s5127_s11 = inlined_call_operand.hbm [shape: f32[2,16,16,128], index: 11, kind: output, shape index: {}]  }
   0x1   :  { %5213 = sst [smem:[#allocation49_spill]] %s5117_s1 }
   0x2   :  { %5214 = sst [smem:[#allocation50_spill]] %s5127_s11 }
   0x3   :  { %16 = vsyncpa [#allocation4], 0 }
   0x4   :  { %18 = vsyncpa [#allocation4 + $0x1], 0 }
   0x5   :  { %19 = vsyncpa [#allocation7], 0 }
   0x6   :  { %20 = vsyncpa [#allocation5], 0 }
   0x7   :  { %22 = vsyncpa [#allocation5 + $0x1], 0  ;;  %s3460_s17 = smov 0   ;;  %s3462_s18 = smov 0  }
   0x8   :  { %s3464_s19 = smov 0   ;;  %s3466_s20 = smov 0  }
   0x9   :  { %s3468_s21 = smov 0   ;;  %s3470_s22 = smov 0  }
   0xa LB: > { %5215 = sst [smem:[#allocation13_spill]] %s3369_s17  ;;  %s2894_s23 = sadd.s32 4294967295, %s3389_s22   ;;  %s3389_s22 = sphi %s3470_s22, %s28_s22   ;;  %s3385_s21 = sphi %s3468_s21, %s5339_s21   ;;  %s3381_s20 = sphi %s3466_s20, %s5338_s20   ;;  %s3377_s19 = sphi %s3464_s19, %s5337_s19   ;;  %s3373_s18 = sphi %s3462_s18, %s5336_s18   ;;  %s3369_s17 = sphi %s3460_s17, %s5335_s17  }
   0xb   : > { %5216 = sst [smem:[#allocation14_spill]] %s3389_s22  ;;  %s2895_s24 = sadd.s32 4294967294, %s3389_s22  }
   0xc   : > { %p56_p0 = scmp.ne.s32.totalorder %s3377_s19, %s3373_s18  ;;  %p57_p1 = scmp.eq.s32.totalorder %s3389_s22, 0 }
   0xd   : > { %p62_p2 = scmp.ne.s32.totalorder %s3373_s18, %s3369_s17  ;;  %p3497_p3 = scmp.eq.s32.totalorder %s2894_s23, 0 }
   0xe   : > { %p298_p4 = scmp.eq.s32.totalorder %s2894_s23, 1  ;;  %p3501_p5 = por %p57_p1, %p56_p0 }
   0xf   : > { %s5217_s25 = scalar_select %p3497_p3, 1, 0 }
  0x10   : > { %p304_p6 = scmp.eq.s32.totalorder %s2895_s24, 1  ;;  %p3507_p7 = por %p3497_p3, %p62_p2 }
  0x11   : > { %p3511_p8 = por %p298_p4, %p56_p0  ;;  %p2896_p10 = scmp.ge.s32.totalorder %s3389_s22, 1 }
  0x12   : > { %s5219_s27 = scalar_select %p3507_p7, 1, 0 }
  0x13   : > { %s5220_s28 = scalar_select %p3511_p8, 1, 0 }
  0x14   : > { %p3515_p9 = por %p304_p6, %p62_p2  ;;  %p311_p11 = scmp.lt.s32.totalorder %s3389_s22, 3 }
  0x15   : > { %5221 = sst [smem:[#allocation15_spill]] %s5220_s28  ;;  %s3391_s12 = smov [#allocation6]  }
  0x16   : > { %s5222_s29 = scalar_select %p3515_p9, 1, 0 }
  0x17   : > { %p3522_p13 = pnand %p2896_p10, %p311_p11  ;;  %s324_s13 = sshll.u32 %s3391_s12, 4  ;;  %s325_s13 = int_to_ptr.vmem [resolvable:$true] %s324_s13 }
  0x18   : > { %5223 = sst [smem:[#allocation16_spill]] %s5222_s29  ;;  %p3154_p1 = scmp.lt.s32.totalorder %s3389_s22, 2 }
  0x19   : > { %s5224_s30 = scalar_select %p3522_p13, 1, 0 }
  0x1a   : > { %p3137_p0 = pneg %p3522_p13  ;;  %p3531_p4 = pnand %p3154_p1, %p3501_p5 }
  0x1b   : > { %s3392_s15 = smov [#allocation8]   ;;  %s5227_s1 = sld [smem:[#allocation49_spill]] }
  0x1c   : > { %s5225_s14 = scalar_select %p3531_p4, 1, 0 }
  0x1d   : > { %s355_s16 = sshll.u32 %s3392_s15, 4  ;;  %p3537_p2 = pnand %p3137_p0, %p3497_p3  ;;  %s3541_s16 = int_to_ptr.vmem [resolvable:$true] %s355_s16 }
  0x1f   : > { %p3219_p6 = pneg %p3537_p2 }
  0x21   : > { %s3217_s22 = scalar_lea.hbm %s5227_s1, 64 }
  0x22   : > { %p3218_p5 = scmp.ne.s32.totalorder %s5227_s1, %s3217_s22  ;;  %p3224_p1 = scmp.lt.u32.totalorder %s3217_s22, %s5227_s1 }
  0x24   : > { %p3220_p10 = pnand %p3219_p6, %p3218_p5 }
  0x26   : > { %p3221_p11 = pneg %p3220_p10 }
  0x28   : > { %p3226_p0 = pnand %p3224_p1, %p3221_p11 }
  0x2a   : > { %3229 = shalt.err (!%p3226_p0)
}
  0x2b   : > { %s3230_s11 = scalar_lea.vmem %s325_s13, 64  ;;  %p3238_p3 = scmp.lt.s32.totalorder %s325_s13, %s325_s13 }
  0x2c   : > { %p3231_p12 = scmp.ne.s32.totalorder %s325_s13, %s3230_s11  ;;  %p3239_p7 = scmp.lt.s32.totalorder %s3230_s11, %s3230_s11 }
  0x2e   : > { %p3233_p9 = pnand %p3231_p12, %p3219_p6  ;;  %p3240_p13 = por %p3239_p7, %p3238_p3 }
  0x30   : > { %p3234_p8 = pneg %p3233_p9 }
  0x32   : > { %p3241_p4 = pnand %p3240_p13, %p3234_p8 }
  0x34   : > { %3244 = shalt.err (!%p3241_p4)
}
  0x35   : > { %3140 = dma.hbm_to_vmem [thread:$0]  (!%p3537_p2), %s5227_s1, 64, %s325_s13, [#allocation7]  }
  0x36   : > { %s3245_s12 = scalar_lea.hbm %s5125_s9, 2048 }
  0x37   : > { %p3246_p9 = scmp.ne.s32.totalorder %s5125_s9, %s3245_s12  ;;  %p3252_p8 = scmp.lt.u32.totalorder %s3245_s12, %s5125_s9 }
  0x39   : > { %p3248_p3 = pnand %p3246_p9, %p3219_p6 }
  0x3b   : > { %p3249_p7 = pneg %p3248_p3 }
  0x3d   : > { %p3254_p12 = pnand %p3252_p8, %p3249_p7 }
  0x3f   : > { %3257 = shalt.err (!%p3254_p12)
}
  0x40   : > { %s3258_s13 = scalar_lea.vmem %s3541_s16, 2048  ;;  %p3266_p10 = scmp.lt.s32.totalorder %s3541_s16, %s3541_s16 }
  0x41   : > { %p3259_p13 = scmp.ne.s32.totalorder %s3541_s16, %s3258_s13  ;;  %p3267_p11 = scmp.lt.s32.totalorder %s3258_s13, %s3258_s13 }
  0x43   : > { %p3261_p4 = pnand %p3259_p13, %p3219_p6  ;;  %p3268_p1 = por %p3267_p11, %p3266_p10 }
  0x45   : > { %p3262_p5 = pneg %p3261_p4 }
  0x47   : > { %p3269_p0 = pnand %p3268_p1, %p3262_p5 }
  0x49   : > { %3272 = shalt.err (!%p3269_p0)
}
  0x4a   : > { %s5141_s28 = smov 128   ;;  %s5142_s29 = smov 8  }
  0x4b   : > { %3143 = dma.hbm_to_vmem [thread:$0]  (!%p3537_p2), %s5125_s9, 2048, %s3541_s16, [#allocation7], %s5141_s28, %s5141_s28, %s5142_s29  }
  0x4c   : > { %s372_s22 = sand.u32 1, %s3377_s19   ;;  %s40_s26 = sadd.s32 1, %s3385_s21 }
  0x4d   : > { %s3122_s15 = smul.u32 704, %s372_s22  ;;  %p42_p6 = scmp.ge.s32.totalorder %s40_s26, 2 }
  0x4e   : > { %s3123_s11 = smul.u32 11264, %s3385_s21  ;;  %s3612_s28 = scalar_lea.sflag [#allocation4], %s372_s22 }
  0x4f   : > { %s5341_s26 = smov (%p42_p6, %s40_s26), 0  ;;  %s376_s16 = scalar_lea.vmem [#allocation3], %s3122_s15 }
  0x50   : > { %s3602_s23 = scalar_lea.hbm %s5116_s0, %s3123_s11  ;;  %s385_s24 = sshll.u32 %s376_s16, 4  ;;  %s3606_s24 = int_to_ptr.vmem [resolvable:$true] %s385_s24 }
  0x51   : > { %s44_s17 = ssub.s32 %s3385_s21, %s5341_s26  ;;  %s3273_s29 = scalar_lea.hbm %s3602_s23, 11264 }
  0x52   : > { %p3608_p2 = scmp.eq.s32.totalorder %s44_s17, 0  ;;  %p3274_p9 = scmp.ne.s32.totalorder %s3602_s23, %s3273_s29 }
  0x53   : > { %p5229_p3 = scmp.ne.s32.totalorder %s5225_s14, 0  ;;  %s3278_s11 = scalar_lea.hbm %s5116_s0, 22528 }
  0x54   : > { %p3279_p13 = scmp.lt.u32.totalorder %s3602_s23, %s5116_s0  ;;  %p3280_p4 = scmp.lt.u32.totalorder %s3278_s11, %s3273_s29 }
  0x55   : > { %p3275_p7 = pneg %p5229_p3  ;;  %p3282_p10 = scmp.lt.u32.totalorder %s3273_s29, %s3602_s23 }
  0x56   : > { %p3281_p5 = por %p3280_p4, %p3279_p13 }
  0x57   : > { %p3276_p8 = pnand %p3275_p7, %p3274_p9 }
  0x58   : > { %p3283_p11 = por %p3282_p10, %p3281_p5 }
  0x59   : > { %p3277_p12 = pneg %p3276_p8 }
  0x5b   : > { %p3284_p1 = pnand %p3283_p11, %p3277_p12 }
  0x5d   : > { %3287 = shalt.err (!%p3284_p1)
}
  0x5e   : > { %s3288_s22 = scalar_lea.vmem %s3606_s24, 11264  ;;  %s3395_s17 = smov [#allocation3]  }
  0x5f   : > { %p3289_p0 = scmp.ne.s32.totalorder %s3606_s24, %s3288_s22  ;;  %s3293_s1 = sshll.u32 %s3395_s17, 4  ;;  %s3294_s1 = int_to_ptr.vmem [resolvable:$false] %s3293_s1 }
  0x60   : > { %s3295_s15 = scalar_lea.vmem %s3294_s1, 22528  ;;  %p3296_p8 = scmp.lt.s32.totalorder %s3606_s24, %s3294_s1 }
  0x61   : > { %p3291_p6 = pnand %p3289_p0, %p3275_p7  ;;  %p3297_p13 = scmp.lt.s32.totalorder %s3295_s15, %s3288_s22 }
  0x63   : > { %p3292_p9 = pneg %p3291_p6  ;;  %p3298_p4 = por %p3297_p13, %p3296_p8 }
  0x65   : > { %p3299_p5 = pnand %p3298_p4, %p3292_p9 }
  0x67   : > { %3302 = shalt.err (!%p3299_p5)
}
  0x68   : > { %s5230_s29 = smov 8   ;;  %s5231_s11 = smov 128  }
  0x69   : > { %3147 = dma.hbm_to_vmem [thread:$0]  (!%p5229_p3), %s3602_s23, 11264, %s3606_s24, %s3612_s28, %s5231_s11, %s5231_s11, %s5230_s29  }
  0x6a   : > { %s5232_s13 = sadd.s32 1, %s3377_s19  ;;  %p5233_p7 = scmp.ne.s32.totalorder %s5224_s30, 0 }
  0x6b   : > { %s3648_s16 = scalar_select %p3608_p2, %s3377_s19, %s5232_s13  }
  0x6c   : > { %397 = sbr.rel (%p5233_p7) target bundleno = 636 (0x27c), region = 64 }
  0x73   : > { %s3653_s14 = sand.u32 1, %s3373_s18   ;;  %p5234_p12 = scmp.ne.s32.totalorder %s5219_s27, 0 }
  0x74   : > { %s3124_s22 = smul.u32 704, %s3653_s14  ;;  %s400_s17 = scalar_lea.sflag [#allocation4], %s3653_s14 }
  0x76   : > { %s3657_s1 = scalar_lea.vmem [#allocation3], %s3124_s22 }
  0x77   : > { %3356 = dma.done.wait (%p5234_p12), %s400_s17, 11264  }
  0x78   : > { %3358 = vsyncadd (%p5234_p12), %s400_s17, 4294956032  ;;  %p5235_p2 = scmp.ne.s32.totalorder %s5217_s25, 0 }
  0x7a   : > { %3360 = dma.done.wait (%p5235_p2), [#allocation7], 2112  }
  0x7b   : > { %3362 = vsyncadd (%p5235_p2), [#allocation7], 4294965184  ;;  %v3396_v0 = vmov 0.0   ;;  %v791_v1 = vlaneseq  ;;  %v2459_v3 = vld [vmem:[#allocation8] sm:$0xff]  ;;  %v2460_v4 = vld [vmem:[#allocation8 + $0x8] sm:$0xff]  ;;  %s2904_s15 = sshll.u32 %s3653_s14, 8 }
  0x7c   : > { %460 = vst [vmem:[#allocation2 + $0x106] sm:$0x3] %v3396_v0  ;;  %462 = vst [vmem:[#allocation2 + $0x146] sm:$0x3] %v3396_v0  ;;  %v2461_v5 = vld [vmem:[#allocation8 + $0x10] sm:$0xff]  ;;  %v3074_v6 = vpack.c.bf16 %v2460_v4, %v2459_v3  ;;  %v2462_v7 = vld [vmem:[#allocation8 + $0x18] sm:$0xff] }
  0x7d   : > { %464 = vst [vmem:[#allocation2 + $0x186] sm:$0x3] %v3396_v0  ;;  %452 = vst [vmem:[#allocation2 + $0x6] sm:$0x3] %v3396_v0  ;;  %v792_v2 = vshrl.u32 %v791_v1, 7  ;;  %v2463_v8 = vld [vmem:[#allocation8 + $0x20] sm:$0xff]  ;;  %v3078_v10 = vpack.c.bf16 %v2462_v7, %v2461_v5 }
  0x7e   : > { %453 = vst [vmem:[#allocation2 + $0x26] sm:$0x3] %v3396_v0  ;;  %454 = vst [vmem:[#allocation2 + $0x46] sm:$0x3] %v3396_v0  ;;  %v2464_v9 = vld [vmem:[#allocation8 + $0x28] sm:$0xff]  ;;  %v2465_v11 = vld [vmem:[#allocation8 + $0x30] sm:$0xff]  ;;  %3106 = vmatprep.subr.bf16.mxu1 %v3074_v6  ;;  %3075 = vmatprep.subr.bf16.mxu0 %v3074_v6 }
  0x7f   : > { %455 = vst [vmem:[#allocation2 + $0x66] sm:$0x3] %v3396_v0  ;;  %456 = vst [vmem:[#allocation2 + $0x86] sm:$0x3] %v3396_v0  ;;  %v2466_v12 = vld [vmem:[#allocation8 + $0x38] sm:$0xff]  ;;  %v2467_v13 = vld [vmem:[#allocation8 + $0x40] sm:$0xff]  ;;  %3114 = vmatpush3.bf16.msra.mxu1 %v3074_v6  ;;  %3077 = vmatpush3.bf16.msra.mxu0 %v3074_v6  ;;  %v3082_v23 = vpack.c.bf16 %v2464_v9, %v2463_v8 }
  0x80   : > { %457 = vst [vmem:[#allocation2 + $0xa6] sm:$0x3] %v3396_v0  ;;  %458 = vst [vmem:[#allocation2 + $0xc6] sm:$0x3] %v3396_v0  ;;  %v3667_v14 = vsub.s32 0, %v792_v2  ;;  %v2468_v15 = vld [vmem:[#allocation8 + $0x48] sm:$0xff]  ;;  %3107 = vmatprep.subr.bf16.mxu1 %v3078_v10  ;;  %3079 = vmatprep.subr.bf16.mxu0 %v3078_v10  ;;  %v3674_v27 = vpack.c.bf16 %v2466_v12, %v2465_v11 }
  0x81   : > { %459 = vst [vmem:[#allocation2 + $0xe6] sm:$0x3] %v3396_v0  ;;  %461 = vst [vmem:[#allocation2 + $0x126] sm:$0x3] %v3396_v0  ;;  %v2469_v16 = vld [vmem:[#allocation8 + $0x50] sm:$0xff]  ;;  %v2470_v17 = vld [vmem:[#allocation8 + $0x58] sm:$0xff]  ;;  %v3676_v28 = vpack.c.bf16 %v2468_v15, %v2467_v13 }
  0x82   : > { %463 = vst [vmem:[#allocation2 + $0x166] sm:$0x3] %v3396_v0  ;;  %465 = vst [vmem:[#allocation2 + $0x1a6] sm:$0x3] %v3396_v0  ;;  %v3669_v18 = vsub.s32 1, %v792_v2  ;;  %v3671_v19 = vsub.s32 2, %v792_v2  ;;  %v3678_v29 = vpack.c.bf16 %v2470_v17, %v2469_v16 }
  0x83   : > { %466 = vst [vmem:[#allocation2 + $0x1c6] sm:$0x3] %v3396_v0  ;;  %467 = vst [vmem:[#allocation2 + $0x1e6] sm:$0x3] %v3396_v0  ;;  %v2471_v20 = vld [vmem:[#allocation8 + $0x60] sm:$0xff]  ;;  %v2472_v21 = vld [vmem:[#allocation8 + $0x68] sm:$0xff]  ;;  %3115 = vmatpush3.bf16.msra.mxu1 %v3078_v10  ;;  %3081 = vmatpush3.bf16.msra.mxu0 %v3078_v10 }
  0x84   : > { %468 = vst [vmem:[#allocation2 + $0x206] sm:$0x3] %v3396_v0  ;;  %469 = vst [vmem:[#allocation2 + $0x226] sm:$0x3] %v3396_v0  ;;  %v2473_v22 = vld [vmem:[#allocation8 + $0x70] sm:$0xff]  ;;  %v2474_v24 = vld [vmem:[#allocation8 + $0x78] sm:$0xff]  ;;  %v3686_v34 = vpack.c.bf16 %v2472_v21, %v2471_v20  ;;  %3108 = vmatprep.subr.bf16.mxu1 %v3082_v23  ;;  %3083 = vmatprep.subr.bf16.mxu0 %v3082_v23 }
  0x85   : > { %470 = vst [vmem:[#allocation2 + $0x246] sm:$0x3] %v3396_v0  ;;  %471 = vst [vmem:[#allocation2 + $0x266] sm:$0x3] %v3396_v0  ;;  %v746_v25 = vld [vmem:[#allocation6] sm:$0x7]  ;;  %v3688_v35 = vpack.c.bf16 %v2474_v24, %v2473_v22 }
  0x86   : > { %472 = vst [vmem:[#allocation2 + $0x18] sm:$0x3] %v3396_v0  ;;  %473 = vst [vmem:[#allocation2 + $0x38] sm:$0x3] %v3396_v0  ;;  %v763_v26 = vld [vmem:[%s3657_s1 + $0x107] sm:$0xff]  ;;  %v764_v30 = vld [vmem:[%s3657_s1 + $0x10f] sm:$0xff]  ;;  %v3684_v33 = vrot.slane %v746_v25, %v3667_v14  ;;  %v3694_v39 = vrot.slane %v746_v25, %v3669_v18  ;;  %v3697_v40 = vrot.slane %v746_v25, %v3671_v19 }
  0x87   : > { %474 = vst [vmem:[#allocation2 + $0x58] sm:$0x3] %v3396_v0  ;;  %475 = vst [vmem:[#allocation2 + $0x78] sm:$0x3] %v3396_v0  ;;  %v765_v31 = vld [vmem:[%s3657_s1 + $0x127] sm:$0xff]  ;;  %v766_v32 = vld [vmem:[%s3657_s1 + $0x12f] sm:$0xff]  ;;  %3116 = vmatpush3.bf16.msra.mxu1 %v3082_v23  ;;  %3085 = vmatpush3.bf16.msra.mxu0 %v3082_v23 }
  0x88   : > { %476 = vst [vmem:[#allocation2 + $0x98] sm:$0x3] %v3396_v0  ;;  %477 = vst [vmem:[#allocation2 + $0xb8] sm:$0x3] %v3396_v0  ;;  %v767_v36 = vld [vmem:[%s3657_s1 + $0x147] sm:$0xff]  ;;  %v768_v37 = vld [vmem:[%s3657_s1 + $0x14f] sm:$0xff]  ;;  %v811_v44 = vmul.f32 %v3684_v33, %v763_v26  ;;  %v812_v45 = vmul.f32 %v3684_v33, %v764_v30  ;;  %v813_v46 = vmul.f32 %v3684_v33, %v765_v31  ;;  %3109 = vmatprep.subr.bf16.mxu1 %v3674_v27 }
  0x89   : > { %478 = vst [vmem:[#allocation2 + $0xd8] sm:$0x3] %v3396_v0  ;;  %479 = vst [vmem:[#allocation2 + $0xf8] sm:$0x3] %v3396_v0  ;;  %v769_v38 = vld [vmem:[%s3657_s1 + $0x167] sm:$0xff]  ;;  %v770_v41 = vld [vmem:[%s3657_s1 + $0x16f] sm:$0xff]  ;;  %v814_v50 = vmul.f32 %v3684_v33, %v766_v32  ;;  %v815_v51 = vmul.f32 %v3684_v33, %v767_v36  ;;  %v816_v52 = vmul.f32 %v3684_v33, %v768_v37  ;;  %3087 = vmatprep.subr.bf16.mxu0 %v3674_v27 }
  0x8a   : > { %480 = vst [vmem:[#allocation2 + $0x118] sm:$0x3] %v3396_v0  ;;  %481 = vst [vmem:[#allocation2 + $0x138] sm:$0x3] %v3396_v0  ;;  %v771_v42 = vld [vmem:[%s3657_s1 + $0x187] sm:$0xff]  ;;  %v772_v43 = vld [vmem:[%s3657_s1 + $0x18f] sm:$0xff]  ;;  %v817_v54 = vmul.f32 %v3684_v33, %v769_v38  ;;  %v818_v55 = vmul.f32 %v3684_v33, %v770_v41 }
  0x8b   : > { %482 = vst [vmem:[#allocation2 + $0x158] sm:$0x3] %v3396_v0  ;;  %483 = vst [vmem:[#allocation2 + $0x178] sm:$0x3] %v3396_v0  ;;  %v773_v47 = vld [vmem:[%s3657_s1 + $0x1a7] sm:$0xff]  ;;  %v774_v48 = vld [vmem:[%s3657_s1 + $0x1af] sm:$0xff]  ;;  %v819_v56 = vmul.f32 %v3684_v33, %v771_v42  ;;  %v820_v57 = vmul.f32 %v3684_v33, %v772_v43  ;;  %3117 = vmatpush3.bf16.msra.mxu1 %v3674_v27  ;;  %3089 = vmatpush3.bf16.msra.mxu0 %v3674_v27 }
  0x8c   : > { %484 = vst [vmem:[#allocation2 + $0x198] sm:$0x3] %v3396_v0  ;;  %485 = vst [vmem:[#allocation2 + $0x1b8] sm:$0x3] %v3396_v0  ;;  %v775_v49 = vld [vmem:[%s3657_s1 + $0x1c7] sm:$0xff]  ;;  %v776_v53 = vld [vmem:[%s3657_s1 + $0x1cf] sm:$0xff]  ;;  %v821_v60 = vmul.f32 %v3684_v33, %v773_v47  ;;  %v822_v61 = vmul.f32 %v3684_v33, %v774_v48  ;;  %3110 = vmatprep.subr.bf16.mxu1 %v3676_v28  ;;  %3091 = vmatprep.subr.bf16.mxu0 %v3676_v28 }
  0x8d   : > { %486 = vst [vmem:[#allocation2 + $0x1d8] sm:$0x3] %v3396_v0  ;;  %487 = vst [vmem:[#allocation2 + $0x1f8] sm:$0x3] %v3396_v0  ;;  %v855_v58 = vld [vmem:[%s3657_s1 + $0x108] sm:$0xff]  ;;  %v856_v59 = vld [vmem:[%s3657_s1 + $0x110] sm:$0xff]  ;;  %v823_v62 = vmul.f32 %v3684_v33, %v775_v49  ;;  %v824_v63 = vmul.f32 %v3684_v33, %v776_v53 }
  0x8e   : > { %488 = vst [vmem:[#allocation2 + $0x218] sm:$0x3] %v3396_v0  ;;  %489 = vst [vmem:[#allocation2 + $0x238] sm:$0x3] %v3396_v0  ;;  %v858_v1 = vld [vmem:[%s3657_s1 + $0x130] sm:$0xff]  ;;  %v859_v2 = vld [vmem:[%s3657_s1 + $0x148] sm:$0xff]  ;;  %v903_v6 = vmul.f32 %v3694_v39, %v855_v58  ;;  %v904_v7 = vmul.f32 %v3694_v39, %v856_v59 }
  0x8f   : > { %490 = vst [vmem:[#allocation2 + $0x258] sm:$0x3] %v3396_v0  ;;  %491 = vst [vmem:[#allocation2 + $0x278] sm:$0x3] %v3396_v0  ;;  %v857_v0 = vld [vmem:[%s3657_s1 + $0x128] sm:$0xff]  ;;  %v860_v3 = vld [vmem:[%s3657_s1 + $0x150] sm:$0xff]  ;;  %v906_v12 = vmul.f32 %v3694_v39, %v858_v1  ;;  %v907_v13 = vmul.f32 %v3694_v39, %v859_v2  ;;  %3118 = vmatpush3.bf16.msra.mxu1 %v3676_v28  ;;  %3093 = vmatpush3.bf16.msra.mxu0 %v3676_v28 }
  0x90   : > { %5236 = vst [vmem:[#allocation17_spill] sm:$0xff] %v3684_v33  ;;  %5237 = vst [vmem:[#allocation18_spill] sm:$0xff] %v3694_v39  ;;  %v861_v4 = vld [vmem:[%s3657_s1 + $0x168] sm:$0xff]  ;;  %v862_v5 = vld [vmem:[%s3657_s1 + $0x170] sm:$0xff]  ;;  %v905_v8 = vmul.f32 %v3694_v39, %v857_v0  ;;  %v908_v15 = vmul.f32 %v3694_v39, %v860_v3  ;;  %v947_v32 = vadd.f32 %v903_v6, %v811_v44  ;;  %3111 = vmatprep.subr.bf16.mxu1 %v3678_v29  ;;  %s4966_s29 = scalar_lea.vmem [#allocation9], %s2904_s15  ;;  %s2945_s11 = sshll.u32 %s3381_s20, 12 }
  0x91   : > { %v863_v9 = vld [vmem:[%s3657_s1 + $0x188] sm:$0xff]  ;;  %v864_v10 = vld [vmem:[%s3657_s1 + $0x190] sm:$0xff]  ;;  %v909_v21 = vmul.f32 %v3694_v39, %v861_v4  ;;  %v910_v22 = vmul.f32 %v3694_v39, %v862_v5  ;;  %v948_v36 = vadd.f32 %v904_v7, %v812_v45  ;;  %v950_v42 = vadd.f32 %v906_v12, %v814_v50  ;;  %3095 = vmatprep.subr.bf16.mxu0 %v3678_v29  ;;  %s5327_s13 = sld [smem:[#allocation15_spill]]  ;;  %s2788_s22 = sshll.u32 %s4966_s29, 4  ;;  %s5064_s22 = int_to_ptr.vmem [resolvable:$true] %s2788_s22 }
  0x92   : > { %v865_v11 = vld [vmem:[%s3657_s1 + $0x1a8] sm:$0xff]  ;;  %v866_v16 = vld [vmem:[%s3657_s1 + $0x1b0] sm:$0xff]  ;;  %v911_v23 = vmul.f32 %v3694_v39, %v863_v9  ;;  %v912_v24 = vmul.f32 %v3694_v39, %v864_v10  ;;  %v949_v37 = vadd.f32 %v905_v8, %v813_v46  ;;  %v951_v43 = vadd.f32 %v907_v13, %v815_v51  ;;  %s5328_s27 = sld [smem:[#allocation50_spill]]  ;;  %s2772_s20 = scalar_lea.sflag [#allocation5], %s3653_s14 }
  0x93   : > { %v867_v17 = vld [vmem:[%s3657_s1 + $0x1c8] sm:$0xff]  ;;  %v868_v20 = vld [vmem:[%s3657_s1 + $0x1d0] sm:$0xff]  ;;  %v913_v25 = vmul.f32 %v3694_v39, %v865_v11  ;;  %v914_v26 = vmul.f32 %v3694_v39, %v866_v16  ;;  %v952_v47 = vadd.f32 %v908_v15, %v816_v52  ;;  %v953_v45 = vadd.f32 %v909_v21, %v817_v54  ;;  %3119 = vmatpush3.bf16.msra.mxu1 %v3678_v29  ;;  %s3303_s28 = scalar_lea.vmem %s5064_s22, 4096  ;;  %s3397_s12 = smov [#allocation9]  }
  0x94   : > { %v915_v30 = vmul.f32 %v3694_v39, %v867_v17  ;;  %v916_v31 = vmul.f32 %v3694_v39, %v868_v20  ;;  %v991_v38 = vld [vmem:[%s3657_s1 + $0x109] sm:$0xff]  ;;  %v992_v41 = vld [vmem:[%s3657_s1 + $0x111] sm:$0xff]  ;;  %v954_v46 = vadd.f32 %v910_v22, %v818_v55  ;;  %v955_v49 = vadd.f32 %v911_v23, %v819_v56  ;;  %3097 = vmatpush3.bf16.msra.mxu0 %v3678_v29  ;;  %v1310_v22 = vld [vmem:[%s5119_s3] sm:$0x7]  ;;  %p3304_p3 = scmp.ne.s32.totalorder %s5064_s22, %s3303_s28  ;;  %s3307_s23 = sshll.u32 %s3397_s12, 4  ;;  %s3308_s23 = int_to_ptr.vmem [resolvable:$false] %s3307_s23 }
  0x95   : > { %v993_v48 = vld [vmem:[%s3657_s1 + $0x129] sm:$0xff]  ;;  %v994_v27 = vld [vmem:[%s3657_s1 + $0x131] sm:$0xff]  ;;  %v956_v53 = vadd.f32 %v912_v24, %v820_v57  ;;  %v957_v1 = vadd.f32 %v913_v25, %v821_v60  ;;  %v958_v50 = vadd.f32 %v914_v26, %v822_v61  ;;  %v1039_v56 = vmul.f32 %v3697_v40, %v991_v38  ;;  %3112 = vmatprep.subr.bf16.mxu1 %v3686_v34  ;;  %v1111_v29 = vld [vmem:[%s5118_s2] sm:$0x1]  ;;  %s3309_s24 = scalar_lea.vmem %s3308_s23, 8192  ;;  %p3310_p0 = scmp.lt.s32.totalorder %s5064_s22, %s3308_s23 }
  0x96   : > { %v995_v44 = vld [vmem:[%s3657_s1 + $0x149] sm:$0xff]  ;;  %v996_v58 = vld [vmem:[%s3657_s1 + $0x151] sm:$0xff]  ;;  %v959_v51 = vadd.f32 %v915_v30, %v823_v62  ;;  %v960_v2 = vadd.f32 %v916_v31, %v824_v63  ;;  %v1040_v57 = vmul.f32 %v3697_v40, %v992_v41  ;;  %v1041_v6 = vmul.f32 %v3697_v40, %v993_v48  ;;  %3099 = vmatprep.subr.bf16.mxu0 %v3686_v34  ;;  %v3799_v30 = vld [vmem:[%s5121_s5] sm:$0x7]  ;;  %p3311_p6 = scmp.lt.s32.totalorder %s3309_s24, %s3303_s28 }
  0x97   : > { %v997_v59 = vld [vmem:[%s3657_s1 + $0x169] sm:$0xff]  ;;  %v998_v0 = vld [vmem:[%s3657_s1 + $0x171] sm:$0xff]  ;;  %v1042_v60 = vmul.f32 %v3697_v40, %v994_v27  ;;  %v1043_v61 = vmul.f32 %v3697_v40, %v995_v44  ;;  %v1044_v62 = vmul.f32 %v3697_v40, %v996_v58  ;;  %v1083_v13 = vadd.f32 %v1039_v56, %v947_v32  ;;  %3120 = vmatpush3.bf16.msra.mxu1 %v3686_v34  ;;  %v2033_v48 = vld [vmem:[%s5122_s6] sm:$0x1]  ;;  %p5329_p10 = scmp.ne.s32.totalorder %s5327_s13, 0 }
  0x98   : > { %v999_v52 = vld [vmem:[%s3657_s1 + $0x189] sm:$0xff]  ;;  %v1000_v3 = vld [vmem:[%s3657_s1 + $0x191] sm:$0xff]  ;;  %v1045_v28 = vmul.f32 %v3697_v40, %v997_v59  ;;  %v1046_v63 = vmul.f32 %v3697_v40, %v998_v0  ;;  %v1084_v15 = vadd.f32 %v1040_v57, %v948_v36  ;;  %v1085_v16 = vadd.f32 %v1041_v6, %v949_v37  ;;  %3101 = vmatpush3.bf16.msra.mxu0 %v3686_v34  ;;  %s5062_s30 = scalar_lea.hbm %s5328_s27, %s2945_s11  ;;  %p3312_p9 = por %p3311_p6, %p3310_p0 }
  0x99   : > { %v1001_v4 = vld [vmem:[%s3657_s1 + $0x1a9] sm:$0xff]  ;;  %v1002_v54 = vld [vmem:[%s3657_s1 + $0x1b1] sm:$0xff]  ;;  %v1047_v7 = vmul.f32 %v3697_v40, %v999_v52  ;;  %v1048_v8 = vmul.f32 %v3697_v40, %v1000_v3  ;;  %v1086_v17 = vadd.f32 %v1042_v60, %v950_v42  ;;  %v1087_v20 = vadd.f32 %v1043_v61, %v951_v43  ;;  %3113 = vmatprep.subr.bf16.mxu1 %v3688_v35  ;;  %p3305_p11 = pnand %p3304_p3, %p5329_p10 }
  0x9a   : > { %v1003_v55 = vld [vmem:[%s3657_s1 + $0x1c9] sm:$0xff]  ;;  %v1004_v5 = vld [vmem:[%s3657_s1 + $0x1d1] sm:$0xff]  ;;  %v1049_v9 = vmul.f32 %v3697_v40, %v1001_v4  ;;  %v1050_v10 = vmul.f32 %v3697_v40, %v1002_v54  ;;  %v1088_v21 = vadd.f32 %v1044_v62, %v952_v47  ;;  %v1089_v23 = vadd.f32 %v1045_v28, %v953_v45  ;;  %3103 = vmatprep.subr.bf16.mxu0 %v3688_v35 }
  0x9b   : > { %v1051_v11 = vmul.f32 %v3697_v40, %v1003_v55  ;;  %v1052_v12 = vmul.f32 %v3697_v40, %v1004_v5  ;;  %v1090_v24 = vadd.f32 %v1046_v63, %v954_v46  ;;  %v1091_v25 = vadd.f32 %v1047_v7, %v955_v49  ;;  %3121 = vmatpush3.bf16.msra.mxu1 %v3688_v35  ;;  %p3306_p1 = pneg %p3305_p11 }
  0x9c   : > { %v1092_v26 = vadd.f32 %v1048_v8, %v956_v53  ;;  %v1093_v31 = vadd.f32 %v1049_v9, %v957_v1  ;;  %v1094_v32 = vadd.f32 %v1050_v10, %v958_v50  ;;  %v3804_v38 = vrot.slane %v1111_v29, %v3667_v14  ;;  %3105 = vmatpush3.bf16.msra.mxu0 %v3688_v35 }
  0x9d   : > { %v1095_v36 = vadd.f32 %v1051_v11, %v959_v51  ;;  %v1096_v37 = vadd.f32 %v1052_v12, %v960_v2  ;;  %v3807_v41 = vrot.slane %v1310_v22, %v3667_v14  ;;  %v3810_v42 = vrot.slane %v1310_v22, %v3669_v18  ;;  %p3313_p8 = pnand %p3312_p9, %p3306_p1 }
  0x9e   : > { %v3815_v43 = vrot.slane %v1310_v22, %v3671_v19  ;;  %v3819_v47 = vrot.slane %v3799_v30, %v3667_v14  ;;  %v3823_v34 = vrot.slane %v3799_v30, %v3669_v18  ;;  %v3828_v27 = vmul.f32 0.0, %v1111_v29 }
  0x9f   : > { %v3831_v44 = vadd.f32 %v3804_v38, %v1083_v13  ;;  %v3834_v45 = vadd.f32 %v3804_v38, %v1084_v15  ;;  %v3837_v46 = vadd.f32 %v3804_v38, %v1085_v16  ;;  %v3840_v49 = vadd.f32 %v3804_v38, %v1086_v17  ;;  %v3909_v17 = vld [vmem:[%s5120_s4] ss:$0 sm:$0xff] }
  0xa0   : > { %5238 = vst [vmem:[#allocation19_spill] sm:$0xff] %v3823_v34  ;;  %v3843_v53 = vadd.f32 %v3804_v38, %v1087_v20  ;;  %v3846_v58 = vadd.f32 %v3804_v38, %v1088_v21  ;;  %v3849_v59 = vadd.f32 %v3804_v38, %v1089_v23  ;;  %v3852_v0 = vadd.f32 %v3804_v38, %v1090_v24  ;;  %v2214_v24 = vld [vmem:[%s5123_s7] sm:$0x7] }
  0xa1   : > { %5239 = vst [vmem:[#allocation20_spill] sm:$0xff] %v3831_v44  ;;  %5240 = vst [vmem:[#allocation21_spill] sm:$0xff] %v3834_v45  ;;  %v3857_v1 = vadd.f32 %v3804_v38, %v1091_v25  ;;  %v3860_v50 = vadd.f32 %v3804_v38, %v1092_v26  ;;  %v3863_v51 = vadd.f32 %v3804_v38, %v1093_v31  ;;  %v3865_v2 = vmul.f32 0.0, %v2033_v48  ;;  %v747_v25 = vld [vmem:[%s3657_s1 + $0x7] sm:$0xff] }
  0xa2   : > { %5241 = vst [vmem:[#allocation22_spill] sm:$0xff] %v3837_v46  ;;  %5242 = vst [vmem:[#allocation23_spill] sm:$0xff] %v3840_v49  ;;  %v3868_v52 = vadd.f32 %v3804_v38, %v1094_v32  ;;  %v3871_v3 = vadd.f32 %v3804_v38, %v1095_v36  ;;  %v3874_v4 = vadd.f32 %v3804_v38, %v1096_v37  ;;  %v748_v36 = vld [vmem:[%s3657_s1 + $0xf] sm:$0xff]  ;;  %v749_v37 = vld [vmem:[%s3657_s1 + $0x27] sm:$0xff] }
  0xa3   : > { %5243 = vst [vmem:[#allocation24_spill] sm:$0xff] %v3843_v53  ;;  %5244 = vst [vmem:[#allocation25_spill] sm:$0xff] %v3846_v58  ;;  %v1331_v35 = vmul.f32 %v3807_v41, %v3831_v44  ;;  %v1332_v54 = vmul.f32 %v3807_v41, %v3834_v45  ;;  %v1335_v55 = vmul.f32 %v3807_v41, %v3843_v53  ;;  %v846_v45 = vld [vmem:[%s3657_s1 + $0x70] sm:$0xff] }
  0xa4   : > { %5245 = vst [vmem:[#allocation26_spill] sm:$0xff] %v3849_v59  ;;  %5246 = vst [vmem:[#allocation27_spill] sm:$0xff] %v3852_v0  ;;  %v1336_v5 = vmul.f32 %v3807_v41, %v3846_v58  ;;  %v1339_v56 = vmul.f32 %v3807_v41, %v3857_v1  ;;  %v1340_v57 = vmul.f32 %v3807_v41, %v3860_v50 }
  0xa5   : > { %5247 = vst [vmem:[#allocation28_spill] sm:$0xff] %v3857_v1  ;;  %5248 = vst [vmem:[#allocation29_spill] sm:$0xff] %v3860_v50  ;;  %v1375_v6 = vmul.f32 %v3810_v42, %v3837_v46  ;;  %v1376_v60 = vmul.f32 %v3810_v42, %v3840_v49  ;;  %v1379_v61 = vmul.f32 %v3810_v42, %v3849_v59 }
  0xa6   : > { %5249 = vst [vmem:[#allocation30_spill] sm:$0xff] %v3863_v51  ;;  %5250 = vst [vmem:[#allocation31_spill] sm:$0xff] %v3868_v52  ;;  %v1380_v62 = vmul.f32 %v3810_v42, %v3852_v0  ;;  %v1383_v28 = vmul.f32 %v3810_v42, %v3863_v51  ;;  %v1384_v63 = vmul.f32 %v3810_v42, %v3868_v52 }
  0xa7   : > { %5251 = vst [vmem:[#allocation32_spill] sm:$0xff] %v3871_v3  ;;  %5252 = vst [vmem:[#allocation33_spill] sm:$0xff] %v3874_v4  ;;  %v1459_v7 = vmul.f32 %v3815_v43, %v3843_v53  ;;  %v1415_v8 = vadd.f32 %v1375_v6, %v1331_v35  ;;  %v1416_v9 = vadd.f32 %v1376_v60, %v1332_v54  ;;  %v750_v35 = vld [vmem:[%s3657_s1 + $0x2f] sm:$0xff] }
  0xa8   : > { %v1419_v10 = vadd.f32 %v1379_v61, %v1335_v55  ;;  %v1460_v11 = vmul.f32 %v3815_v43, %v3846_v58  ;;  %v1420_v12 = vadd.f32 %v1380_v62, %v1336_v5  ;;  %v1423_v13 = vadd.f32 %v1383_v28, %v1339_v56  ;;  %v752_v6 = vld [vmem:[%s3657_s1 + $0x4f] sm:$0xff] }
  0xa9   : > { %v1424_v15 = vadd.f32 %v1384_v63, %v1340_v57  ;;  %v1463_v16 = vmul.f32 %v3815_v43, %v3857_v1  ;;  %v1464_v20 = vmul.f32 %v3815_v43, %v3860_v50  ;;  %v1467_v21 = vmul.f32 %v3815_v43, %v3871_v3  ;;  %v751_v57 = vld [vmem:[%s3657_s1 + $0x47] sm:$0xff]  ;;  %v754_v28 = vld [vmem:[%s3657_s1 + $0x6f] sm:$0xff] }
  0xaa   : > { %v1468_v22 = vmul.f32 %v3815_v43, %v3874_v4  ;;  %v1499_v23 = vadd.f32 %v1459_v7, %v1415_v8  ;;  %v1500_v26 = vadd.f32 %v1460_v11, %v1416_v9  ;;  %v3923_v31 = vrot.slane %v3799_v30, %v3671_v19  ;;  %v753_v30 = vld [vmem:[%s3657_s1 + $0x67] sm:$0xff]  ;;  %v756_v7 = vld [vmem:[%s3657_s1 + $0x8f] sm:$0xff] }
  0xab   : > { %v1503_v29 = vadd.f32 %v1463_v16, %v1419_v10  ;;  %v3926_v32 = vrot.slane %v2033_v48, %v3667_v14  ;;  %v1504_v54 = vadd.f32 %v1464_v20, %v1420_v12  ;;  %v1507_v55 = vadd.f32 %v1467_v21, %v1423_v13  ;;  %v755_v63 = vld [vmem:[%s3657_s1 + $0x87] sm:$0xff]  ;;  %v758_v12 = vld [vmem:[%s3657_s1 + $0xaf] sm:$0xff] }
  0xac   : > { %v1508_v5 = vadd.f32 %v1468_v22, %v1424_v15  ;;  %v1546_v56 = vadd.f32 %v3909_v17, %v1499_v23  ;;  %v3936_v60 = vadd.f32 %v3909_v17, %v1500_v26  ;;  %v3940_v61 = vrot.slane %v2214_v24, %v3667_v14  ;;  %v759_v13 = vld [vmem:[%s3657_s1 + $0xc7] sm:$0xff]  ;;  %v760_v20 = vld [vmem:[%s3657_s1 + $0xcf] sm:$0xff] }
  0xad   : > { %v1550_v48 = vadd.f32 %v3909_v17, %v1503_v29  ;;  %v3943_v62 = vrot.slane %v2214_v24, %v3669_v18  ;;  %v3949_v8 = vadd.f32 %v3909_v17, %v1504_v54  ;;  %v1554_v9 = vadd.f32 %v3909_v17, %v1507_v55  ;;  %v757_v18 = vld [vmem:[%s3657_s1 + $0xa7] sm:$0xff]  ;;  %v840_v26 = vld [vmem:[%s3657_s1 + $0x10] sm:$0xff] }
  0xae   : > { %5253 = vst [vmem:[#allocation34_spill] sm:$0xff] %v3936_v60  ;;  %v3953_v10 = vadd.f32 %v3909_v17, %v1508_v5  ;;  %1676 = vst [vmem:[#allocation2 + $0x108] sm:$0xff] %v1546_v56  ;;  %v3956_v11 = vmul.f32 %v3823_v34, %v1546_v56  ;;  %v3966_v16 = vrot.slane %v2214_v24, %v3671_v19  ;;  %v839_v23 = vld [vmem:[%s3657_s1 + $0x8] sm:$0xff]  ;;  %v842_v54 = vld [vmem:[%s3657_s1 + $0x30] sm:$0xff] }
  0xaf   : > { %5254 = vst [vmem:[#allocation35_spill] sm:$0xff] %v3949_v8  ;;  %1677 = vst [vmem:[#allocation2 + $0x110] sm:$0xff] %v3936_v60  ;;  %v3963_v15 = vmul.f32 %v3823_v34, %v1550_v48  ;;  %v795_v21 = vmul.f32 %v3684_v33, %v747_v25  ;;  %v796_v22 = vmul.f32 %v3684_v33, %v748_v36  ;;  %v841_v36 = vld [vmem:[%s3657_s1 + $0x28] sm:$0xff]  ;;  %v848_v50 = vld [vmem:[%s3657_s1 + $0x90] sm:$0xff] }
  0xb0   : > { %5255 = vst [vmem:[#allocation36_spill] sm:$0xff] %v3953_v10  ;;  %1680 = vst [vmem:[#allocation2 + $0x148] sm:$0xff] %v1550_v48  ;;  %v1853_v29 = vmul.f32 %v3823_v34, %v1554_v9  ;;  %v797_v19 = vmul.f32 %v3684_v33, %v749_v37  ;;  %v798_v24 = vmul.f32 %v3684_v33, %v750_v35  ;;  %v843_v55 = vld [vmem:[%s3657_s1 + $0x48] sm:$0xff]  ;;  %v844_v35 = vld [vmem:[%s3657_s1 + $0x50] sm:$0xff] }
  0xb1   : > { %1681 = vst [vmem:[#allocation2 + $0x150] sm:$0xff] %v3949_v8  ;;  %1684 = vst [vmem:[#allocation2 + $0x188] sm:$0xff] %v1554_v9  ;;  %v799_v25 = vmul.f32 %v3684_v33, %v751_v57  ;;  %v800_v5 = vmul.f32 %v3684_v33, %v752_v6  ;;  %v801_v56 = vmul.f32 %v3684_v33, %v753_v30  ;;  %v845_v9 = vld [vmem:[%s3657_s1 + $0x68] sm:$0xff]  ;;  %v850_v58 = vld [vmem:[%s3657_s1 + $0xb0] sm:$0xff] }
  0xb2   : > { %1685 = vst [vmem:[#allocation2 + $0x190] sm:$0xff] %v3953_v10  ;;  %v802_v48 = vmul.f32 %v3684_v33, %v754_v28  ;;  %v803_v37 = vmul.f32 %v3684_v33, %v755_v63  ;;  %v804_v57 = vmul.f32 %v3684_v33, %v756_v7  ;;  %v805_v44 = vmul.f32 %v3684_v33, %v757_v18  ;;  %v847_v6 = vld [vmem:[%s3657_s1 + $0x88] sm:$0xff]  ;;  %v852_v53 = vld [vmem:[%s3657_s1 + $0xd0] sm:$0xff] }
  0xb3   : > { %v806_v4 = vmul.f32 %v3684_v33, %v758_v12  ;;  %v807_v3 = vmul.f32 %v3684_v33, %v759_v13  ;;  %v849_v1 = vld [vmem:[%s3657_s1 + $0xa8] sm:$0xff]  ;;  %v808_v30 = vmul.f32 %v3684_v33, %v760_v20  ;;  %v887_v63 = vmul.f32 %v3694_v39, %v839_v23 }
  0xb4   : > { %v851_v28 = vld [vmem:[%s3657_s1 + $0xc8] sm:$0xff]  ;;  %v888_v52 = vmul.f32 %v3694_v39, %v840_v26  ;;  %v889_v7 = vmul.f32 %v3694_v39, %v841_v36  ;;  %v890_v18 = vmul.f32 %v3694_v39, %v842_v54  ;;  %v891_v12 = vmul.f32 %v3694_v39, %v843_v55 }
  0xb5   : > { %v892_v13 = vmul.f32 %v3694_v39, %v844_v35  ;;  %v893_v51 = vmul.f32 %v3694_v39, %v845_v9  ;;  %v1717_v0 = vld [vmem:[#allocation2 + $0x106] sm:$0xff]  ;;  %v894_v20 = vmul.f32 %v3694_v39, %v846_v45  ;;  %v895_v59 = vmul.f32 %v3694_v39, %v847_v6 }
  0xb6   : > { %v896_v49 = vmul.f32 %v3694_v39, %v848_v50  ;;  %v897_v23 = vmul.f32 %v3694_v39, %v849_v1  ;;  %v1761_v36 = vmul.f32 %v3819_v47, %v1717_v0  ;;  %v1925_v46 = vld [vmem:[#allocation2 + $0x10a] sm:$0xff]  ;;  %v898_v54 = vmul.f32 %v3694_v39, %v850_v58 }
  0xb7   : > { %v1721_v26 = vld [vmem:[#allocation2 + $0x146] sm:$0xff]  ;;  %v899_v55 = vmul.f32 %v3694_v39, %v851_v28  ;;  %v900_v35 = vmul.f32 %v3694_v39, %v852_v53  ;;  %v1969_v50 = vmul.f32 %v3923_v31, %v1925_v46  ;;  %v931_v6 = vadd.f32 %v887_v63, %v795_v21 }
  0xb8   : > { %v1725_v9 = vld [vmem:[#allocation2 + $0x186] sm:$0xff]  ;;  %v1765_v33 = vmul.f32 %v3819_v47, %v1721_v26  ;;  %v932_v1 = vadd.f32 %v888_v52, %v796_v22  ;;  %v1885_v0 = vadd.f32 %v3956_v11, %v1761_v36  ;;  %v933_v26 = vadd.f32 %v889_v7, %v797_v19 }
  0xb9   : > { %v1929_v45 = vld [vmem:[#allocation2 + $0x14a] sm:$0xff]  ;;  %v1769_v8 = vmul.f32 %v3819_v47, %v1725_v9  ;;  %v934_v39 = vadd.f32 %v890_v18, %v798_v24  ;;  %v935_v34 = vadd.f32 %v891_v12, %v799_v25  ;;  %v936_v52 = vadd.f32 %v892_v13, %v800_v5 }
  0xba   : > { %v1933_v10 = vld [vmem:[#allocation2 + $0x18a] sm:$0xff]  ;;  %v1973_v58 = vmul.f32 %v3923_v31, %v1929_v45  ;;  %v1889_v28 = vadd.f32 %v3963_v15, %v1765_v33  ;;  %v2009_v46 = vadd.f32 %v1969_v50, %v1885_v0  ;;  %v937_v21 = vadd.f32 %v893_v51, %v801_v56 }
  0xbb   : > { %v1977_v53 = vmul.f32 %v3923_v31, %v1933_v10  ;;  %v1893_v60 = vadd.f32 %v1853_v29, %v1769_v8  ;;  %v975_v22 = vld [vmem:[%s3657_s1 + $0x9] sm:$0xff]  ;;  %v938_v63 = vadd.f32 %v894_v20, %v802_v48  ;;  %v939_v36 = vadd.f32 %v895_v59, %v803_v37  ;;  %v976_v9 = vld [vmem:[%s3657_s1 + $0x11] sm:$0xff] }
  0xbc   : > { %v2013_v11 = vadd.f32 %v1973_v58, %v1889_v28  ;;  %v940_v10 = vadd.f32 %v896_v49, %v804_v57  ;;  %v977_v33 = vld [vmem:[%s3657_s1 + $0x29] sm:$0xff]  ;;  %v4026_v19 = vadd.f32 %v3926_v32, %v2009_v46  ;;  %v941_v8 = vadd.f32 %v897_v23, %v805_v44  ;;  %v978_v51 = vld [vmem:[%s3657_s1 + $0x31] sm:$0xff] }
  0xbd   : > { %v2017_v15 = vadd.f32 %v1977_v53, %v1893_v60  ;;  %v942_v29 = vadd.f32 %v898_v54, %v806_v4  ;;  %v979_v24 = vld [vmem:[%s3657_s1 + $0x49] sm:$0xff]  ;;  %v980_v25 = vld [vmem:[%s3657_s1 + $0x51] sm:$0xff]  ;;  %v943_v49 = vadd.f32 %v899_v55, %v807_v3  ;;  %v944_v59 = vadd.f32 %v900_v35, %v808_v30 }
  0xbe   : > { %5256 = vst [vmem:[#allocation37_spill] sm:$0xff] %v4026_v19  ;;  %v4032_v5 = vadd.f32 %v3926_v32, %v2013_v11  ;;  %v981_v56 = vld [vmem:[%s3657_s1 + $0x69] sm:$0xff]  ;;  %v982_v60 = vld [vmem:[%s3657_s1 + $0x71] sm:$0xff]  ;;  %v1023_v37 = vmul.f32 %v3697_v40, %v975_v22  ;;  %v2235_v44 = vmul.f32 %v3940_v61, %v4026_v19  ;;  %v1024_v12 = vmul.f32 %v3697_v40, %v976_v9  ;;  %v4066_v22 = vld [vmem:[%s5124_s8] ss:$0 sm:$0xff] }
  0xbf   : > { %v983_v48 = vld [vmem:[%s3657_s1 + $0x89] sm:$0xff]  ;;  %v4039_v57 = vadd.f32 %v3926_v32, %v2017_v15  ;;  %v984_v4 = vld [vmem:[%s3657_s1 + $0x91] sm:$0xff]  ;;  %v1025_v13 = vmul.f32 %v3697_v40, %v977_v33  ;;  %v1026_v23 = vmul.f32 %v3697_v40, %v978_v51  ;;  %v1027_v54 = vmul.f32 %v3697_v40, %v979_v24 }
  0xc0   : > { %5257 = vst [vmem:[#allocation38_spill] sm:$0xff] %v4032_v5  ;;  %v985_v7 = vld [vmem:[%s3657_s1 + $0xa9] sm:$0xff]  ;;  %v986_v18 = vld [vmem:[%s3657_s1 + $0xb1] sm:$0xff]  ;;  %v2271_v3 = vmul.f32 %v3943_v62, %v4032_v5  ;;  %v1028_v55 = vmul.f32 %v3697_v40, %v980_v25  ;;  %v1029_v45 = vmul.f32 %v3697_v40, %v981_v56  ;;  %v1030_v50 = vmul.f32 %v3697_v40, %v982_v60 }
  0xc1   : > { %5258 = vst [vmem:[#allocation39_spill] sm:$0xff] %v4039_v57  ;;  %v987_v30 = vld [vmem:[%s3657_s1 + $0xc9] sm:$0xff]  ;;  %v988_v20 = vld [vmem:[%s3657_s1 + $0xd1] sm:$0xff]  ;;  %v2339_v35 = vmul.f32 %v3966_v16, %v4039_v57  ;;  %v1031_v0 = vmul.f32 %v3697_v40, %v983_v48  ;;  %v1032_v53 = vmul.f32 %v3697_v40, %v984_v4  ;;  %v1033_v28 = vmul.f32 %v3697_v40, %v985_v7 }
  0xc2   : > { %v2303_v58 = vadd.f32 %v2271_v3, %v2235_v44  ;;  %v1034_v46 = vmul.f32 %v3697_v40, %v986_v18  ;;  %v1035_v11 = vmul.f32 %v3697_v40, %v987_v30  ;;  %v1036_v9 = vmul.f32 %v3697_v40, %v988_v20 }
  0xc3   : > { %v1067_v33 = vadd.f32 %v1023_v37, %v931_v6  ;;  %v1068_v15 = vadd.f32 %v1024_v12, %v932_v1  ;;  %v1069_v24 = vadd.f32 %v1025_v13, %v933_v26  ;;  %v1070_v25 = vadd.f32 %v1026_v23, %v934_v39 }
  0xc4   : > { %v2371_v51 = vadd.f32 %v2339_v35, %v2303_v58  ;;  %v1071_v56 = vadd.f32 %v1027_v54, %v935_v34  ;;  %v1072_v60 = vadd.f32 %v1028_v55, %v936_v52  ;;  %v1073_v48 = vadd.f32 %v1029_v45, %v937_v21 }
  0xc5   : > { %v1074_v44 = vadd.f32 %v1030_v50, %v938_v63  ;;  %v1075_v4 = vadd.f32 %v1031_v0, %v939_v36  ;;  %v1076_v18 = vadd.f32 %v1032_v53, %v940_v10  ;;  %v1077_v3 = vadd.f32 %v1033_v28, %v941_v8 }
  0xc6   : > { %v2410_v7 = vadd.f32 %v4066_v22, %v2371_v51  ;;  %v1078_v19 = vadd.f32 %v1034_v46, %v942_v29  ;;  %v1079_v57 = vadd.f32 %v1035_v11, %v943_v49  ;;  %v1080_v5 = vadd.f32 %v1036_v9, %v944_v59  ;;  %v1718_v11 = vld [vmem:[#allocation2 + $0x10e] sm:$0xff] }
  0xc7   : > { %v4073_v30 = vrot.slane %v3828_v27, %v3667_v14  ;;  %v4076_v6 = vadd.f32 %v3804_v38, %v1073_v48  ;;  %v4079_v39 = vadd.f32 %v3804_v38, %v1074_v44  ;;  %v4082_v34 = vadd.f32 %v3804_v38, %v1075_v4  ;;  %v1726_v44 = vld [vmem:[#allocation2 + $0x18e] sm:$0xff] }
  0xc8   : > { %3050 = vmatprep.mubr.f32.mxu1 %v2410_v7  ;;  %v4085_v1 = vadd.f32 %v3804_v38, %v1076_v18  ;;  %v4088_v26 = vadd.f32 %v3804_v38, %v1077_v3  ;;  %v4105_v8 = vadd.f32 %v3804_v38, %v1078_v19  ;;  %v4108_v29 = vadd.f32 %v3804_v38, %v1079_v57 }
  0xc9   : > { %5259 = vst [vmem:[#allocation40_spill] sm:$0xff] %v4073_v30  ;;  %5260 = vst [vmem:[#allocation41_spill] sm:$0xff] %v4082_v34  ;;  %v1266_v52 = vadd.f32 %v4073_v30, %v1067_v33  ;;  %v1267_v27 = vadd.f32 %v4073_v30, %v1068_v15  ;;  %v4093_v21 = vadd.f32 %v4073_v30, %v1069_v24  ;;  %v1722_v24 = vld [vmem:[#allocation2 + $0x14e] sm:$0xff] }
  0xca   : > { %5261 = vst [vmem:[#allocation42_spill] sm:$0xff] %v4085_v1  ;;  %v4096_v63 = vadd.f32 %v4073_v30, %v1070_v25  ;;  %v4099_v36 = vadd.f32 %v4073_v30, %v1071_v56  ;;  %v4102_v10 = vadd.f32 %v4073_v30, %v1072_v60  ;;  %5264 = vst [vmem:[#allocation45_spill] sm:$0xff] %v4105_v8 }
  0xcb   : > { %5265 = vst [vmem:[#allocation46_spill] sm:$0xff] %v4108_v29  ;;  %v4111_v49 = vadd.f32 %v3804_v38, %v1080_v5  ;;  %v1315_v59 = vmul.f32 %v3807_v41, %v1266_v52  ;;  %v1316_v37 = vmul.f32 %v3807_v41, %v1267_v27  ;;  %v1323_v12 = vmul.f32 %v3807_v41, %v4082_v34 }
  0xcc   : > { %5262 = vst [vmem:[#allocation43_spill] sm:$0xff] %v4099_v36  ;;  %5263 = vst [vmem:[#allocation44_spill] sm:$0xff] %v4102_v10  ;;  %v1319_v13 = vmul.f32 %v3807_v41, %v4099_v36  ;;  %v1320_v19 = vmul.f32 %v3807_v41, %v4102_v10  ;;  %v1324_v57 = vmul.f32 %v3807_v41, %v4085_v1 }
  0xcd   : > { %5266 = vst [vmem:[#allocation47_spill] sm:$0xff] %v4111_v49  ;;  %v1359_v5 = vmul.f32 %v3810_v42, %v4093_v21  ;;  %v1360_v20 = vmul.f32 %v3810_v42, %v4096_v63  ;;  %v1363_v23 = vmul.f32 %v3810_v42, %v4076_v6  ;;  %v1364_v54 = vmul.f32 %v3810_v42, %v4079_v39 }
  0xce   : > { %v1367_v55 = vmul.f32 %v3810_v42, %v4088_v26  ;;  %v1368_v35 = vmul.f32 %v3810_v42, %v4105_v8  ;;  %v1443_v50 = vmul.f32 %v3815_v43, %v4099_v36  ;;  %v1444_v0 = vmul.f32 %v3815_v43, %v4102_v10 }
  0xcf   : > { %v1399_v45 = vadd.f32 %v1359_v5, %v1315_v59  ;;  %v1400_v58 = vadd.f32 %v1360_v20, %v1316_v37  ;;  %v1403_v53 = vadd.f32 %v1363_v23, %v1319_v13  ;;  %v1404_v28 = vadd.f32 %v1364_v54, %v1320_v19  ;;  %v1926_v19 = vld [vmem:[#allocation2 + $0x112] sm:$0xff] }
  0xd0   : > { %v1407_v46 = vadd.f32 %v1367_v55, %v1323_v12  ;;  %v1408_v9 = vadd.f32 %v1368_v35, %v1324_v57  ;;  %v1447_v33 = vmul.f32 %v3815_v43, %v4082_v34  ;;  %v1448_v15 = vmul.f32 %v3815_v43, %v4085_v1  ;;  %v1930_v57 = vld [vmem:[#allocation2 + $0x152] sm:$0xff] }
  0xd1   : > { %v1451_v51 = vmul.f32 %v3815_v43, %v4108_v29  ;;  %v1452_v25 = vmul.f32 %v3815_v43, %v4111_v49  ;;  %v1483_v56 = vadd.f32 %v1443_v50, %v1399_v45  ;;  %v1484_v60 = vadd.f32 %v1444_v0, %v1400_v58  ;;  %v5268_v54 = vld [vmem:[#allocation34_spill] sm:$0xff]  ;;  %v5269_v55 = vld [vmem:[#allocation19_spill] sm:$0xff] }
  0xd2   : > { %v4149_v48 = vrot.slane %v3865_v2, %v3667_v14  ;;  %v1487_v4 = vadd.f32 %v1447_v33, %v1403_v53  ;;  %v1488_v7 = vadd.f32 %v1448_v15, %v1404_v28  ;;  %v1762_v3 = vmul.f32 %v3819_v47, %v1718_v11  ;;  %v1934_v45 = vld [vmem:[#allocation2 + $0x192] sm:$0xff]  ;;  %v5271_v28 = vld [vmem:[#allocation36_spill] sm:$0xff]  ;;  %v777_v11 = vld [vmem:[%s3657_s1 + $0x1e7] sm:$0xff] }
  0xd3   : > { %v1491_v18 = vadd.f32 %v1451_v51, %v1407_v46  ;;  %v1492_v52 = vadd.f32 %v1452_v25, %v1408_v9  ;;  %v1530_v27 = vadd.f32 %v3909_v17, %v1483_v56  ;;  %v1531_v59 = vadd.f32 %v3909_v17, %v1484_v60  ;;  %v5270_v58 = vld [vmem:[#allocation35_spill] sm:$0xff]  ;;  %v869_v25 = vld [vmem:[%s3657_s1 + $0x1e8] sm:$0xff] }
  0xd4   : > { %5267 = vst [vmem:[#allocation48_spill] sm:$0xff] %v4149_v48  ;;  %v1766_v37 = vmul.f32 %v3819_v47, %v1722_v24  ;;  %v1534_v12 = vadd.f32 %v3909_v17, %v1487_v4  ;;  %v1535_v13 = vadd.f32 %v3909_v17, %v1488_v7  ;;  %v1770_v2 = vmul.f32 %v3819_v47, %v1726_v44  ;;  %v778_v24 = vld [vmem:[%s3657_s1 + $0x1ef] sm:$0xff] }
  0xd5   : > { %v1538_v14 = vadd.f32 %v3909_v17, %v1491_v18  ;;  %v1539_v5 = vadd.f32 %v3909_v17, %v1492_v52  ;;  %v1620_v20 = vmul.f32 0.0, %v1530_v27  ;;  %v1621_v23 = vmul.f32 0.0, %v1531_v59  ;;  %v870_v7 = vld [vmem:[%s3657_s1 + $0x1f0] sm:$0xff] }
  0xd6   : > { %v1846_v35 = vmul.f32 %v5269_v55, %v5268_v54  ;;  %1664 = vst [vmem:[#allocation2 + $0x48] sm:$0xff] %v1534_v12  ;;  %1665 = vst [vmem:[#allocation2 + $0x50] sm:$0xff] %v1535_v13  ;;  %v1833_v50 = vmul.f32 %v5269_v55, %v1534_v12  ;;  %v1850_v53 = vmul.f32 %v5269_v55, %v5270_v58  ;;  %v1005_v18 = vld [vmem:[%s3657_s1 + $0x1e9] sm:$0xff]  ;;  %v1006_v52 = vld [vmem:[%s3657_s1 + $0x1f1] sm:$0xff] }
  0xd7   : > { %1668 = vst [vmem:[#allocation2 + $0x88] sm:$0xff] %v1538_v14  ;;  %v1837_v0 = vmul.f32 %v5269_v55, %v1538_v14  ;;  %v1854_v46 = vmul.f32 %v5269_v55, %v5271_v28  ;;  %1660 = vst [vmem:[#allocation2 + $0x8] sm:$0xff] %v1620_v20  ;;  %v1829_v9 = vmul.f32 %v5269_v55, %v1620_v20  ;;  %v5272_v12 = vld [vmem:[#allocation17_spill] sm:$0xff] }
  0xd8   : > { %1661 = vst [vmem:[#allocation2 + $0x10] sm:$0xff] %v1621_v23  ;;  %1669 = vst [vmem:[#allocation2 + $0x90] sm:$0xff] %v1539_v5  ;;  %v1886_v33 = vadd.f32 %v1846_v35, %v1762_v3  ;;  %v1970_v15 = vmul.f32 %v3923_v31, %v1926_v19  ;;  %v1974_v51 = vmul.f32 %v3923_v31, %v1930_v57 }
  0xd9   : > { %v1890_v56 = vadd.f32 %v1850_v53, %v1766_v37  ;;  %v1894_v60 = vadd.f32 %v1854_v46, %v1770_v2  ;;  %v1978_v44 = vmul.f32 %v3923_v31, %v1934_v45  ;;  %v1830_v4 = vmul.f32 %v5269_v55, %v1621_v23  ;;  %v5273_v37 = vld [vmem:[#allocation18_spill] sm:$0xff] }
  0xda   : > { %v2010_v27 = vadd.f32 %v1970_v15, %v1886_v33  ;;  %v1834_v59 = vmul.f32 %v5269_v55, %v1535_v13  ;;  %v1838_v3 = vmul.f32 %v5269_v55, %v1539_v5  ;;  %v825_v14 = vmul.f32 %v5272_v12, %v777_v11  ;;  %v5277_v53 = vld [vmem:[#allocation22_spill] sm:$0xff] }
  0xdb   : > { %v2014_v19 = vadd.f32 %v1974_v51, %v1890_v56  ;;  %v2018_v57 = vadd.f32 %v1978_v44, %v1894_v60  ;;  %v826_v20 = vmul.f32 %v5272_v12, %v778_v24  ;;  %v917_v2 = vmul.f32 %v5273_v37, %v869_v25  ;;  %v5278_v24 = vld [vmem:[#allocation23_spill] sm:$0xff]  ;;  %v5279_v56 = vld [vmem:[#allocation26_spill] sm:$0xff] }
  0xdc   : > { %v4185_v54 = vadd.f32 %v3926_v32, %v2010_v27  ;;  %v918_v23 = vmul.f32 %v5273_v37, %v870_v7  ;;  %v1053_v35 = vmul.f32 %v3697_v40, %v1005_v18  ;;  %v1054_v45 = vmul.f32 %v3697_v40, %v1006_v52 }
  0xdd   : > { %v4191_v13 = vadd.f32 %v3926_v32, %v2014_v19  ;;  %v4194_v5 = vadd.f32 %v3926_v32, %v2018_v57  ;;  %v961_v58 = vadd.f32 %v917_v2, %v825_v14  ;;  %v4198_v28 = vmul.f32 %v3807_v41, %v5277_v53  ;;  %v1705_v46 = vld [vmem:[#allocation2 + $0x46] sm:$0xff]  ;;  %v1914_v29 = vld [vmem:[#allocation2 + $0x52] sm:$0xff] }
  0xde   : > { %5274 = vst [vmem:[#allocation34_spill] sm:$0xff] %v4185_v54  ;;  %v1709_v11 = vld [vmem:[#allocation2 + $0x86] sm:$0xff]  ;;  %v2236_v15 = vmul.f32 %v3940_v61, %v4185_v54  ;;  %v962_v51 = vadd.f32 %v918_v23, %v826_v20  ;;  %v4204_v25 = vmul.f32 %v3807_v41, %v5278_v24  ;;  %v4208_v60 = vmul.f32 %v3807_v41, %v5279_v56 }
  0xdf   : > { %5275 = vst [vmem:[#allocation19_spill] sm:$0xff] %v4191_v13  ;;  %5276 = vst [vmem:[#allocation35_spill] sm:$0xff] %v4194_v5  ;;  %v1913_v33 = vld [vmem:[#allocation2 + $0x4a] sm:$0xff]  ;;  %v1749_v7 = vmul.f32 %v3819_v47, %v1705_v46  ;;  %v1753_v18 = vmul.f32 %v3819_v47, %v1709_v11  ;;  %v2272_v19 = vmul.f32 %v3943_v62, %v4191_v13  ;;  %v1910_v49 = vld [vmem:[#allocation2 + $0x12] sm:$0xff] }
  0xe0   : > { %v1701_v44 = vld [vmem:[#allocation2 + $0x6] sm:$0xff]  ;;  %v1957_v14 = vmul.f32 %v3923_v31, %v1913_v33  ;;  %v2340_v23 = vmul.f32 %v3966_v16, %v4194_v5  ;;  %v1702_v30 = vld [vmem:[#allocation2 + $0xe] sm:$0xff] }
  0xe1   : > { %v1909_v52 = vld [vmem:[#allocation2 + $0xa] sm:$0xff]  ;;  %v1745_v57 = vmul.f32 %v3819_v47, %v1701_v44  ;;  %v1873_v11 = vadd.f32 %v1833_v50, %v1749_v7  ;;  %v1877_v24 = vadd.f32 %v1837_v0, %v1753_v18  ;;  %v2304_v53 = vadd.f32 %v2272_v19, %v2236_v15  ;;  %v1918_v1 = vld [vmem:[#allocation2 + $0x92] sm:$0xff] }
  0xe2   : > { %v1917_v27 = vld [vmem:[#allocation2 + $0x8a] sm:$0xff]  ;;  %v1953_v20 = vmul.f32 %v3923_v31, %v1909_v52  ;;  %v1746_v33 = vmul.f32 %v3819_v47, %v1702_v30  ;;  %v1958_v15 = vmul.f32 %v3923_v31, %v1914_v29  ;;  %v1962_v7 = vmul.f32 %v3923_v31, %v1918_v1 }
  0xe3   : > { %v1961_v2 = vmul.f32 %v3923_v31, %v1917_v27  ;;  %v1706_v46 = vld [vmem:[#allocation2 + $0x4e] sm:$0xff]  ;;  %v1869_v13 = vadd.f32 %v1829_v9, %v1745_v57  ;;  %v1954_v27 = vmul.f32 %v3923_v31, %v1910_v49  ;;  %v1997_v34 = vadd.f32 %v1957_v14, %v1873_v11  ;;  %v5287_v11 = vld [vmem:[#allocation25_spill] sm:$0xff] }
  0xe4   : > { %v1710_v54 = vld [vmem:[#allocation2 + $0x8e] sm:$0xff]  ;;  %v1750_v44 = vmul.f32 %v3819_v47, %v1706_v46  ;;  %v2372_v10 = vadd.f32 %v2340_v23, %v2304_v53  ;;  %v1870_v36 = vadd.f32 %v1830_v4, %v1746_v33  ;;  %v1097_v4 = vadd.f32 %v1053_v35, %v961_v58  ;;  %v5286_v23 = vld [vmem:[#allocation24_spill] sm:$0xff] }
  0xe5   : > { %v1754_v52 = vmul.f32 %v3819_v47, %v1710_v54  ;;  %v2001_v5 = vadd.f32 %v1961_v2, %v1877_v24  ;;  %v1993_v8 = vadd.f32 %v1953_v20, %v1869_v13  ;;  %v4226_v30 = vadd.f32 %v3926_v32, %v1997_v34  ;;  %v5285_v57 = vld [vmem:[#allocation31_spill] sm:$0xff] }
  0xe6   : > { %v1874_v50 = vadd.f32 %v1834_v59, %v1750_v44  ;;  %v2411_v54 = vadd.f32 %v4066_v22, %v2372_v10  ;;  %v1994_v24 = vadd.f32 %v1954_v27, %v1870_v36  ;;  %v4244_v36 = vadd.f32 %v3804_v38, %v1097_v4  ;;  %v5288_v44 = vld [vmem:[#allocation28_spill] sm:$0xff] }
  0xe7   : > { %v1878_v0 = vadd.f32 %v1838_v3, %v1754_v52  ;;  %v4229_v9 = vadd.f32 %v3926_v32, %v2001_v5  ;;  %v2174_v49 = vadd.f32 %v4149_v48, %v1993_v8  ;;  %v2255_v59 = vmul.f32 %v3943_v62, %v4226_v30  ;;  %v5283_v5 = vld [vmem:[#allocation27_spill] sm:$0xff] }
  0xe8   : > { %v1998_v53 = vadd.f32 %v1958_v15, %v1874_v50  ;;  %3051 = vmatmul.mubr.f32.vlgmr.msra.gmra.mrb[0].mxu1 %v2411_v54  ;;  %v1098_v3 = vadd.f32 %v1054_v45, %v962_v51  ;;  %v2175_v10 = vadd.f32 %v4149_v48, %v1994_v24  ;;  %v1338_v58 = vmul.f32 %v3807_v41, %v5283_v5  ;;  %v5284_v45 = vld [vmem:[#allocation30_spill] sm:$0xff]  ;;  %v5290_v54 = vld [vmem:[#allocation32_spill] sm:$0xff] }
  0xe9   : > { %5280 = vst [vmem:[#allocation36_spill] sm:$0xff] %v4229_v9  ;;  %v2323_v29 = vmul.f32 %v3966_v16, %v4229_v9  ;;  %v2002_v34 = vadd.f32 %v1962_v7, %v1878_v0  ;;  %v2219_v13 = vmul.f32 %v3940_v61, %v2174_v49  ;;  %v1341_v51 = vmul.f32 %v3807_v41, %v5284_v45  ;;  %v5289_v0 = vld [vmem:[#allocation29_spill] sm:$0xff] }
  0xea   : > { %v4241_v1 = vadd.f32 %v3926_v32, %v1998_v53  ;;  %v4250_v35 = vadd.f32 %v3804_v38, %v1098_v3  ;;  %v2220_v14 = vmul.f32 %v3940_v61, %v2175_v10  ;;  %v1342_v20 = vmul.f32 %v3807_v41, %v5285_v57  ;;  %v5291_v49 = vld [vmem:[#allocation33_spill] sm:$0xff] }
  0xeb   : > { %v4247_v8 = vadd.f32 %v3926_v32, %v2002_v34  ;;  %v2287_v18 = vadd.f32 %v2255_v59, %v2219_v13  ;;  %v1377_v46 = vmul.f32 %v3810_v42, %v5286_v23  ;;  %v1378_v33 = vmul.f32 %v3810_v42, %v5287_v11  ;;  %v761_v10 = vld [vmem:[%s3657_s1 + $0xe7] sm:$0xff] }
  0xec   : > { %5281 = vst [vmem:[#allocation17_spill] sm:$0xff] %v4241_v1  ;;  %v2256_v19 = vmul.f32 %v3943_v62, %v4241_v1  ;;  %v1381_v52 = vmul.f32 %v3810_v42, %v5288_v44  ;;  %v1382_v15 = vmul.f32 %v3810_v42, %v5289_v0  ;;  %v1385_v7 = vmul.f32 %v3810_v42, %v5290_v54 }
  0xed   : > { %5282 = vst [vmem:[#allocation18_spill] sm:$0xff] %v4247_v8  ;;  %v2324_v2 = vmul.f32 %v3966_v16, %v4247_v8  ;;  %v2355_v27 = vadd.f32 %v2323_v29, %v2287_v18  ;;  %v1386_v24 = vmul.f32 %v3810_v42, %v5291_v49  ;;  %v1417_v53 = vadd.f32 %v1377_v46, %v4198_v28  ;;  %v854_v46 = vld [vmem:[%s3657_s1 + $0xf0] sm:$0xff] }
  0xee   : > { %v2288_v50 = vadd.f32 %v2256_v19, %v2220_v14  ;;  %v1418_v4 = vadd.f32 %v1378_v33, %v4204_v25  ;;  %v1421_v59 = vadd.f32 %v1381_v52, %v4208_v60  ;;  %v1422_v3 = vadd.f32 %v1382_v15, %v1338_v58  ;;  %v762_v25 = vld [vmem:[%s3657_s1 + $0xef] sm:$0xff] }
  0xef   : > { %v2394_v29 = vadd.f32 %v4066_v22, %v2355_v27  ;;  %v1425_v13 = vadd.f32 %v1385_v7, %v1341_v51  ;;  %v1426_v18 = vadd.f32 %v1386_v24, %v1342_v20  ;;  %v1461_v14 = vmul.f32 %v3815_v43, %v5279_v56  ;;  %v853_v20 = vld [vmem:[%s3657_s1 + $0xe8] sm:$0xff]  ;;  %v990_v7 = vld [vmem:[%s3657_s1 + $0xf1] sm:$0xff] }
  0xf0   : > { %v2356_v34 = vadd.f32 %v2324_v2, %v2288_v50  ;;  %v1462_v19 = vmul.f32 %v3815_v43, %v5283_v5  ;;  %v1465_v28 = vmul.f32 %v3815_v43, %v5284_v45  ;;  %v1466_v58 = vmul.f32 %v3815_v43, %v5285_v57  ;;  %v989_v52 = vld [vmem:[%s3657_s1 + $0xe9] sm:$0xff] }
  0xf1   : > { %3026 = vmatprep.mubr.f32.mxu0 %v2394_v29  ;;  %v1469_v51 = vmul.f32 %v3815_v43, %v4244_v36  ;;  %v1470_v56 = vmul.f32 %v3815_v43, %v4250_v35  ;;  %v1501_v5 = vadd.f32 %v1461_v14, %v1417_v53  ;;  %v809_v45 = vmul.f32 %v5272_v12, %v761_v10 }
  0xf2   : > { %v2395_v60 = vadd.f32 %v4066_v22, %v2356_v34  ;;  %v1502_v2 = vadd.f32 %v1462_v19, %v1418_v4  ;;  %v1505_v23 = vadd.f32 %v1465_v28, %v1421_v59  ;;  %v1506_v11 = vadd.f32 %v1466_v58, %v1422_v3 }
  0xf3   : > { %v1509_v33 = vadd.f32 %v1469_v51, %v1425_v13  ;;  %v1510_v44 = vadd.f32 %v1470_v56, %v1426_v18  ;;  %v810_v57 = vmul.f32 %v5272_v12, %v762_v25  ;;  %v1548_v27 = vadd.f32 %v3909_v17, %v1501_v5 }
  0xf4   : > { %3027 = vmatmul.mubr.f32.vlgmr.msra.gmra.mrb[0].mxu0 %v2395_v60  ;;  %v4301_v50 = vadd.f32 %v3909_v17, %v1502_v2  ;;  %v1552_v0 = vadd.f32 %v3909_v17, %v1505_v23  ;;  %v901_v15 = vmul.f32 %v5273_v37, %v853_v20  ;;  %v4307_v24 = vadd.f32 %v3909_v17, %v1506_v11  ;;  %v5292_v20 = vld [vmem:[#allocation45_spill] sm:$0xff]  ;;  %v5293_v2 = vld [vmem:[#allocation43_spill] sm:$0xff] }
  0xf5   : > { %v1556_v53 = vadd.f32 %v3909_v17, %v1509_v33  ;;  %v4311_v4 = vadd.f32 %v3909_v17, %v1510_v44  ;;  %v902_v59 = vmul.f32 %v5273_v37, %v854_v46  ;;  %1678 = vst [vmem:[#allocation2 + $0x128] sm:$0xff] %v1548_v27  ;;  %v1847_v29 = vmul.f32 %v5269_v55, %v1548_v27  ;;  %v5295_v46 = vld [vmem:[#allocation41_spill] sm:$0xff]  ;;  %v5296_v33 = vld [vmem:[#allocation42_spill] sm:$0xff] }
  0xf6   : > { %1679 = vst [vmem:[#allocation2 + $0x130] sm:$0xff] %v4301_v50  ;;  %1682 = vst [vmem:[#allocation2 + $0x168] sm:$0xff] %v1552_v0  ;;  %v1851_v34 = vmul.f32 %v5269_v55, %v1552_v0  ;;  %v945_v3 = vadd.f32 %v901_v15, %v809_v45  ;;  %v1037_v13 = vmul.f32 %v3697_v40, %v989_v52  ;;  %v5297_v52 = vld [vmem:[#allocation46_spill] sm:$0xff]  ;;  %v5298_v0 = vld [vmem:[#allocation47_spill] sm:$0xff] }
  0xf7   : > { %1683 = vst [vmem:[#allocation2 + $0x170] sm:$0xff] %v4307_v24  ;;  %1686 = vst [vmem:[#allocation2 + $0x1a8] sm:$0xff] %v1556_v53  ;;  %v1855_v10 = vmul.f32 %v5269_v55, %v1556_v53  ;;  %v946_v18 = vadd.f32 %v902_v59, %v810_v57  ;;  %v1038_v14 = vmul.f32 %v3697_v40, %v990_v7 }
  0xf8   : > { %1687 = vst [vmem:[#allocation2 + $0x1b0] sm:$0xff] %v4311_v4  ;;  %v1317_v19 = vmul.f32 %v3807_v41, %v4093_v21  ;;  %v1081_v28 = vadd.f32 %v1037_v13, %v945_v3  ;;  %v1318_v25 = vmul.f32 %v3807_v41, %v4096_v63  ;;  %v1321_v60 = vmul.f32 %v3807_v41, %v4076_v6  ;;  %v5294_v63 = vld [vmem:[#allocation44_spill] sm:$0xff] }
  0xf9   : > { %v1322_v58 = vmul.f32 %v3807_v41, %v4079_v39  ;;  %v1082_v51 = vadd.f32 %v1038_v14, %v946_v18  ;;  %v1325_v56 = vmul.f32 %v3807_v41, %v4088_v26  ;;  %v1326_v5 = vmul.f32 %v3807_v41, %v5292_v20 }
  0xfa   : > { %v1361_v21 = vmul.f32 %v3810_v42, %v5293_v2  ;;  %v4337_v23 = vadd.f32 %v3804_v38, %v1081_v28  ;;  %v1362_v45 = vmul.f32 %v3810_v42, %v5294_v63  ;;  %v1365_v11 = vmul.f32 %v3810_v42, %v5295_v46 }
  0xfb   : > { %v1366_v44 = vmul.f32 %v3810_v42, %v5296_v33  ;;  %v4346_v57 = vadd.f32 %v3804_v38, %v1082_v51  ;;  %v1369_v27 = vmul.f32 %v3810_v42, %v5297_v52  ;;  %v1370_v15 = vmul.f32 %v3810_v42, %v5298_v0 }
  0xfc   : > { %v1401_v7 = vadd.f32 %v1361_v21, %v1317_v19  ;;  %v1402_v53 = vadd.f32 %v1362_v45, %v1318_v25  ;;  %v1405_v59 = vadd.f32 %v1365_v11, %v1321_v60  ;;  %v1445_v13 = vmul.f32 %v3815_v43, %v4076_v6  ;;  %v1719_v18 = vld [vmem:[#allocation2 + $0x126] sm:$0xff] }
  0xfd   : > { %v1406_v3 = vadd.f32 %v1366_v44, %v1322_v58  ;;  %v1723_v14 = vld [vmem:[#allocation2 + $0x166] sm:$0xff]  ;;  %v1409_v2 = vadd.f32 %v1369_v27, %v1325_v56  ;;  %v1410_v63 = vadd.f32 %v1370_v15, %v1326_v5  ;;  %v1446_v51 = vmul.f32 %v3815_v43, %v4079_v39 }
  0xfe   : > { %v1927_v28 = vld [vmem:[#allocation2 + $0x12a] sm:$0xff]  ;;  %v1449_v46 = vmul.f32 %v3815_v43, %v4088_v26  ;;  %v1763_v19 = vmul.f32 %v3819_v47, %v1719_v18  ;;  %v1767_v25 = vmul.f32 %v3819_v47, %v1723_v14  ;;  %v1450_v21 = vmul.f32 %v3815_v43, %v5292_v20 }
  0xff   : > { %v1727_v33 = vld [vmem:[#allocation2 + $0x1a6] sm:$0xff]  ;;  %v1971_v6 = vmul.f32 %v3923_v31, %v1927_v28  ;;  %v1453_v26 = vmul.f32 %v3815_v43, %v4337_v23  ;;  %v1454_v44 = vmul.f32 %v3815_v43, %v4346_v57  ;;  %v1485_v27 = vadd.f32 %v1445_v13, %v1401_v7 }
 0x100   : > { %v1931_v60 = vld [vmem:[#allocation2 + $0x16a] sm:$0xff]  ;;  %v1771_v56 = vmul.f32 %v3819_v47, %v1727_v33  ;;  %v1887_v45 = vadd.f32 %v1847_v29, %v1763_v19  ;;  %v1891_v11 = vadd.f32 %v1851_v34, %v1767_v25  ;;  %v1486_v18 = vadd.f32 %v1446_v51, %v1402_v53 }
 0x101   : > { %v1935_v58 = vld [vmem:[#allocation2 + $0x1aa] sm:$0xff]  ;;  %v1975_v5 = vmul.f32 %v3923_v31, %v1931_v60  ;;  %v1489_v14 = vadd.f32 %v1449_v46, %v1405_v59  ;;  %v1490_v28 = vadd.f32 %v1450_v21, %v1406_v3  ;;  %v1493_v33 = vadd.f32 %v1453_v26, %v1409_v2  ;;  %v1928_v21 = vld [vmem:[#allocation2 + $0x132] sm:$0xff] }
 0x102   : > { %v1979_v39 = vmul.f32 %v3923_v31, %v1935_v58  ;;  %v1895_v15 = vadd.f32 %v1855_v10, %v1771_v56  ;;  %v2011_v20 = vadd.f32 %v1971_v6, %v1887_v45  ;;  %v1494_v1 = vadd.f32 %v1454_v44, %v1410_v63  ;;  %v1720_v59 = vld [vmem:[#allocation2 + $0x12e] sm:$0xff] }
 0x103   : > { %v2015_v8 = vadd.f32 %v1975_v5, %v1891_v11  ;;  %v1532_v58 = vadd.f32 %v3909_v17, %v1485_v27  ;;  %v1533_v9 = vadd.f32 %v3909_v17, %v1486_v18  ;;  %v1536_v29 = vadd.f32 %v3909_v17, %v1489_v14  ;;  %v1724_v3 = vld [vmem:[#allocation2 + $0x16e] sm:$0xff] }
 0x104   : > { %v2019_v60 = vadd.f32 %v1979_v39, %v1895_v15  ;;  %v4374_v34 = vadd.f32 %v3926_v32, %v2011_v20  ;;  %v1537_v10 = vadd.f32 %v3909_v17, %v1490_v28  ;;  %v1540_v53 = vadd.f32 %v3909_v17, %v1493_v33  ;;  %v1728_v46 = vld [vmem:[#allocation2 + $0x1ae] sm:$0xff] }
 0x105   : > { %v4377_v7 = vadd.f32 %v3926_v32, %v2015_v8  ;;  %v1541_v2 = vadd.f32 %v3909_v17, %v1494_v1  ;;  %v1622_v63 = vmul.f32 0.0, %v1532_v58  ;;  %v1623_v51 = vmul.f32 0.0, %v1533_v9  ;;  %1666 = vst [vmem:[#allocation2 + $0x68] sm:$0xff] %v1536_v29  ;;  %v1932_v56 = vld [vmem:[#allocation2 + $0x172] sm:$0xff]  ;;  %v779_v27 = vld [vmem:[%s3657_s1 + $0x207] sm:$0xff] }
 0x106   : > { %5299 = vst [vmem:[#allocation26_spill] sm:$0xff] %v4374_v34  ;;  %v4382_v13 = vadd.f32 %v3926_v32, %v2019_v60  ;;  %v2237_v19 = vmul.f32 %v3940_v61, %v4374_v34  ;;  %1667 = vst [vmem:[#allocation2 + $0x70] sm:$0xff] %v1537_v10  ;;  %v1835_v25 = vmul.f32 %v5269_v55, %v1536_v29  ;;  %v1936_v17 = vld [vmem:[#allocation2 + $0x1b2] sm:$0xff] }
 0x107   : > { %5300 = vst [vmem:[#allocation27_spill] sm:$0xff] %v4377_v7  ;;  %v2273_v8 = vmul.f32 %v3943_v62, %v4377_v7  ;;  %1670 = vst [vmem:[#allocation2 + $0xa8] sm:$0xff] %v1540_v53  ;;  %v1839_v6 = vmul.f32 %v5269_v55, %v1540_v53  ;;  %v1831_v1 = vmul.f32 %v5269_v55, %v1622_v63  ;;  %v780_v20 = vld [vmem:[%s3657_s1 + $0x20f] sm:$0xff] }
 0x108   : > { %5301 = vst [vmem:[#allocation30_spill] sm:$0xff] %v4382_v13  ;;  %v2341_v9 = vmul.f32 %v3966_v16, %v4382_v13  ;;  %1662 = vst [vmem:[#allocation2 + $0x28] sm:$0xff] %v1622_v63  ;;  %v1764_v5 = vmul.f32 %v3819_v47, %v1720_v59  ;;  %v1768_v39 = vmul.f32 %v3819_v47, %v1724_v3  ;;  %v872_v53 = vld [vmem:[%s3657_s1 + $0x210] sm:$0xff] }
 0x109   : > { %1663 = vst [vmem:[#allocation2 + $0x30] sm:$0xff] %v1623_v51  ;;  %1671 = vst [vmem:[#allocation2 + $0xb0] sm:$0xff] %v1541_v2  ;;  %v2305_v26 = vadd.f32 %v2273_v8, %v2237_v19  ;;  %v1772_v45 = vmul.f32 %v3819_v47, %v1728_v46  ;;  %v1848_v11 = vmul.f32 %v5269_v55, %v4301_v50  ;;  %v871_v50 = vld [vmem:[%s3657_s1 + $0x208] sm:$0xff] }
 0x10a   : > { %v1852_v44 = vmul.f32 %v5269_v55, %v4307_v24  ;;  %v1856_v15 = vmul.f32 %v5269_v55, %v4311_v4  ;;  %v1972_v18 = vmul.f32 %v3923_v31, %v1928_v21  ;;  %v1976_v14 = vmul.f32 %v3923_v31, %v1932_v56 }
 0x10b   : > { %v1980_v28 = vmul.f32 %v3923_v31, %v1936_v17  ;;  %v2373_v33 = vadd.f32 %v2341_v9, %v2305_v26  ;;  %v1888_v60 = vadd.f32 %v1848_v11, %v1764_v5  ;;  %v1832_v29 = vmul.f32 %v5269_v55, %v1623_v51 }
 0x10c   : > { %v1892_v58 = vadd.f32 %v1852_v44, %v1768_v39  ;;  %v1896_v59 = vadd.f32 %v1856_v15, %v1772_v45  ;;  %v1836_v24 = vmul.f32 %v5269_v55, %v1537_v10  ;;  %v1840_v3 = vmul.f32 %v5269_v55, %v1541_v2  ;;  %v1707_v46 = vld [vmem:[#allocation2 + $0x66] sm:$0xff] }
 0x10d   : > { %v827_v4 = vmul.f32 %v5272_v12, %v779_v27  ;;  %v2412_v63 = vadd.f32 %v4066_v22, %v2373_v33  ;;  %v2012_v19 = vadd.f32 %v1972_v18, %v1888_v60  ;;  %v828_v21 = vmul.f32 %v5272_v12, %v780_v20  ;;  %v1915_v51 = vld [vmem:[#allocation2 + $0x6a] sm:$0xff] }
 0x10e   : > { %v2016_v8 = vadd.f32 %v1976_v14, %v1892_v58  ;;  %v1711_v56 = vld [vmem:[#allocation2 + $0xa6] sm:$0xff]  ;;  %v1751_v17 = vmul.f32 %v3819_v47, %v1707_v46  ;;  %v2020_v9 = vadd.f32 %v1980_v28, %v1896_v59  ;;  %v1708_v5 = vld [vmem:[#allocation2 + $0x6e] sm:$0xff]  ;;  %v919_v39 = vmul.f32 %v5273_v37, %v871_v50 }
 0x10f   : > { %v920_v10 = vmul.f32 %v5273_v37, %v872_v53  ;;  %3053 = vmatprep.mubr.f32.mxu1 %v2412_v63  ;;  %v1703_v2 = vld [vmem:[#allocation2 + $0x26] sm:$0xff]  ;;  %v1755_v26 = vmul.f32 %v3819_v47, %v1711_v56  ;;  %v1959_v44 = vmul.f32 %v3923_v31, %v1915_v51  ;;  %v4422_v27 = vadd.f32 %v3926_v32, %v2012_v19 }
 0x110   : > { %v1911_v45 = vld [vmem:[#allocation2 + $0x2a] sm:$0xff]  ;;  %v4425_v15 = vadd.f32 %v3926_v32, %v2016_v8  ;;  %v1747_v18 = vmul.f32 %v3819_v47, %v1703_v2  ;;  %v1875_v14 = vadd.f32 %v1835_v25, %v1751_v17  ;;  %v4431_v50 = vadd.f32 %v3926_v32, %v2020_v9  ;;  %v1912_v8 = vld [vmem:[#allocation2 + $0x32] sm:$0xff] }
 0x111   : > { %v1919_v11 = vld [vmem:[#allocation2 + $0xaa] sm:$0xff]  ;;  %5302 = vst [vmem:[#allocation31_spill] sm:$0xff] %v4422_v27  ;;  %v1955_v28 = vmul.f32 %v3923_v31, %v1911_v45  ;;  %v1879_v58 = vadd.f32 %v1839_v6, %v1755_v26  ;;  %v2238_v53 = vmul.f32 %v3940_v61, %v4422_v27  ;;  %v1752_v19 = vmul.f32 %v3819_v47, %v1708_v5  ;;  %v1916_v9 = vld [vmem:[#allocation2 + $0x72] sm:$0xff] }
 0x112   : > { %v1963_v20 = vmul.f32 %v3923_v31, %v1919_v11  ;;  %v1704_v33 = vld [vmem:[#allocation2 + $0x2e] sm:$0xff]  ;;  %v2274_v59 = vmul.f32 %v3943_v62, %v4425_v15  ;;  %v1871_v63 = vadd.f32 %v1831_v1, %v1747_v18  ;;  %v1999_v46 = vadd.f32 %v1959_v44, %v1875_v14 }
 0x113   : > { %v1712_v60 = vld [vmem:[#allocation2 + $0xae] sm:$0xff]  ;;  %v1748_v25 = vmul.f32 %v3819_v47, %v1704_v33  ;;  %v2342_v6 = vmul.f32 %v3966_v16, %v4431_v50  ;;  %v1876_v11 = vadd.f32 %v1836_v24, %v1752_v19  ;;  %v1956_v14 = vmul.f32 %v3923_v31, %v1912_v8 }
 0x114   : > { %v2003_v56 = vadd.f32 %v1963_v20, %v1879_v58  ;;  %v2306_v17 = vadd.f32 %v2274_v59, %v2238_v53  ;;  %v1756_v51 = vmul.f32 %v3819_v47, %v1712_v60  ;;  %v1920_v2 = vld [vmem:[#allocation2 + $0xb2] sm:$0xff]  ;;  %v1995_v26 = vadd.f32 %v1955_v28, %v1871_v63  ;;  %v1007_v58 = vld [vmem:[%s3657_s1 + $0x209] sm:$0xff] }
 0x115   : > { %v4443_v1 = vadd.f32 %v3926_v32, %v1999_v46  ;;  %v1872_v45 = vadd.f32 %v1832_v29, %v1748_v25  ;;  %v1960_v60 = vmul.f32 %v3923_v31, %v1916_v9  ;;  %v1964_v28 = vmul.f32 %v3923_v31, %v1920_v2  ;;  %v1008_v53 = vld [vmem:[%s3657_s1 + $0x211] sm:$0xff] }
 0x116   : > { %v4446_v5 = vadd.f32 %v3926_v32, %v2003_v56  ;;  %v2374_v44 = vadd.f32 %v2342_v6, %v2306_v17  ;;  %v1880_v18 = vadd.f32 %v1840_v3, %v1756_v51  ;;  %v2176_v20 = vadd.f32 %v4149_v48, %v1995_v26 }
 0x117   : > { %v2257_v33 = vmul.f32 %v3943_v62, %v4443_v1  ;;  %v1996_v59 = vadd.f32 %v1956_v14, %v1872_v45  ;;  %v963_v3 = vadd.f32 %v919_v39, %v827_v4  ;;  %v2000_v46 = vadd.f32 %v1960_v60, %v1876_v11 }
 0x118   : > { %v2325_v29 = vmul.f32 %v3966_v16, %v4446_v5  ;;  %v2413_v24 = vadd.f32 %v4066_v22, %v2374_v44  ;;  %v2221_v63 = vmul.f32 %v3940_v61, %v2176_v20  ;;  %v2004_v25 = vadd.f32 %v1964_v28, %v1880_v18  ;;  %v5303_v28 = vld [vmem:[#allocation38_spill] sm:$0xff] }
 0x119   : > { %v964_v19 = vadd.f32 %v920_v10, %v828_v21  ;;  %v2177_v8 = vadd.f32 %v4149_v48, %v1996_v59  ;;  %v1055_v56 = vmul.f32 %v3697_v40, %v1007_v58  ;;  %v1056_v17 = vmul.f32 %v3697_v40, %v1008_v53  ;;  %v5311_v48 = vld [vmem:[#allocation18_spill] sm:$0xff] }
 0x11a   : > { %3054 = vmatmul.mubr.f32.gmra.mrb[2].mxu1 %v2413_v24  ;;  %v1343_v6 = vmul.f32 %v3807_v41, %v5290_v54  ;;  %v2289_v51 = vadd.f32 %v2257_v33, %v2221_v63  ;;  %v4466_v9 = vadd.f32 %v3926_v32, %v2000_v46  ;;  %v4469_v4 = vadd.f32 %v3926_v32, %v2004_v25  ;;  %v5304_v63 = vld [vmem:[#allocation39_spill] sm:$0xff] }
 0x11b   : > { %v1344_v21 = vmul.f32 %v3807_v41, %v5291_v49  ;;  %v2222_v39 = vmul.f32 %v3940_v61, %v2177_v8  ;;  %v1099_v10 = vadd.f32 %v1055_v56, %v963_v3  ;;  %v1100_v2 = vadd.f32 %v1056_v17, %v964_v19  ;;  %v5305_v17 = vld [vmem:[#allocation20_spill] sm:$0xff] }
 0x11c   : > { %v1387_v26 = vmul.f32 %v3810_v42, %v4244_v36  ;;  %v2357_v45 = vadd.f32 %v2325_v29, %v2289_v51  ;;  %v2258_v54 = vmul.f32 %v3943_v62, %v4466_v9  ;;  %v2326_v11 = vmul.f32 %v3966_v16, %v4469_v4 }
 0x11d   : > { %v1388_v44 = vmul.f32 %v3810_v42, %v4250_v35  ;;  %v4483_v18 = vadd.f32 %v3804_v38, %v1099_v10  ;;  %v4486_v49 = vadd.f32 %v3804_v38, %v1100_v2  ;;  %v2239_v58 = vmul.f32 %v3940_v61, %v5303_v28  ;;  %v4515_v2 = vld [vmem:[%s5120_s4] ss:$0 sm:$0xff] }
 0x11e   : > { %v1427_v14 = vadd.f32 %v1387_v26, %v1343_v6  ;;  %v2396_v20 = vadd.f32 %v4066_v22, %v2357_v45  ;;  %v2290_v33 = vadd.f32 %v2258_v54, %v2222_v39  ;;  %v1327_v24 = vmul.f32 %v3807_v41, %v5297_v52  ;;  %v5306_v6 = vld [vmem:[#allocation21_spill] sm:$0xff]  ;;  %v5307_v54 = vld [vmem:[#allocation36_spill] sm:$0xff] }
 0x11f   : > { %v1428_v60 = vadd.f32 %v1388_v44, %v1344_v21  ;;  %v1471_v53 = vmul.f32 %v3815_v43, %v4483_v18  ;;  %v1472_v29 = vmul.f32 %v3815_v43, %v4486_v49  ;;  %v1328_v59 = vmul.f32 %v3807_v41, %v5298_v0 }
 0x120   : > { %3029 = vmatprep.mubr.f32.mxu0 %v2396_v20  ;;  %v2358_v3 = vadd.f32 %v2326_v11, %v2290_v33  ;;  %v2275_v46 = vmul.f32 %v3943_v62, %v5304_v63  ;;  %v1371_v25 = vmul.f32 %v3810_v42, %v4337_v23  ;;  %v1372_v19 = vmul.f32 %v3810_v42, %v4346_v57  ;;  %v5308_v20 = vld [vmem:[#allocation19_spill] sm:$0xff] }
 0x121   : > { %v1511_v8 = vadd.f32 %v1471_v53, %v1427_v14  ;;  %v1512_v56 = vadd.f32 %v1472_v29, %v1428_v60  ;;  %v1455_v52 = vmul.f32 %v3815_v43, %v5305_v17  ;;  %v1456_v0 = vmul.f32 %v3815_v43, %v5306_v6  ;;  %v5309_v33 = vld [vmem:[#allocation35_spill] sm:$0xff]  ;;  %v873_v29 = vld [vmem:[%s3657_s1 + $0x228] sm:$0xff] }
 0x122   : > { %v2397_v51 = vadd.f32 %v4066_v22, %v2358_v3  ;;  %v1411_v21 = vadd.f32 %v1371_v25, %v1327_v24  ;;  %v1412_v39 = vadd.f32 %v1372_v19, %v1328_v59  ;;  %v2223_v10 = vmul.f32 %v3940_v61, %v4226_v30  ;;  %v781_v22 = vld [vmem:[%s3657_s1 + $0x227] sm:$0xff]  ;;  %v782_v53 = vld [vmem:[%s3657_s1 + $0x22f] sm:$0xff] }
 0x123   : > { %v1558_v26 = vadd.f32 %v4515_v2, %v1511_v8  ;;  %v1559_v45 = vadd.f32 %v4515_v2, %v1512_v56  ;;  %v2259_v11 = vmul.f32 %v3943_v62, %v5307_v54  ;;  %v2240_v30 = vmul.f32 %v3940_v61, %v5308_v20  ;;  %v874_v24 = vld [vmem:[%s3657_s1 + $0x230] sm:$0xff]  ;;  %v5310_v19 = vld [vmem:[#allocation17_spill] sm:$0xff] }
 0x124   : > { %3030 = vmatmul.mubr.f32.gmra.mrb[2].mxu0 %v2397_v51  ;;  %v1495_v44 = vadd.f32 %v1455_v52, %v1411_v21  ;;  %v1496_v14 = vadd.f32 %v1456_v0, %v1412_v39  ;;  %v2276_v60 = vmul.f32 %v3943_v62, %v5309_v33  ;;  %v4530_v3 = vadd.f32 %v2275_v46, %v2239_v58  ;;  %v1009_v56 = vld [vmem:[%s3657_s1 + $0x229] sm:$0xff]  ;;  %v1010_v52 = vld [vmem:[%s3657_s1 + $0x231] sm:$0xff] }
 0x125   : > { %1688 = vst [vmem:[#allocation2 + $0x1c8] sm:$0xff] %v1558_v26  ;;  %1689 = vst [vmem:[#allocation2 + $0x1d0] sm:$0xff] %v1559_v45  ;;  %v1857_v59 = vmul.f32 %v5269_v55, %v1558_v26  ;;  %v4532_v25 = vadd.f32 %v2259_v11, %v2223_v10  ;;  %v4536_v8 = vmul.f32 %v3940_v61, %v5310_v19 }
 0x126   : > { %v1542_v0 = vadd.f32 %v4515_v2, %v1495_v44  ;;  %v1543_v51 = vadd.f32 %v4515_v2, %v1496_v14  ;;  %v1858_v21 = vmul.f32 %v5269_v55, %v1559_v45  ;;  %v829_v39 = vmul.f32 %v5272_v12, %v781_v22 }
 0x127   : > { %v4546_v58 = vmul.f32 %v3943_v62, %v5311_v48  ;;  %v830_v46 = vmul.f32 %v5272_v12, %v782_v53  ;;  %v921_v10 = vmul.f32 %v5273_v37, %v873_v29  ;;  %v922_v26 = vmul.f32 %v5273_v37, %v874_v24 }
 0x128   : > { %1672 = vst [vmem:[#allocation2 + $0xc8] sm:$0xff] %v1542_v0  ;;  %1673 = vst [vmem:[#allocation2 + $0xd0] sm:$0xff] %v1543_v51  ;;  %v1841_v11 = vmul.f32 %v5269_v55, %v1542_v0  ;;  %v4552_v44 = vadd.f32 %v2276_v60, %v2240_v30  ;;  %v1057_v45 = vmul.f32 %v3697_v40, %v1009_v56 }
 0x129   : > { %v1058_v22 = vmul.f32 %v3697_v40, %v1010_v52  ;;  %v965_v14 = vadd.f32 %v921_v10, %v829_v39  ;;  %v966_v19 = vadd.f32 %v922_v26, %v830_v46  ;;  %v1345_v20 = vmul.f32 %v3807_v41, %v4244_v36 }
 0x12a   : > { %v1346_v53 = vmul.f32 %v3807_v41, %v4250_v35  ;;  %v1842_v29 = vmul.f32 %v5269_v55, %v1543_v51  ;;  %v1389_v24 = vmul.f32 %v3810_v42, %v4483_v18  ;;  %v1390_v30 = vmul.f32 %v3810_v42, %v4486_v49 }
 0x12b   : > { %v2241_v60 = vmul.f32 %v3940_v61, %v4377_v7  ;;  %v1101_v56 = vadd.f32 %v1057_v45, %v965_v14  ;;  %v1102_v52 = vadd.f32 %v1058_v22, %v966_v19  ;;  %v2277_v0 = vmul.f32 %v3943_v62, %v4382_v13  ;;  %v5312_v13 = vld [vmem:[#allocation22_spill] sm:$0xff] }
 0x12c   : > { %v1329_v36 = vmul.f32 %v3807_v41, %v4337_v23  ;;  %v1729_v35 = vld [vmem:[#allocation2 + $0x1c6] sm:$0xff]  ;;  %v1730_v51 = vld [vmem:[#allocation2 + $0x1ce] sm:$0xff]  ;;  %v1429_v46 = vadd.f32 %v1389_v24, %v1345_v20  ;;  %v1430_v10 = vadd.f32 %v1390_v30, %v1346_v53  ;;  %v1330_v26 = vmul.f32 %v3807_v41, %v4346_v57 }
 0x12d   : > { %v1937_v39 = vld [vmem:[#allocation2 + $0x1ca] sm:$0xff]  ;;  %v1373_v28 = vmul.f32 %v3810_v42, %v5305_v17  ;;  %v1773_v45 = vmul.f32 %v3819_v47, %v1729_v35  ;;  %v1774_v14 = vmul.f32 %v3819_v47, %v1730_v51  ;;  %v1938_v19 = vld [vmem:[#allocation2 + $0x1d2] sm:$0xff]  ;;  %v4579_v23 = vadd.f32 %v3804_v38, %v1101_v56 }
 0x12e   : > { %v1981_v22 = vmul.f32 %v3923_v31, %v1937_v39  ;;  %v1982_v7 = vmul.f32 %v3923_v31, %v1938_v19  ;;  %v4583_v20 = vadd.f32 %v3804_v38, %v1102_v52  ;;  %v1374_v57 = vmul.f32 %v3810_v42, %v5306_v6 }
 0x12f   : > { %v1413_v53 = vadd.f32 %v1373_v28, %v1329_v36  ;;  %v1897_v17 = vadd.f32 %v1857_v59, %v1773_v45  ;;  %v1713_v24 = vld [vmem:[#allocation2 + $0xc6] sm:$0xff]  ;;  %v1898_v35 = vadd.f32 %v1858_v21, %v1774_v14  ;;  %v1714_v39 = vld [vmem:[#allocation2 + $0xce] sm:$0xff]  ;;  %v1473_v51 = vmul.f32 %v3815_v43, %v4579_v23 }
 0x130   : > { %v1921_v30 = vld [vmem:[#allocation2 + $0xca] sm:$0xff]  ;;  %v1457_v56 = vmul.f32 %v3815_v43, %v5312_v13  ;;  %v1757_v19 = vmul.f32 %v3819_v47, %v1713_v24  ;;  %v1758_v27 = vmul.f32 %v3819_v47, %v1714_v39  ;;  %v1922_v34 = vld [vmem:[#allocation2 + $0xd2] sm:$0xff]  ;;  %v1474_v28 = vmul.f32 %v3815_v43, %v4583_v20 }
 0x131   : > { %v1965_v52 = vmul.f32 %v3923_v31, %v1921_v30  ;;  %v2021_v6 = vadd.f32 %v1981_v22, %v1897_v17  ;;  %v2022_v59 = vadd.f32 %v1982_v7, %v1898_v35  ;;  %v1966_v21 = vmul.f32 %v3923_v31, %v1922_v34  ;;  %v5313_v39 = vld [vmem:[#allocation23_spill] sm:$0xff] }
 0x132   : > { %v1513_v36 = vadd.f32 %v1473_v51, %v1429_v46  ;;  %v1881_v45 = vadd.f32 %v1841_v11, %v1757_v19  ;;  %v1882_v14 = vadd.f32 %v1842_v29, %v1758_v27  ;;  %v1514_v33 = vadd.f32 %v1474_v28, %v1430_v10  ;;  %v4643_v51 = vld [vmem:[%s5124_s8] ss:$0 sm:$0xff]  ;;  %v875_v28 = vld [vmem:[%s3657_s1 + $0x248] sm:$0xff] }
 0x133   : > { %v1414_v48 = vadd.f32 %v1374_v57, %v1330_v26  ;;  %v4598_v13 = vadd.f32 %v3926_v32, %v2021_v6  ;;  %v4601_v24 = vadd.f32 %v3926_v32, %v2022_v59  ;;  %v1458_v63 = vmul.f32 %v3815_v43, %v5313_v39 }
 0x134   : > { %v1560_v30 = vadd.f32 %v4515_v2, %v1513_v36  ;;  %v2005_v22 = vadd.f32 %v1965_v52, %v1881_v45  ;;  %v2006_v7 = vadd.f32 %v1966_v21, %v1882_v14  ;;  %v1561_v34 = vadd.f32 %v4515_v2, %v1514_v33  ;;  %v876_v45 = vld [vmem:[%s3657_s1 + $0x250] sm:$0xff] }
 0x135   : > { %v1497_v46 = vadd.f32 %v1457_v56, %v1413_v53  ;;  %v2343_v27 = vmul.f32 %v3966_v16, %v4598_v13  ;;  %v2344_v11 = vmul.f32 %v3966_v16, %v4601_v24  ;;  %v2292_v29 = vadd.f32 %v4546_v58, %v4536_v8  ;;  %v1011_v14 = vld [vmem:[%s3657_s1 + $0x249] sm:$0xff] }
 0x136   : > { %1690 = vst [vmem:[#allocation2 + $0x1e8] sm:$0xff] %v1560_v30  ;;  %v1498_v10 = vadd.f32 %v1458_v63, %v1414_v48  ;;  %v4614_v26 = vadd.f32 %v3926_v32, %v2005_v22  ;;  %v4617_v57 = vadd.f32 %v3926_v32, %v2006_v7  ;;  %1691 = vst [vmem:[#allocation2 + $0x1f0] sm:$0xff] %v1561_v34 }
 0x137   : > { %v4619_v33 = vadd.f32 %v2277_v0, %v2241_v60  ;;  %v1544_v53 = vadd.f32 %v4515_v2, %v1497_v46  ;;  %v2375_v17 = vadd.f32 %v2343_v27, %v4530_v3  ;;  %v2376_v35 = vadd.f32 %v2344_v11, %v4552_v44  ;;  %v783_v44 = vld [vmem:[%s3657_s1 + $0x247] sm:$0xff]  ;;  %v784_v0 = vld [vmem:[%s3657_s1 + $0x24f] sm:$0xff] }
 0x138   : > { %v1859_v8 = vmul.f32 %v5269_v55, %v1560_v30  ;;  %v1545_v48 = vadd.f32 %v4515_v2, %v1498_v10  ;;  %v2327_v63 = vmul.f32 %v3966_v16, %v4614_v26  ;;  %v2328_v58 = vmul.f32 %v3966_v16, %v4617_v57 }
 0x139   : > { %1674 = vst [vmem:[#allocation2 + $0xe8] sm:$0xff] %v1544_v53  ;;  %v4632_v60 = vmul.f32 %v3940_v61, %v4443_v1  ;;  %v4636_v3 = vmul.f32 %v3943_v62, %v4446_v5  ;;  %v2414_v56 = vadd.f32 %v4643_v51, %v2375_v17  ;;  %v2415_v19 = vadd.f32 %v4643_v51, %v2376_v35 }
 0x13a   : > { %1675 = vst [vmem:[#allocation2 + $0xf0] sm:$0xff] %v1545_v48  ;;  %v1843_v1 = vmul.f32 %v5269_v55, %v1544_v53  ;;  %v2242_v52 = vmul.f32 %v3940_v61, %v4425_v15  ;;  %v2359_v6 = vadd.f32 %v2327_v63, %v4532_v25  ;;  %v2360_v59 = vadd.f32 %v2328_v58, %v2292_v29  ;;  %v1012_v29 = vld [vmem:[%s3657_s1 + $0x251] sm:$0xff] }
 0x13b   : > { %v1860_v21 = vmul.f32 %v5269_v55, %v1561_v34  ;;  %v2278_v36 = vmul.f32 %v3943_v62, %v4431_v50  ;;  %3056 = vmatprep.mubr.f32.mxu1 %v2414_v56  ;;  %v1844_v30 = vmul.f32 %v5269_v55, %v1545_v48  ;;  %v2226_v39 = vmul.f32 %v3940_v61, %v4466_v9 }
 0x13c   : > { %v831_v22 = vmul.f32 %v5272_v12, %v783_v44  ;;  %v832_v7 = vmul.f32 %v5272_v12, %v784_v0  ;;  %v2398_v25 = vadd.f32 %v4643_v51, %v2359_v6  ;;  %3057 = vmatmul.mubr.f32.gmra.mrb[4].mxu1 %v2415_v19  ;;  %v2399_v34 = vadd.f32 %v4643_v51, %v2360_v59 }
 0x13d   : > { %v1731_v46 = vld [vmem:[#allocation2 + $0x1e6] sm:$0xff]  ;;  %v2262_v27 = vmul.f32 %v3943_v62, %v4469_v4  ;;  %v923_v11 = vmul.f32 %v5273_v37, %v875_v28  ;;  %v1732_v9 = vld [vmem:[#allocation2 + $0x1ee] sm:$0xff]  ;;  %v2310_v35 = vadd.f32 %v2278_v36, %v2242_v52  ;;  %v924_v48 = vmul.f32 %v5273_v37, %v876_v45 }
 0x13e   : > { %v1775_v10 = vmul.f32 %v3819_v47, %v1731_v46  ;;  %v1939_v53 = vld [vmem:[#allocation2 + $0x1ea] sm:$0xff]  ;;  %v1940_v17 = vld [vmem:[#allocation2 + $0x1f2] sm:$0xff]  ;;  %v1059_v63 = vmul.f32 %v3697_v40, %v1011_v14  ;;  %3032 = vmatprep.mubr.f32.mxu0 %v2398_v25  ;;  %v1776_v44 = vmul.f32 %v3819_v47, %v1732_v9  ;;  %v1060_v59 = vmul.f32 %v3697_v40, %v1012_v29 }
 0x13f   : > { %v1983_v58 = vmul.f32 %v3923_v31, %v1939_v53  ;;  %v1984_v0 = vmul.f32 %v3923_v31, %v1940_v17  ;;  %v967_v56 = vadd.f32 %v923_v11, %v831_v22  ;;  %3033 = vmatmul.mubr.f32.gmra.mrb[4].mxu0 %v2399_v34  ;;  %v968_v6 = vadd.f32 %v924_v48, %v832_v7 }
 0x140   : > { %v1899_v19 = vadd.f32 %v1859_v8, %v1775_v10  ;;  %v1715_v28 = vld [vmem:[#allocation2 + $0xe6] sm:$0xff]  ;;  %v1347_v52 = vmul.f32 %v3807_v41, %v4483_v18  ;;  %v1900_v14 = vadd.f32 %v1860_v21, %v1776_v44  ;;  %v1348_v9 = vmul.f32 %v3807_v41, %v4486_v49 }
 0x141   : > { %v1759_v36 = vmul.f32 %v3819_v47, %v1715_v28  ;;  %v1923_v45 = vld [vmem:[#allocation2 + $0xea] sm:$0xff]  ;;  %v1924_v46 = vld [vmem:[#allocation2 + $0xf2] sm:$0xff]  ;;  %v1103_v53 = vadd.f32 %v1059_v63, %v967_v56  ;;  %v1104_v18 = vadd.f32 %v1060_v59, %v968_v6  ;;  %v1391_v49 = vmul.f32 %v3810_v42, %v4579_v23 }
 0x142   : > { %v1716_v25 = vld [vmem:[#allocation2 + $0xee] sm:$0xff]  ;;  %v2023_v22 = vadd.f32 %v1983_v58, %v1899_v19  ;;  %v1967_v8 = vmul.f32 %v3923_v31, %v1923_v45  ;;  %v1968_v34 = vmul.f32 %v3923_v31, %v1924_v46  ;;  %v2024_v29 = vadd.f32 %v1984_v0, %v1900_v14 }
 0x143   : > { %v1760_v7 = vmul.f32 %v3819_v47, %v1716_v25  ;;  %v1883_v11 = vadd.f32 %v1843_v1, %v1759_v36  ;;  %v4684_v10 = vadd.f32 %v3804_v38, %v1103_v53  ;;  %v1392_v48 = vmul.f32 %v3810_v42, %v4583_v20 }
 0x144   : > { %v4687_v21 = vadd.f32 %v3926_v32, %v2023_v22  ;;  %v4694_v58 = vadd.f32 %v3926_v32, %v2024_v29  ;;  %v4697_v1 = vadd.f32 %v3804_v38, %v1104_v18  ;;  %v1431_v56 = vadd.f32 %v1391_v49, %v1347_v52  ;;  %v5315_v18 = vld [vmem:[#allocation39_spill] sm:$0xff] }
 0x145   : > { %v1884_v17 = vadd.f32 %v1844_v30, %v1760_v7  ;;  %v2007_v63 = vadd.f32 %v1967_v8, %v1883_v11  ;;  %v1475_v44 = vmul.f32 %v3815_v43, %v4684_v10  ;;  %v1432_v19 = vadd.f32 %v1392_v48, %v1348_v9  ;;  %v5314_v8 = vld [vmem:[#allocation37_spill] sm:$0xff]  ;;  %v786_v11 = vld [vmem:[%s3657_s1 + $0x26f] sm:$0xff] }
 0x146   : > { %v2345_v0 = vmul.f32 %v3966_v16, %v4687_v21  ;;  %v2293_v6 = vadd.f32 %v4636_v3, %v4632_v60  ;;  %v2346_v59 = vmul.f32 %v3966_v16, %v4694_v58  ;;  %v1476_v38 = vmul.f32 %v3815_v43, %v4697_v1 }
 0x147   : > { %v2008_v30 = vadd.f32 %v1968_v34, %v1884_v17  ;;  %v4704_v28 = vadd.f32 %v3926_v32, %v2007_v63  ;;  %v2294_v14 = vadd.f32 %v2262_v27, %v2226_v39  ;;  %v1515_v52 = vadd.f32 %v1475_v44, %v1431_v56  ;;  %v785_v34 = vld [vmem:[%s3657_s1 + $0x267] sm:$0xff]  ;;  %v878_v44 = vld [vmem:[%s3657_s1 + $0x270] sm:$0xff] }
 0x148   : > { %v2377_v36 = vadd.f32 %v2345_v0, %v4619_v33  ;;  %v2378_v46 = vadd.f32 %v2346_v59, %v2310_v35  ;;  %v1516_v60 = vadd.f32 %v1476_v38, %v1432_v19  ;;  %v2227_v3 = vmul.f32 %v3940_v61, %v5307_v54  ;;  %v877_v63 = vld [vmem:[%s3657_s1 + $0x268] sm:$0xff] }
 0x149   : > { %v4714_v45 = vadd.f32 %v3926_v32, %v2008_v30  ;;  %v2329_v25 = vmul.f32 %v3966_v16, %v4704_v28  ;;  %v1562_v9 = vadd.f32 %v4515_v2, %v1515_v52  ;;  %v2263_v35 = vmul.f32 %v3943_v62, %v4614_v26  ;;  %v1013_v0 = vld [vmem:[%s3657_s1 + $0x269] sm:$0xff] }
 0x14a   : > { %v2416_v53 = vadd.f32 %v4643_v51, %v2377_v36  ;;  %v2417_v39 = vadd.f32 %v4643_v51, %v2378_v46  ;;  %v1563_v27 = vadd.f32 %v4515_v2, %v1516_v60  ;;  %v2331_v7 = vmul.f32 %v3966_v16, %v5314_v8  ;;  %v5316_v56 = vld [vmem:[#allocation18_spill] sm:$0xff] }
 0x14b   : > { %v2330_v33 = vmul.f32 %v3966_v16, %v4714_v45  ;;  %v2361_v22 = vadd.f32 %v2329_v25, %v2293_v6  ;;  %1692 = vst [vmem:[#allocation2 + $0x208] sm:$0xff] %v1562_v9  ;;  %v2243_v17 = vmul.f32 %v3940_v61, %v5315_v18  ;;  %v2279_v49 = vmul.f32 %v3943_v62, %v4598_v13  ;;  %v5317_v59 = vld [vmem:[#allocation34_spill] sm:$0xff] }
 0x14c   : > { %3059 = vmatprep.mubr.f32.mxu1 %v2416_v53  ;;  %1693 = vst [vmem:[#allocation2 + $0x210] sm:$0xff] %v1563_v27  ;;  %v2295_v48 = vadd.f32 %v2263_v35, %v2227_v3  ;;  %v2228_v19 = vmul.f32 %v3940_v61, %v5316_v56  ;;  %v2264_v6 = vmul.f32 %v3943_v62, %v4617_v57  ;;  %v1014_v36 = vld [vmem:[%s3657_s1 + $0x271] sm:$0xff] }
 0x14d   : > { %v2362_v54 = vadd.f32 %v2330_v33, %v2294_v14  ;;  %v2400_v29 = vadd.f32 %v4643_v51, %v2361_v22  ;;  %3060 = vmatmul.mubr.f32.gmra.mrb[6].mxu1 %v2417_v39  ;;  %v2332_v38 = vmul.f32 %v3966_v16, %v5317_v59  ;;  %v1861_v14 = vmul.f32 %v5269_v55, %v1562_v9 }
 0x14e   : > { %v2363_v52 = vadd.f32 %v2331_v7, %v2295_v48  ;;  %v833_v25 = vmul.f32 %v5272_v12, %v785_v34  ;;  %v834_v46 = vmul.f32 %v5272_v12, %v786_v11  ;;  %v2296_v60 = vadd.f32 %v2264_v6, %v2228_v19  ;;  %v5318_v48 = vld [vmem:[#allocation35_spill] sm:$0xff] }
 0x14f   : > { %v2401_v30 = vadd.f32 %v4643_v51, %v2362_v54  ;;  %3035 = vmatprep.mubr.f32.mxu0 %v2400_v29  ;;  %v925_v3 = vmul.f32 %v5273_v37, %v877_v63  ;;  %v926_v53 = vmul.f32 %v5273_v37, %v878_v44  ;;  %v1061_v33 = vmul.f32 %v3697_v40, %v1013_v0 }
 0x150   : > { %v2402_v22 = vadd.f32 %v4643_v51, %v2363_v52  ;;  %v1062_v39 = vmul.f32 %v3697_v40, %v1014_v36  ;;  %v1349_v9 = vmul.f32 %v3807_v41, %v4579_v23  ;;  %v1350_v35 = vmul.f32 %v3807_v41, %v4583_v20 }
 0x151   : > { %3036 = vmatmul.mubr.f32.gmra.mrb[6].mxu0 %v2401_v30  ;;  %v2364_v54 = vadd.f32 %v2332_v38, %v2296_v60  ;;  %v969_v7 = vadd.f32 %v925_v3, %v833_v25  ;;  %v970_v34 = vadd.f32 %v926_v53, %v834_v46  ;;  %v1393_v11 = vmul.f32 %v3810_v42, %v4684_v10  ;;  %v5319_v60 = vld [vmem:[#allocation40_spill] sm:$0xff] }
 0x152   : > { %v1733_v29 = vld [vmem:[#allocation2 + $0x206] sm:$0xff]  ;;  %3038 = vmatprep.mubr.f32.mxu0 %v2402_v22  ;;  %v1862_v18 = vmul.f32 %v5269_v55, %v1563_v27  ;;  %v2244_v63 = vmul.f32 %v3940_v61, %v5318_v48  ;;  %v1394_v44 = vmul.f32 %v3810_v42, %v4697_v1  ;;  %v2229_v23 = vmul.f32 %v3940_v61, %v4446_v5 }
 0x153   : > { %v1777_v20 = vmul.f32 %v3819_v47, %v1733_v29  ;;  %v1941_v0 = vld [vmem:[#allocation2 + $0x20a] sm:$0xff]  ;;  %v1942_v56 = vld [vmem:[#allocation2 + $0x212] sm:$0xff]  ;;  %v2403_v19 = vadd.f32 %v4643_v51, %v2364_v54  ;;  %v1105_v6 = vadd.f32 %v1061_v33, %v969_v7  ;;  %v1106_v38 = vadd.f32 %v1062_v39, %v970_v34 }
 0x154   : > { %v1734_v30 = vld [vmem:[#allocation2 + $0x20e] sm:$0xff]  ;;  %v1985_v27 = vmul.f32 %v3923_v31, %v1941_v0  ;;  %v1986_v52 = vmul.f32 %v3923_v31, %v1942_v56  ;;  %v1433_v25 = vadd.f32 %v1393_v11, %v1349_v9  ;;  %v1434_v53 = vadd.f32 %v1394_v44, %v1350_v35 }
 0x155   : > { %v1778_v36 = vmul.f32 %v3819_v47, %v1734_v30  ;;  %v1901_v46 = vadd.f32 %v1861_v14, %v1777_v20  ;;  %3039 = vmatmul.mubr.f32.gmra.mrb[8].mxu0 %v2403_v19  ;;  %v4775_v5 = vadd.f32 %v5319_v60, %v1105_v6  ;;  %v4778_v3 = vadd.f32 %v5319_v60, %v1106_v38  ;;  %v5320_v54 = vld [vmem:[#allocation26_spill] sm:$0xff]  ;;  %v5321_v19 = vld [vmem:[#allocation31_spill] sm:$0xff] }
 0x156   : > { %v2280_v33 = vmul.f32 %v3943_v62, %v4601_v24  ;;  %v2265_v39 = vmul.f32 %v3943_v62, %v4704_v28  ;;  %v2333_v14 = vmul.f32 %v3966_v16, %v5320_v54  ;;  %v2311_v35 = vadd.f32 %v2279_v49, %v2243_v17  ;;  %v787_v30 = vld [vmem:[%s3657_s1 + $0x287] sm:$0xff]  ;;  %v788_v56 = vld [vmem:[%s3657_s1 + $0x28f] sm:$0xff] }
 0x157   : > { %v1902_v22 = vadd.f32 %v1862_v18, %v1778_v36  ;;  %v2025_v9 = vadd.f32 %v1985_v27, %v1901_v46  ;;  %v1477_v7 = vmul.f32 %v3815_v43, %v4775_v5  ;;  %v1478_v34 = vmul.f32 %v3815_v43, %v4778_v3  ;;  %v1015_v46 = vld [vmem:[%s3657_s1 + $0x289] sm:$0xff] }
 0x158   : > { %v2297_v29 = vadd.f32 %v2265_v39, %v2229_v23  ;;  %v2230_v18 = vmul.f32 %v3940_v61, %v4469_v4  ;;  %v2266_v0 = vmul.f32 %v3943_v62, %v4714_v45  ;;  %v2312_v49 = vadd.f32 %v2280_v33, %v2244_v63  ;;  %v1016_v39 = vld [vmem:[%s3657_s1 + $0x291] sm:$0xff] }
 0x159   : > { %v2026_v11 = vadd.f32 %v1986_v52, %v1902_v22  ;;  %v4793_v48 = vadd.f32 %v3926_v32, %v2025_v9  ;;  %v1517_v44 = vadd.f32 %v1477_v7, %v1433_v25  ;;  %v1518_v20 = vadd.f32 %v1478_v34, %v1434_v53  ;;  %v879_v52 = vld [vmem:[%s3657_s1 + $0x288] sm:$0xff]  ;;  %v880_v25 = vld [vmem:[%s3657_s1 + $0x290] sm:$0xff] }
 0x15a   : > { %v2365_v23 = vadd.f32 %v2333_v14, %v2297_v29  ;;  %v2334_v4 = vmul.f32 %v3966_v16, %v5321_v19  ;;  %v2298_v36 = vadd.f32 %v2266_v0, %v2230_v18  ;;  %v835_v22 = vmul.f32 %v5272_v12, %v787_v30  ;;  %v5322_v9 = vld [vmem:[#allocation30_spill] sm:$0xff] }
 0x15b   : > { %v4800_v17 = vadd.f32 %v3926_v32, %v2026_v11  ;;  %v2347_v6 = vmul.f32 %v3966_v16, %v4793_v48  ;;  %v1564_v38 = vadd.f32 %v4515_v2, %v1517_v44  ;;  %v1565_v27 = vadd.f32 %v4515_v2, %v1518_v20 }
 0x15c   : > { %v2404_v63 = vadd.f32 %v4643_v51, %v2365_v23  ;;  %v836_v33 = vmul.f32 %v5272_v12, %v788_v56  ;;  %v2245_v7 = vmul.f32 %v3940_v61, %v5322_v9  ;;  %v2281_v34 = vmul.f32 %v3943_v62, %v4687_v21 }
 0x15d   : > { %v2348_v53 = vmul.f32 %v3966_v16, %v4800_v17  ;;  %v2379_v14 = vadd.f32 %v2347_v6, %v2311_v35  ;;  %1694 = vst [vmem:[#allocation2 + $0x228] sm:$0xff] %v1564_v38  ;;  %1695 = vst [vmem:[#allocation2 + $0x230] sm:$0xff] %v1565_v27  ;;  %v2366_v11 = vadd.f32 %v2334_v4, %v2298_v36 }
 0x15e   : > { %3041 = vmatprep.mubr.f32.mxu0 %v2404_v63  ;;  %v927_v18 = vmul.f32 %v5273_v37, %v879_v52  ;;  %v928_v44 = vmul.f32 %v5273_v37, %v880_v25  ;;  %v1063_v20 = vmul.f32 %v3697_v40, %v1015_v46  ;;  %v1064_v30 = vmul.f32 %v3697_v40, %v1016_v39 }
 0x15f   : > { %v2380_v29 = vadd.f32 %v2348_v53, %v2312_v49  ;;  %v2418_v0 = vadd.f32 %v4643_v51, %v2379_v14  ;;  %v2405_v35 = vadd.f32 %v4643_v51, %v2366_v11  ;;  %v1351_v56 = vmul.f32 %v3807_v41, %v4684_v10 }
 0x160   : > { %v971_v4 = vadd.f32 %v927_v18, %v835_v22  ;;  %v972_v49 = vadd.f32 %v928_v44, %v836_v33  ;;  %v1352_v6 = vmul.f32 %v3807_v41, %v4697_v1  ;;  %v2246_v36 = vmul.f32 %v3940_v61, %v4431_v50  ;;  %v5323_v33 = vld [vmem:[#allocation38_spill] sm:$0xff] }
 0x161   : > { %v2419_v23 = vadd.f32 %v4643_v51, %v2380_v29  ;;  %3062 = vmatprep.mubr.f32.mxu1 %v2418_v0  ;;  %3042 = vmatmul.mubr.f32.gmra.mrb[10].mxu0 %v2405_v35  ;;  %v1395_v52 = vmul.f32 %v3810_v42, %v4775_v5  ;;  %v1396_v25 = vmul.f32 %v3810_v42, %v4778_v3 }
 0x162   : > { %v2282_v10 = vmul.f32 %v3943_v62, %v4694_v58  ;;  %v1107_v46 = vadd.f32 %v1063_v20, %v971_v4  ;;  %v1108_v53 = vadd.f32 %v1064_v30, %v972_v49  ;;  %v2231_v1 = vmul.f32 %v3940_v61, %v4614_v26 }
 0x163   : > { %3063 = vmatmul.mubr.f32.gmra.mrb[8].mxu1 %v2419_v23  ;;  %v1863_v63 = vmul.f32 %v5269_v55, %v1564_v38  ;;  %v1864_v50 = vmul.f32 %v5269_v55, %v1565_v27  ;;  %v2267_v22 = vmul.f32 %v3943_v62, %v5314_v8  ;;  %v2335_v39 = vmul.f32 %v3966_v16, %v5323_v33 }
 0x164   : > { %v1735_v14 = vld [vmem:[#allocation2 + $0x226] sm:$0xff]  ;;  %v1736_v11 = vld [vmem:[#allocation2 + $0x22e] sm:$0xff]  ;;  %v1306_v29 = vadd.f32 %v5319_v60, %v1107_v46  ;;  %v1307_v18 = vadd.f32 %v5319_v60, %v1108_v53  ;;  %v1435_v44 = vadd.f32 %v1395_v52, %v1351_v56  ;;  %v1436_v26 = vadd.f32 %v1396_v25, %v1352_v6 }
 0x165   : > { %v1943_v9 = vld [vmem:[#allocation2 + $0x22a] sm:$0xff]  ;;  %v1779_v38 = vmul.f32 %v3819_v47, %v1735_v14  ;;  %v1780_v20 = vmul.f32 %v3819_v47, %v1736_v11  ;;  %v1944_v8 = vld [vmem:[#allocation2 + $0x232] sm:$0xff]  ;;  %v2299_v0 = vadd.f32 %v2267_v22, %v2231_v1  ;;  %v2313_v35 = vadd.f32 %v2281_v34, %v2245_v7 }
 0x166   : > { %v1987_v27 = vmul.f32 %v3923_v31, %v1943_v9  ;;  %v1988_v30 = vmul.f32 %v3923_v31, %v1944_v8  ;;  %v1479_v23 = vmul.f32 %v3815_v43, %v1306_v29  ;;  %v1480_v4 = vmul.f32 %v3815_v43, %v1307_v18  ;;  %v789_v25 = vld [vmem:[%s3657_s1 + $0x2a7] sm:$0xff]  ;;  %v790_v34 = vld [vmem:[%s3657_s1 + $0x2af] sm:$0xff] }
 0x167   : > { %v1903_v56 = vadd.f32 %v1863_v63, %v1779_v38  ;;  %v1904_v49 = vadd.f32 %v1864_v50, %v1780_v20  ;;  %v2367_v6 = vadd.f32 %v2335_v39, %v2299_v0  ;;  %v2232_v52 = vmul.f32 %v3940_v61, %v4617_v57  ;;  %v881_v1 = vld [vmem:[%s3657_s1 + $0x2a8] sm:$0xff]  ;;  %v5324_v63 = vld [vmem:[#allocation19_spill] sm:$0xff] }
 0x168   : > { %v2314_v46 = vadd.f32 %v2282_v10, %v2246_v36  ;;  %v1519_v53 = vadd.f32 %v1479_v23, %v1435_v44  ;;  %v1520_v33 = vadd.f32 %v1480_v4, %v1436_v26  ;;  %v2268_v7 = vmul.f32 %v3943_v62, %v5317_v59  ;;  %v882_v39 = vld [vmem:[%s3657_s1 + $0x2b0] sm:$0xff] }
 0x169   : > { %v2027_v22 = vadd.f32 %v1987_v27, %v1903_v56  ;;  %v2028_v14 = vadd.f32 %v1988_v30, %v1904_v49  ;;  %v2406_v9 = vadd.f32 %v4643_v51, %v2367_v6  ;;  %v2336_v50 = vmul.f32 %v3966_v16, %v5324_v63  ;;  %v1017_v44 = vld [vmem:[%s3657_s1 + $0x2a9] sm:$0xff]  ;;  %v1018_v23 = vld [vmem:[%s3657_s1 + $0x2b1] sm:$0xff] }
 0x16a   : > { %v1566_v57 = vadd.f32 %v4515_v2, %v1519_v53  ;;  %v1567_v36 = vadd.f32 %v4515_v2, %v1520_v33  ;;  %v2300_v10 = vadd.f32 %v2268_v7, %v2232_v52  ;;  %v837_v11 = vmul.f32 %v5272_v12, %v789_v25 }
 0x16b   : > { %v4872_v59 = vadd.f32 %v3926_v32, %v2027_v22  ;;  %v4875_v26 = vadd.f32 %v3926_v32, %v2028_v14  ;;  %3044 = vmatprep.mubr.f32.mxu0 %v2406_v9  ;;  %v838_v38 = vmul.f32 %v5272_v12, %v790_v34  ;;  %v929_v27 = vmul.f32 %v5273_v37, %v881_v1 }
 0x16c   : > { %v1656_v20 = vmul.f32 0.0, %v1566_v57  ;;  %v1657_v8 = vmul.f32 0.0, %v1567_v36  ;;  %v2368_v0 = vadd.f32 %v2336_v50, %v2300_v10  ;;  %v930_v30 = vmul.f32 %v5273_v37, %v882_v39  ;;  %v5325_v50 = vld [vmem:[#allocation27_spill] sm:$0xff] }
 0x16d   : > { %v2349_v4 = vmul.f32 %v3966_v16, %v4872_v59  ;;  %v2350_v56 = vmul.f32 %v3966_v16, %v4875_v26  ;;  %v973_v49 = vadd.f32 %v929_v27, %v837_v11  ;;  %v1065_v32 = vmul.f32 %v3697_v40, %v1017_v44 }
 0x16e   : > { %1696 = vst [vmem:[#allocation2 + $0x248] sm:$0xff] %v1656_v20  ;;  %1697 = vst [vmem:[#allocation2 + $0x250] sm:$0xff] %v1657_v8  ;;  %v2407_v12 = vadd.f32 %v4643_v51, %v2368_v0  ;;  %v974_v6 = vadd.f32 %v930_v30, %v838_v38  ;;  %v1066_v53 = vmul.f32 %v3697_v40, %v1018_v23 }
 0x16f   : > { %v2381_v52 = vadd.f32 %v2349_v4, %v2313_v35  ;;  %v2382_v25 = vadd.f32 %v2350_v56, %v2314_v46  ;;  %v1109_v37 = vadd.f32 %v1065_v32, %v973_v49  ;;  %v1353_v33 = vmul.f32 %v3807_v41, %v4775_v5 }
 0x170   : > { %3045 = vmatmul.mubr.f32.gmra.mrb[12].mxu0 %v2407_v12  ;;  %v1354_v7 = vmul.f32 %v3807_v41, %v4778_v3  ;;  %v1397_v34 = vmul.f32 %v3810_v42, %v1306_v29  ;;  %v1398_v1 = vmul.f32 %v3810_v42, %v1307_v18  ;;  %v1110_v35 = vadd.f32 %v1066_v53, %v974_v6 }
 0x171   : > { %v2420_v22 = vadd.f32 %v4643_v51, %v2381_v52  ;;  %v2421_v14 = vadd.f32 %v4643_v51, %v2382_v25  ;;  %v1308_v46 = vadd.f32 %v5319_v60, %v1109_v37  ;;  %v2247_v40 = vmul.f32 %v3940_v61, %v4598_v13  ;;  %v5326_v37 = vld [vmem:[#allocation48_spill] sm:$0xff] }
 0x172   : > { %v2283_v5 = vmul.f32 %v3943_v62, %v4793_v48  ;;  %v1437_v9 = vadd.f32 %v1397_v34, %v1353_v33  ;;  %v1438_v63 = vadd.f32 %v1398_v1, %v1354_v7  ;;  %v1309_v41 = vadd.f32 %v5319_v60, %v1110_v35 }
 0x173   : > { %3065 = vmatprep.mubr.f32.mxu1 %v2420_v22  ;;  %v1481_v42 = vmul.f32 %v3815_v43, %v1308_v46  ;;  %v2233_v3 = vmul.f32 %v3940_v61, %v4704_v28  ;;  %v2269_v29 = vmul.f32 %v3943_v62, %v5320_v54  ;;  %v1865_v18 = vmul.f32 %v5269_v55, %v1656_v20 }
 0x174   : > { %3066 = vmatmul.mubr.f32.gmra.mrb[10].mxu1 %v2421_v14  ;;  %v1866_v13 = vmul.f32 %v5269_v55, %v1657_v8  ;;  %v2248_v48 = vmul.f32 %v3940_v61, %v4601_v24  ;;  %v2337_v39 = vmul.f32 %v3966_v16, %v5325_v50  ;;  %v2284_v28 = vmul.f32 %v3943_v62, %v4800_v17 }
 0x175   : > { %v1737_v60 = vld [vmem:[#allocation2 + $0x246] sm:$0xff]  ;;  %v1738_v36 = vld [vmem:[#allocation2 + $0x24e] sm:$0xff]  ;;  %v1482_v10 = vmul.f32 %v3815_v43, %v1309_v41  ;;  %v1521_v54 = vadd.f32 %v1481_v42, %v1437_v9  ;;  %v2301_v11 = vadd.f32 %v2269_v29, %v2233_v3  ;;  %v2234_v20 = vmul.f32 %v3940_v61, %v4714_v45 }
 0x176   : > { %v1945_v57 = vld [vmem:[#allocation2 + $0x24a] sm:$0xff]  ;;  %v1781_v44 = vmul.f32 %v3819_v47, %v1737_v60  ;;  %v1782_v27 = vmul.f32 %v3819_v47, %v1738_v36  ;;  %v1946_v24 = vld [vmem:[#allocation2 + $0x252] sm:$0xff]  ;;  %v2270_v4 = vmul.f32 %v3943_v62, %v5321_v19  ;;  %v2338_v56 = vmul.f32 %v3966_v16, %v4425_v15 }
 0x177   : > { %v1989_v38 = vmul.f32 %v3923_v31, %v1945_v57  ;;  %v1990_v8 = vmul.f32 %v3923_v31, %v1946_v24  ;;  %v1522_v0 = vadd.f32 %v1482_v10, %v1438_v63  ;;  %v1568_v30 = vadd.f32 %v4515_v2, %v1521_v54 }
 0x178   : > { %v2369_v17 = vadd.f32 %v2337_v39, %v2301_v11  ;;  %v1905_v23 = vadd.f32 %v1865_v18, %v1781_v44  ;;  %v1906_v43 = vadd.f32 %v1866_v13, %v1782_v27  ;;  %v2302_v52 = vadd.f32 %v2270_v4, %v2234_v20  ;;  %v2924_v44 = vld [vmem:[%s3657_s1 + $0x170] sm:$0xff] }
 0x179   : > { %v1569_v49 = vadd.f32 %v4515_v2, %v1522_v0  ;;  %v1658_v32 = vmul.f32 0.0, %v1568_v30  ;;  %v2315_v25 = vadd.f32 %v2283_v5, %v2247_v40  ;;  %v2316_v19 = vadd.f32 %v2284_v28, %v2248_v48 }
 0x17a   : > { %v2408_v12 = vadd.f32 %v4643_v51, %v2369_v17  ;;  %v2029_v45 = vadd.f32 %v1989_v38, %v1905_v23  ;;  %v2030_v6 = vadd.f32 %v1990_v8, %v1906_v43  ;;  %v2370_v34 = vadd.f32 %v2338_v56, %v2302_v52  ;;  %v2907_v23 = vld [vmem:[%s3657_s1 + $0x68] sm:$0xff] }
 0x17b   : > { %v1659_v53 = vmul.f32 0.0, %v1569_v49  ;;  %1698 = vst [vmem:[#allocation2 + $0x268] sm:$0xff] %v1658_v32  ;;  %v1867_v35 = vmul.f32 %v5269_v55, %v1658_v32  ;;  %v2249_v42 = vmul.f32 %v3940_v61, %v4687_v21  ;;  %v2285_v3 = vmul.f32 %v3943_v62, %v4872_v59  ;;  %v2926_v32 = vld [vmem:[%s3657_s1 + $0x190] sm:$0xff] }
 0x17c   : > { %3047 = vmatprep.mubr.f32.mxu0 %v2408_v12  ;;  %v2210_v33 = vadd.f32 %v5326_v37, %v2029_v45  ;;  %v2211_v7 = vadd.f32 %v5326_v37, %v2030_v6  ;;  %v2409_v1 = vadd.f32 %v4643_v51, %v2370_v34  ;;  %v2250_v57 = vmul.f32 %v3940_v61, %v4694_v58  ;;  %v2925_v6 = vld [vmem:[%s3657_s1 + $0x188] sm:$0xff] }
 0x17d   : > { %1699 = vst [vmem:[#allocation2 + $0x270] sm:$0xff] %v1659_v53  ;;  %v1868_v63 = vmul.f32 %v5269_v55, %v1659_v53  ;;  %v2286_v21 = vmul.f32 %v3943_v62, %v4875_v26  ;;  %v2317_v36 = vadd.f32 %v2285_v3, %v2249_v42  ;;  %v4959_v26 = vld [vmem:[%s5126_s10] ss:$0 sm:$0xff]  ;;  %v2909_v34 = vld [vmem:[%s3657_s1 + $0x88] sm:$0xff] }
 0x17e   : > { %v2351_v15 = vmul.f32 %v3966_v16, %v2210_v33  ;;  %v2352_v2 = vmul.f32 %v3966_v16, %v2211_v7  ;;  %3048 = vmatmul.mubr.f32.gmra.mrb[14].mxu0 %v2409_v1  ;;  %v2910_v33 = vld [vmem:[%s3657_s1 + $0x90] sm:$0xff] }
 0x180   : > { %v2383_v22 = vadd.f32 %v2351_v15, %v2315_v25  ;;  %v2384_v14 = vadd.f32 %v2352_v2, %v2316_v19 }
 0x182   : > { %v2422_v46 = vadd.f32 %v4643_v51, %v2383_v22  ;;  %v2423_v40 = vadd.f32 %v4643_v51, %v2384_v14  ;;  %v1739_v5 = vld [vmem:[#allocation2 + $0x266] sm:$0xff]  ;;  %v2928_v14 = vld [vmem:[%s3657_s1 + $0x1b0] sm:$0xff] }
 0x183   : > { %v1783_v9 = vmul.f32 %v3819_v47, %v1739_v5 }
 0x184   : > { %3068 = vmatprep.mubr.f32.mxu1 %v2422_v46  ;;  %v1947_v41 = vld [vmem:[#allocation2 + $0x26a] sm:$0xff]  ;;  %v1948_v18 = vld [vmem:[#allocation2 + $0x272] sm:$0xff] }
 0x185   : > { %v1740_v29 = vld [vmem:[#allocation2 + $0x26e] sm:$0xff]  ;;  %3069 = vmatmul.mubr.f32.gmra.mrb[12].mxu1 %v2423_v40  ;;  %v1907_v13 = vadd.f32 %v1867_v35, %v1783_v9  ;;  %v1991_v48 = vmul.f32 %v3923_v31, %v1947_v41  ;;  %v1992_v39 = vmul.f32 %v3923_v31, %v1948_v18  ;;  %v2318_v31 = vadd.f32 %v2286_v21, %v2250_v57 }
 0x186   : > { %v1784_v50 = vmul.f32 %v3819_v47, %v1740_v29  ;;  %v2927_v40 = vld [vmem:[%s3657_s1 + $0x1a8] sm:$0xff]  ;;  %v2912_v41 = vld [vmem:[%s3657_s1 + $0xb0] sm:$0xff] }
 0x187   : > { %v2031_v60 = vadd.f32 %v1991_v48, %v1907_v13  ;;  %v2911_v18 = vld [vmem:[%s3657_s1 + $0xa8] sm:$0xff] }
 0x188   : > { %v1908_v55 = vadd.f32 %v1868_v63, %v1784_v50  ;;  %v2929_v21 = vld [vmem:[%s3657_s1 + $0x1c8] sm:$0xff] }
 0x189   : > { %v2212_v59 = vadd.f32 %v5326_v37, %v2031_v60  ;;  %v2930_v60 = vld [vmem:[%s3657_s1 + $0x1d0] sm:$0xff] }
 0x18a   : > { %v2032_v28 = vadd.f32 %v1992_v39, %v1908_v55 }
 0x18b   : > { %v2353_v10 = vmul.f32 %v3966_v16, %v2212_v59 }
 0x18c   : > { %v2213_v47 = vadd.f32 %v5326_v37, %v2032_v28 }
 0x18d   : > { %v2385_v54 = vadd.f32 %v2353_v10, %v2317_v36  ;;  %v2914_v10 = vld [vmem:[%s3657_s1 + $0xd0] sm:$0xff] }
 0x18e   : > { %v2354_v11 = vmul.f32 %v3966_v16, %v2213_v47  ;;  %v2923_v16 = vld [vmem:[%s3657_s1 + $0x168] sm:$0xff] }
 0x18f   : > { %v2424_v61 = vadd.f32 %v4643_v51, %v2385_v54 }
 0x190   : > { %v2386_v58 = vadd.f32 %v2354_v11, %v2318_v31  ;;  %v2913_v11 = vld [vmem:[%s3657_s1 + $0xc8] sm:$0xff] }
 0x191   : > { %3071 = vmatprep.mubr.f32.mxu1 %v2424_v61 }
 0x192   : > { %v2425_v62 = vadd.f32 %v4643_v51, %v2386_v58  ;;  %v2908_v51 = vld [vmem:[%s3657_s1 + $0x70] sm:$0xff] }
 0x194   : > { %3072 = vmatmul.mubr.f32.gmra.mrb[14].mxu1 %v2425_v62 }
 0x1bb   : > { %v3052_v38 = vpop.f32.mrb[0].mxu1 }
 0x1bc   : > { %v2634_v27 = vadd.f32 %v3052_v38, %v4959_v26  ;;  %v2628_v24 = vpop.f32.mrb[1].mxu1  ;;  %v2916_v38 = vld [vmem:[%s3657_s1 + $0xf0] sm:$0xff] }
 0x1bd   : > { %v2629_v20 = vadd.f32 %v4959_v26, %v2628_v24  ;;  %v2915_v24 = vld [vmem:[%s3657_s1 + $0xe8] sm:$0xff] }
 0x1be   : > { %v2724_v8 = vmul.f32 %v2924_v44, %v2634_v27 }
 0x1bf   : > { %v2723_v0 = vmul.f32 %v2923_v16, %v2629_v20 }
 0x1c0   : > { %2756 = vst [vmem:[%s4966_s29 + $0x88] sm:$0xff] %v2724_v8 }
 0x1c1   : > { %2755 = vst [vmem:[%s4966_s29 + $0x80] sm:$0xff] %v2723_v0 }
 0x1c7   : > { %v3028_v30 = vpop.f32.mrb[0].mxu0 }
 0x1c8   : > { %v2554_v17 = vadd.f32 %v3028_v30, %v4959_v26  ;;  %v2548_v43 = vpop.f32.mrb[1].mxu0  ;;  %v2918_v30 = vld [vmem:[%s3657_s1 + $0x110] sm:$0xff] }
 0x1c9   : > { %v2549_v4 = vadd.f32 %v4959_v26, %v2548_v43 }
 0x1ca   : > { %v2708_v56 = vmul.f32 %v2908_v51, %v2554_v17 }
 0x1cb   : > { %v2707_v49 = vmul.f32 %v2907_v23, %v2549_v4  ;;  %v2932_v23 = vld [vmem:[%s3657_s1 + $0x1f0] sm:$0xff] }
 0x1cc   : > { %2740 = vst [vmem:[%s4966_s29 + $0x8] sm:$0xff] %v2708_v56  ;;  %v2917_v56 = vld [vmem:[%s3657_s1 + $0x108] sm:$0xff] }
 0x1cd   : > { %2739 = vst [vmem:[%s4966_s29] sm:$0xff] %v2707_v49 }
 0x1ed   : > { %v3055_v12 = vpop.f32.mrb[2].mxu1 }
 0x1ee   : > { %v2644_v45 = vadd.f32 %v3055_v12, %v4959_v26  ;;  %v2638_v52 = vpop.f32.mrb[3].mxu1  ;;  %v2931_v12 = vld [vmem:[%s3657_s1 + $0x1e8] sm:$0xff] }
 0x1ef   : > { %v2639_v25 = vadd.f32 %v4959_v26, %v2638_v52 }
 0x1f0   : > { %v2726_v53 = vmul.f32 %v2926_v32, %v2644_v45 }
 0x1f1   : > { %v2725_v37 = vmul.f32 %v2925_v6, %v2639_v25 }
 0x1f2   : > { %2758 = vst [vmem:[%s4966_s29 + $0x98] sm:$0xff] %v2726_v53 }
 0x1f3   : > { %2757 = vst [vmem:[%s4966_s29 + $0x90] sm:$0xff] %v2725_v37 }
 0x1f7   : > { %v3031_v7 = vpop.f32.mrb[2].mxu0 }
 0x1f8   : > { %v2564_v19 = vadd.f32 %v3031_v7, %v4959_v26  ;;  %v2558_v15 = vpop.f32.mrb[3].mxu0  ;;  %v2920_v7 = vld [vmem:[%s3657_s1 + $0x130] sm:$0xff] }
 0x1f9   : > { %v2559_v2 = vadd.f32 %v4959_v26, %v2558_v15  ;;  %v2919_v15 = vld [vmem:[%s3657_s1 + $0x128] sm:$0xff] }
 0x1fa   : > { %v2710_v1 = vmul.f32 %v2910_v33, %v2564_v19 }
 0x1fb   : > { %v2709_v22 = vmul.f32 %v2909_v34, %v2559_v2 }
 0x1fc   : > { %2742 = vst [vmem:[%s4966_s29 + $0x18] sm:$0xff] %v2710_v1 }
 0x1fd   : > { %2741 = vst [vmem:[%s4966_s29 + $0x10] sm:$0xff] %v2709_v22 }
 0x20f   : > { %v3058_v35 = vpop.f32.mrb[4].mxu1 }
 0x210   : > { %v2654_v46 = vadd.f32 %v3058_v35, %v4959_v26  ;;  %v2648_v5 = vpop.f32.mrb[5].mxu1 }
 0x211   : > { %v2649_v9 = vadd.f32 %v4959_v26, %v2648_v5  ;;  %v2933_v5 = vld [vmem:[%s3657_s1 + $0x208] sm:$0xff] }
 0x212   : > { %v2728_v63 = vmul.f32 %v2928_v14, %v2654_v46  ;;  %v3034_v42 = vpop.f32.mrb[4].mxu0  ;;  %v2934_v14 = vld [vmem:[%s3657_s1 + $0x210] sm:$0xff] }
 0x213   : > { %v2574_v3 = vadd.f32 %v3034_v42, %v4959_v26  ;;  %v2727_v29 = vmul.f32 %v2927_v40, %v2649_v9  ;;  %v2568_v13 = vpop.f32.mrb[5].mxu0 }
 0x214   : > { %2760 = vst [vmem:[%s4966_s29 + $0xa8] sm:$0xff] %v2728_v63  ;;  %v2569_v48 = vadd.f32 %v4959_v26, %v2568_v13  ;;  %v2921_v13 = vld [vmem:[%s3657_s1 + $0x148] sm:$0xff] }
 0x215   : > { %v2712_v50 = vmul.f32 %v2912_v41, %v2574_v3  ;;  %2759 = vst [vmem:[%s4966_s29 + $0xa0] sm:$0xff] %v2727_v29  ;;  %v2922_v3 = vld [vmem:[%s3657_s1 + $0x150] sm:$0xff] }
 0x216   : > { %v2711_v39 = vmul.f32 %v2911_v18, %v2569_v48 }
 0x217   : > { %2744 = vst [vmem:[%s4966_s29 + $0x28] sm:$0xff] %v2712_v50 }
 0x218   : > { %2743 = vst [vmem:[%s4966_s29 + $0x20] sm:$0xff] %v2711_v39 }
 0x220   : > { %v3061_v55 = vpop.f32.mrb[6].mxu1 }
 0x221   : > { %v2664_v57 = vadd.f32 %v3061_v55, %v4959_v26  ;;  %v2658_v59 = vpop.f32.mrb[7].mxu1  ;;  %v2936_v55 = vld [vmem:[%s3657_s1 + $0x230] sm:$0xff] }
 0x222   : > { %v2659_v36 = vadd.f32 %v4959_v26, %v2658_v59  ;;  %v2935_v59 = vld [vmem:[%s3657_s1 + $0x228] sm:$0xff] }
 0x223   : > { %v2730_v28 = vmul.f32 %v2930_v60, %v2664_v57 }
 0x224   : > { %v3037_v47 = vpop.f32.mrb[6].mxu0  ;;  %v2729_v54 = vmul.f32 %v2929_v21, %v2659_v36 }
 0x225   : > { %v2584_v31 = vadd.f32 %v3037_v47, %v4959_v26  ;;  %v2578_v61 = vpop.f32.mrb[7].mxu0  ;;  %2762 = vst [vmem:[%s4966_s29 + $0xb8] sm:$0xff] %v2730_v28 }
 0x226   : > { %v2579_v58 = vadd.f32 %v4959_v26, %v2578_v61  ;;  %2761 = vst [vmem:[%s4966_s29 + $0xb0] sm:$0xff] %v2729_v54 }
 0x227   : > { %v2714_v62 = vmul.f32 %v2914_v10, %v2584_v31 }
 0x228   : > { %v2713_v44 = vmul.f32 %v2913_v11, %v2579_v58  ;;  %v3040_v27 = vpop.f32.mrb[8].mxu0  ;;  %v3215_v58 = vld [vmem:[%s3657_s1 + $0x250] sm:$0xff] }
 0x229   : > { %2746 = vst [vmem:[%s4966_s29 + $0x38] sm:$0xff] %v2714_v62  ;;  %v2594_v16 = vadd.f32 %v3040_v27, %v4959_v26  ;;  %v2588_v20 = vpop.f32.mrb[9].mxu0 }
 0x22a   : > { %2745 = vst [vmem:[%s4966_s29 + $0x30] sm:$0xff] %v2713_v44  ;;  %v2589_v8 = vadd.f32 %v4959_v26, %v2588_v20  ;;  %v3216_v44 = vld [vmem:[%s3657_s1 + $0x248] sm:$0xff] }
 0x22b   : > { %v2716_v0 = vmul.f32 %v2916_v38, %v2594_v16 }
 0x22c   : > { %v2715_v51 = vmul.f32 %v2915_v24, %v2589_v8 }
 0x22d   : > { %2748 = vst [vmem:[%s4966_s29 + $0x48] sm:$0xff] %v2716_v0 }
 0x22e   : > { %2747 = vst [vmem:[%s4966_s29 + $0x40] sm:$0xff] %v2715_v51 }
 0x234   : > { %v3043_v17 = vpop.f32.mrb[10].mxu0 }
 0x235   : > { %v2604_v4 = vadd.f32 %v3043_v17, %v4959_v26  ;;  %v2598_v49 = vpop.f32.mrb[11].mxu0 }
 0x236   : > { %v3064_v43 = vpop.f32.mrb[8].mxu1  ;;  %v2599_v6 = vadd.f32 %v4959_v26, %v2598_v49 }
 0x237   : > { %v2674_v32 = vadd.f32 %v3064_v43, %v4959_v26  ;;  %v2668_v45 = vpop.f32.mrb[9].mxu1  ;;  %v2718_v25 = vmul.f32 %v2918_v30, %v2604_v4 }
 0x238   : > { %v2669_v52 = vadd.f32 %v4959_v26, %v2668_v45  ;;  %v2717_v37 = vmul.f32 %v2917_v56, %v2599_v6 }
 0x239   : > { %v2732_v53 = vmul.f32 %v2932_v23, %v2674_v32  ;;  %2750 = vst [vmem:[%s4966_s29 + $0x58] sm:$0xff] %v2718_v25 }
 0x23a   : > { %v2731_v33 = vmul.f32 %v2931_v12, %v2669_v52  ;;  %2749 = vst [vmem:[%s4966_s29 + $0x50] sm:$0xff] %v2717_v37 }
 0x23b   : > { %2764 = vst [vmem:[%s4966_s29 + $0xc8] sm:$0xff] %v2732_v53 }
 0x23c   : > { %2763 = vst [vmem:[%s4966_s29 + $0xc0] sm:$0xff] %v2731_v33 }
 0x243   : > { %v3046_v19 = vpop.f32.mrb[12].mxu0 }
 0x244   : > { %v2614_v34 = vadd.f32 %v3046_v19, %v4959_v26  ;;  %v2608_v2 = vpop.f32.mrb[13].mxu0 }
 0x245   : > { %v2609_v1 = vadd.f32 %v4959_v26, %v2608_v2 }
 0x246   : > { %v2720_v22 = vmul.f32 %v2920_v7, %v2614_v34 }
 0x247   : > { %v3067_v35 = vpop.f32.mrb[10].mxu1  ;;  %v2719_v46 = vmul.f32 %v2919_v15, %v2609_v1 }
 0x248   : > { %v2684_v40 = vadd.f32 %v3067_v35, %v4959_v26  ;;  %v2678_v9 = vpop.f32.mrb[11].mxu1  ;;  %2752 = vst [vmem:[%s4966_s29 + $0x68] sm:$0xff] %v2720_v22 }
 0x249   : > { %v2679_v63 = vadd.f32 %v4959_v26, %v2678_v9  ;;  %2751 = vst [vmem:[%s4966_s29 + $0x60] sm:$0xff] %v2719_v46 }
 0x24a   : > { %v2734_v41 = vmul.f32 %v2934_v14, %v2684_v40 }
 0x24b   : > { %v2733_v42 = vmul.f32 %v2933_v5, %v2679_v63 }
 0x24c   : > { %2766 = vst [vmem:[%s4966_s29 + $0xd8] sm:$0xff] %v2734_v41 }
 0x24d   : > { %2765 = vst [vmem:[%s4966_s29 + $0xd0] sm:$0xff] %v2733_v42 }
 0x251   : > { %v3049_v29 = vpop.f32.mrb[14].mxu0 }
 0x252   : > { %v2624_v18 = vadd.f32 %v3049_v29, %v4959_v26  ;;  %v2618_v48 = vpop.f32.mrb[15].mxu0 }
 0x253   : > { %v2619_v50 = vadd.f32 %v4959_v26, %v2618_v48 }
 0x254   : > { %v2722_v39 = vmul.f32 %v2922_v3, %v2624_v18 }
 0x255   : > { %v2721_v60 = vmul.f32 %v2921_v13, %v2619_v50 }
 0x256   : > { %2754 = vst [vmem:[%s4966_s29 + $0x78] sm:$0xff] %v2722_v39 }
 0x257   : > { %2753 = vst [vmem:[%s4966_s29 + $0x70] sm:$0xff] %v2721_v60 }
 0x258   : > { %v3070_v57 = vpop.f32.mrb[12].mxu1 }
 0x259   : > { %v2694_v21 = vadd.f32 %v3070_v57, %v4959_v26  ;;  %v2688_v36 = vpop.f32.mrb[13].mxu1 }
 0x25a   : > { %v2689_v28 = vadd.f32 %v4959_v26, %v2688_v36 }
 0x25b   : > { %v2736_v10 = vmul.f32 %v2936_v55, %v2694_v21 }
 0x25c   : > { %v2735_v47 = vmul.f32 %v2935_v59, %v2689_v28 }
 0x25d   : > { %2768 = vst [vmem:[%s4966_s29 + $0xe8] sm:$0xff] %v2736_v10 }
 0x25e   : > { %2767 = vst [vmem:[%s4966_s29 + $0xe0] sm:$0xff] %v2735_v47 }
 0x267   : > { %v3073_v31 = vpop.f32.mrb[14].mxu1 }
 0x268   : > { %v2704_v54 = vadd.f32 %v3073_v31, %v4959_v26  ;;  %v2698_v11 = vpop.f32.mrb[15].mxu1 }
 0x269   : > { %v2699_v61 = vadd.f32 %v4959_v26, %v2698_v11 }
 0x26a   : > { %v2738_v62 = vmul.f32 %v3215_v58, %v2704_v54 }
 0x26b   : > { %v2737_v38 = vmul.f32 %v3216_v44, %v2699_v61 }
 0x26c   : > { %2770 = vst [vmem:[%s4966_s29 + $0xf8] sm:$0xff] %v2738_v62 }
 0x26d   : > { %2769 = vst [vmem:[%s4966_s29 + $0xf0] sm:$0xff] %v2737_v38 }
 0x26e   : > { %3316 = shalt.err (!%p3313_p8)
}
 0x26f   : > { %s3317_s1 = scalar_lea.hbm %s5062_s30, 4096  ;;  %s3321_s11 = scalar_lea.hbm %s5328_s27, 8192 }
 0x270   : > { %p3318_p13 = scmp.ne.s32.totalorder %s5062_s30, %s3317_s1  ;;  %p3322_p7 = scmp.lt.u32.totalorder %s5062_s30, %s5328_s27 }
 0x271   : > { %p3323_p12 = scmp.lt.u32.totalorder %s3321_s11, %s3317_s1  ;;  %p3325_p3 = scmp.lt.u32.totalorder %s3317_s1, %s5062_s30 }
 0x272   : > { %p3319_p4 = pnand %p3318_p13, %p5329_p10 }
 0x273   : > { %p3324_p2 = por %p3323_p12, %p3322_p7 }
 0x274   : > { %p3320_p5 = pneg %p3319_p4 }
 0x275   : > { %p3326_p11 = por %p3325_p3, %p3324_p2 }
 0x277   : > { %p3327_p1 = pnand %p3326_p11, %p3320_p5 }
 0x279   : > { %3330 = shalt.err (!%p3327_p1)
}
 0x27a   : > { %s3398_s28 = smov 128   ;;  %s3399_s12 = smov 8  }
 0x27b   : > { %3135 = dma.vmem_to_hbm [thread:$0]  (%p5329_p10), %s5064_s22, 4096, %s5062_s30, %s2772_s20, %s3398_s28, %s3398_s28, %s3399_s12  }
 0x27c PF: > { %s5330_s23 = sld [smem:[#allocation13_spill]]  ;;  %s5331_s24 = sld [smem:[#allocation16_spill]] }
 0x27d   : > { %s5332_s15 = sld [smem:[#allocation14_spill]] }
 0x282   : > { %s2803_s29 = sand.u32 1, %s5330_s23   ;;  %p5333_p0 = scmp.ne.s32.totalorder %s5331_s24, 0 }
 0x283   : > { %p5334_p6 = scmp.ge.s32.totalorder %s5332_s15, 2  ;;  %s2804_s1 = scalar_lea.sflag [#allocation5], %s2803_s29 }
 0x285   : > { %p3149_p9 = pnand %p5334_p6, %p5333_p0 }
 0x287   : > { %3364 = dma.done.wait (!%p3149_p9), %s2804_s1, 4096  }
 0x288   : > { %3366 = vsyncadd (!%p3149_p9), %s2804_s1, 4294963200  ;;  %s28_s22 = sadd.s32 1, %s5332_s15   ;;  %s5335_s17 = smov %s3373_s18 }
 0x289   : > { %p25_p8 = scmp.ge.s32.totalorder %s28_s22, 4   ;;  %s5336_s18 = smov %s3377_s19 }
 0x28a   : > { %s5337_s19 = smov %s3648_s16  ;;  %s5338_s20 = smov %s3385_s21 }
 0x28b   : > { %s5339_s21 = smov %s5341_s26  ;;  %27 = sbr.rel (!%p25_p8) target bundleno = 10 (0xa), region = 126 }
 0x292   :  { %2809 = vsyncpa [#allocation4], 1 }
 0x293   :  { %2811 = vsyncpa [#allocation4 + $0x1], 1 }
 0x294   :  { %2812 = vsyncpa [#allocation7], 1 }
 0x295   :  { %2813 = vsyncpa [#allocation5], 1 }
 0x296   :  { %2815 = vsyncpa [#allocation5 + $0x1], 1 }

</bundles_post_ra>
